<compile_context>
chip_gen: v7x
topology: tpu7x:2x2x1
jax: 0.10.0
libtpu: 0.0.40
codegen_flags: <defaults>
</compile_context>

<pallas_src>
import math

import jax
import jax.numpy as jnp
from jax.experimental import pallas as pl
from jax.experimental.pallas import tpu as pltpu

LANE = 128
TK = 256  # adjacency K-tile: matches v6e/v7x 256-wide MXU; fine on v5e.


def _round_up(v, m):
    return (v + m - 1) // m * m


# ----------------------------------------------------------------------------
# Fused kernel (transposed orientation: channels on sublanes, nodes/edges on
# lanes).  Grid: (Np // TK,) over the adjacency contraction axis.
# ----------------------------------------------------------------------------
def fused_gnn_kernel(lw_ref, adjT_ref, xT_ref, wnT_ref, eaT_ref, weT_ref,
                     hidx_ref, tidx_ref, tc_ref,
                     axwT_ref, ewT_ref, score_ref,
                     h1h_sc, t1h_sc):
    k = pl.program_id(0)
    nk = pl.num_programs(0)

    @pl.when(k == 0)
    def _prologue():
        # Everything that does NOT depend on the finished A@xw lives here so
        # the final grid step only carries the gather + scoring.
        axwT_ref[...] = jnp.zeros_like(axwT_ref)
        # ew^T = W_edge^T @ edge_attr^T   (f32; feeds a returned output).
        ewT_ref[...] = jnp.dot(weT_ref[...], eaT_ref[...],
                               preferred_element_type=jnp.float32)
        # One-hot gather matrices, exact in bf16: h1h[n, e] = (n == head[e]).
        node_ids = jax.lax.broadcasted_iota(jnp.int32, h1h_sc.shape, 0)
        h1h_sc[...] = (node_ids == hidx_ref[...]).astype(
            jnp.float32).astype(jnp.bfloat16)
        t1h_sc[...] = (node_ids == tidx_ref[...]).astype(
            jnp.float32).astype(jnp.bfloat16)

    # Reassociated node transform: xw^T slab = W_node^T @ x^T[:, k-slab] (f32),
    # then axw^T += xw_slab^T @ A^T[k-slab, :] on the MXU with bf16 operands
    # (adjacency is {0,1} -> exact; xw rounds to bf16) and f32 accumulation
    # directly into the resident output block.
    xw_slab = jnp.dot(wnT_ref[...], xT_ref[...],
                      preferred_element_type=jnp.float32)        # (Cp, TK)
    axwT_ref[...] += jnp.dot(xw_slab.astype(jnp.bfloat16), adjT_ref[...],
                             preferred_element_type=jnp.float32)  # (Cp, Np)

    @pl.when(k == nk - 1)
    def _finalize():
        # Gather heads/tails via one-hot matmuls (exact row selection).
        axwT_bf = axwT_ref[...].astype(jnp.bfloat16)
        headsT = jnp.dot(axwT_bf, h1h_sc[...],
                         preferred_element_type=jnp.float32)      # (Cp, Ep)
        tailsT = jnp.dot(axwT_bf, t1h_sc[...],
                         preferred_element_type=jnp.float32)      # (Cp, Ep)
        # real(h * e * conj(t)) with zero imaginary parts == h * e * t  (f32 VPU).
        prod = headsT * ewT_ref[...] * tailsT                     # (Cp, Ep)
        raw = jnp.sum(prod, axis=0, keepdims=True)                # (1, Ep)
        raw = raw * tc_ref[...] * lw_ref[0]
        score_ref[...] = jax.nn.sigmoid(raw)                      # lane-dense


def gnn_model_forward(params, adj, x, edge_index, edge_attr, time_closeness):
    """Returns (axw, ew, scores) matching GNNModel.forward in eval mode."""
    f32 = jnp.float32
    N, F = x.shape
    E, Fe = edge_attr.shape
    C = params["w_node"].shape[1]

    Np = _round_up(N, TK)      # node axis (lanes), TK-tiled for the contraction
    Fp = _round_up(F, LANE)
    Fep = _round_up(Fe, LANE)
    Cp = _round_up(C, LANE)
    Ep = _round_up(E, LANE)
    nk = Np // TK

    # Zero-padded, TRANSPOSED operands.  Padding is exact: padded rows/cols
    # contribute zeros and padded edges are sliced off below.
    adjT_p = jnp.zeros((Np, Np), jnp.bfloat16).at[:N, :N].set(
        adj.T.astype(jnp.bfloat16))                    # {0,1}: exact in bf16
    xT_p = jnp.zeros((Fp, Np), f32).at[:F, :N].set(x.T.astype(f32))
    wnT_p = jnp.zeros((Cp, Fp), f32).at[:C, :F].set(params["w_node"].T)
    eaT_p = jnp.zeros((Fep, Ep), f32).at[:Fe, :E].set(edge_attr.T.astype(f32))
    weT_p = jnp.zeros((Cp, Fep), f32).at[:C, :Fe].set(params["w_edge"].T)
    hidx = jnp.zeros((1, Ep), jnp.int32).at[0, :E].set(
        edge_index[0].astype(jnp.int32))
    tidx = jnp.zeros((1, Ep), jnp.int32).at[0, :E].set(
        edge_index[1].astype(jnp.int32))
    tc_p = jnp.zeros((1, Ep), f32).at[0, :E].set(time_closeness.astype(f32))

    smem = pl.BlockSpec(memory_space=pltpu.MemorySpace.SMEM)

    axwT, ewT, score_row = pl.pallas_call(
        fused_gnn_kernel,
        out_shape=(jax.ShapeDtypeStruct((Cp, Np), f32),      # axw^T
                   jax.ShapeDtypeStruct((Cp, Ep), f32),      # ew^T
                   jax.ShapeDtypeStruct((1, Ep), f32)),      # scores (lane-dense)
        grid=(nk,),
        in_specs=[smem,                                             # lw (SMEM)
                  pl.BlockSpec((TK, Np), lambda k: (k, 0)),         # A^T k-slab
                  pl.BlockSpec((Fp, TK), lambda k: (0, k)),         # x^T k-slab
                  pl.BlockSpec((Cp, Fp), lambda k: (0, 0)),         # W_node^T
                  pl.BlockSpec((Fep, Ep), lambda k: (0, 0)),        # edge_attr^T
                  pl.BlockSpec((Cp, Fep), lambda k: (0, 0)),        # W_edge^T
                  pl.BlockSpec((1, Ep), lambda k: (0, 0)),          # head idx
                  pl.BlockSpec((1, Ep), lambda k: (0, 0)),          # tail idx
                  pl.BlockSpec((1, Ep), lambda k: (0, 0))],         # time close
        out_specs=(pl.BlockSpec((Cp, Np), lambda k: (0, 0)),
                   pl.BlockSpec((Cp, Ep), lambda k: (0, 0)),
                   pl.BlockSpec((1, Ep), lambda k: (0, 0))),
        scratch_shapes=[pltpu.VMEM((Np, Ep), jnp.bfloat16),         # head one-hot
                        pltpu.VMEM((Np, Ep), jnp.bfloat16)],        # tail one-hot
        compiler_params=pltpu.CompilerParams(
            dimension_semantics=("arbitrary",),
            vmem_limit_bytes=32 * 1024 * 1024),
    )(params["lw"], adjT_p, xT_p, wnT_p, eaT_p, weT_p, hidx, tidx, tc_p)

    axw = axwT[:C, :N].T       # tiny wrapper-side transposes (layout plumbing)
    ew = ewT[:C, :E].T
    scores = score_row[0, :E]
    return axw, ew, scores


# ----------------------------------------------------------------------------
# Deterministic parameter init (matches torch init schemes).
# ----------------------------------------------------------------------------
def xavier_uniform(key, fan_in, fan_out):
    bound = math.sqrt(6.0 / (fan_in + fan_out))
    return jax.random.uniform(key, (fan_in, fan_out), jnp.float32,
                              minval=-bound, maxval=bound)


def init_params(key, node_features, edge_features, out_channels):
    k1, k2, k3 = jax.random.split(key, 3)
    return {
        "w_node": xavier_uniform(k1, node_features, out_channels),
        "w_edge": xavier_uniform(k2, edge_features, out_channels),
        "lw": 0.1 * jax.random.normal(k3, (1,), jnp.float32),  # normal(0, 0.1)
    }


if __name__ == "__main__":
    # Shapes chosen so the adjacency contraction runs 2 K-steps of 256 (Np=512).
    N = 400
    NODE_FEATURES = 16
    EDGE_FEATURES = 8
    OUT_CHANNELS = 20
    E = 48

    key = jax.random.PRNGKey(0)
    k_adj, k_x, k_ea, k_ei, k_tc, k_p = jax.random.split(key, 6)

    adj = (jax.random.uniform(k_adj, (N, N)) < 0.3).astype(jnp.float32)
    x = jax.random.normal(k_x, (N, NODE_FEATURES), jnp.float32)
    edge_attr = jax.random.normal(k_ea, (E, EDGE_FEATURES), jnp.float32)
    edge_index = jax.random.randint(k_ei, (2, E), 0, N, jnp.int32)
    time_closeness = jax.random.uniform(k_tc, (E,), jnp.float32)

    params = init_params(k_p, NODE_FEATURES, EDGE_FEATURES, OUT_CHANNELS)

    axw1, ew1, scores = gnn_model_forward(
        params, adj, x, edge_index, edge_attr, time_closeness)
    jax.block_until_ready((axw1, ew1, scores))

    assert axw1.shape == (N, OUT_CHANNELS)
    assert ew1.shape == (E, OUT_CHANNELS)
    assert scores.shape == (E,)

    # ---- pure-f32 reference (torch semantics). The kernel's bf16 MXU operands
    #      bound the mismatch on axw-derived values to ~2^-9 relative. ----
    axw_ref = (adj @ x) @ params["w_node"]
    ew_ref = edge_attr @ params["w_edge"]
    raw_ref = jnp.sum(axw_ref[edge_index[0]] * ew_ref * axw_ref[edge_index[1]],
                      axis=-1) * (time_closeness * params["lw"][0])
    scores_ref = jax.nn.sigmoid(raw_ref)

    assert jnp.allclose(ew1, ew_ref, atol=2e-3, rtol=2e-3)        # f32 path
    assert jnp.allclose(axw1, axw_ref, atol=2e-1, rtol=2e-2)      # bf16 operands
    assert jnp.allclose(scores, scores_ref, atol=8e-2, rtol=8e-2)

    # ---- tight structural check: reference applying the SAME bf16 operand
    #      roundings the kernel applies at its MXU inputs. ----
    bf16 = jnp.bfloat16
    xw_m = x @ params["w_node"]
    axw_m = jnp.dot(adj.astype(bf16), xw_m.astype(bf16),
                    preferred_element_type=jnp.float32)
    axw_g = axw_m.astype(bf16).astype(jnp.float32)     # gather-side rounding
    raw_m = jnp.sum(axw_g[edge_index[0]] * ew_ref * axw_g[edge_index[1]],
                    axis=-1) * (time_closeness * params["lw"][0])
    scores_m = jax.nn.sigmoid(raw_m)
    assert jnp.allclose(axw1, axw_m, atol=8e-2, rtol=1e-2)
    assert jnp.allclose(scores, scores_m, atol=3e-2, rtol=3e-2)

    print("KERNEL_OK")
</pallas_src>

<mosaic_0001>
module attributes {stable_mosaic.version = 11 : i64} {
  func.func @fused_gnn_kernel(%arg0: i32, %arg1: memref<1xf32, #tpu.memory_space<smem>>, %arg2: memref<256x512xbf16, #tpu.memory_space<vmem>>, %arg3: memref<128x256xf32, #tpu.memory_space<vmem>>, %arg4: memref<128x128xf32, #tpu.memory_space<vmem>>, %arg5: memref<128x128xf32, #tpu.memory_space<vmem>>, %arg6: memref<128x128xf32, #tpu.memory_space<vmem>>, %arg7: memref<1x128xi32, #tpu.memory_space<vmem>>, %arg8: memref<1x128xi32, #tpu.memory_space<vmem>>, %arg9: memref<1x128xf32, #tpu.memory_space<vmem>>, %arg10: memref<128x512xf32, #tpu.memory_space<vmem>>, %arg11: memref<128x128xf32, #tpu.memory_space<vmem>>, %arg12: memref<1x128xf32, #tpu.memory_space<vmem>>, %arg13: memref<512x128xbf16, #tpu.memory_space<vmem>>, %arg14: memref<512x128xbf16, #tpu.memory_space<vmem>>) attributes {dimension_semantics = [#tpu.dimension_semantics<arbitrary>], iteration_bounds = array<i64: 2>, scalar_prefetch = 0 : i64, scratch_operands = 2 : i64, tpu.core_type = #tpu.core_type<tc>, window_params = [{transform_indices = @transform_0, window_bounds = array<i64: 1>}, {transform_indices = @transform_1, window_bounds = array<i64: 256, 512>}, {transform_indices = @transform_2, window_bounds = array<i64: 128, 256>}, {pipeline_mode = #tpu.pipeline_mode<synchronous>, transform_indices = @transform_3, window_bounds = array<i64: 128, 128>}, {pipeline_mode = #tpu.pipeline_mode<synchronous>, transform_indices = @transform_4, window_bounds = array<i64: 128, 128>}, {pipeline_mode = #tpu.pipeline_mode<synchronous>, transform_indices = @transform_5, window_bounds = array<i64: 128, 128>}, {pipeline_mode = #tpu.pipeline_mode<synchronous>, transform_indices = @transform_6, window_bounds = array<i64: 1, 128>}, {pipeline_mode = #tpu.pipeline_mode<synchronous>, transform_indices = @transform_7, window_bounds = array<i64: 1, 128>}, {pipeline_mode = #tpu.pipeline_mode<synchronous>, transform_indices = @transform_8, window_bounds = array<i64: 1, 128>}, {pipeline_mode = #tpu.pipeline_mode<synchronous>, transform_indices = @transform_9, window_bounds = array<i64: 128, 512>}, {pipeline_mode = #tpu.pipeline_mode<synchronous>, transform_indices = @transform_10, window_bounds = array<i64: 128, 128>}, {pipeline_mode = #tpu.pipeline_mode<synchronous>, transform_indices = @transform_11, window_bounds = array<i64: 1, 128>}]} {
    %c0_i32 = arith.constant 0 : i32
    %0 = arith.cmpi eq, %arg0, %c0_i32 : i32
    %1 = arith.extui %0 : i1 to i32
    %c0_i32_0 = arith.constant 0 : i32
    %2 = arith.cmpi ne, %1, %c0_i32_0 : i32
    scf.if %2 {
      %cst_12 = arith.constant 0.000000e+00 : f32
      %15 = vector.broadcast %cst_12 : f32 to vector<128x512xf32>
      %c0_13 = arith.constant 0 : index
      %c0_14 = arith.constant 0 : index
      %16 = vector.load %arg10[%c0_13, %c0_14] : memref<128x512xf32, #tpu.memory_space<vmem>>, vector<128x512xf32>
      tpu.vector_store %arg10[%c0_13, %c0_14], %15 {strides = array<i32>} : memref<128x512xf32, #tpu.memory_space<vmem>>, vector<128x512xf32>,
      %c0_15 = arith.constant 0 : index
      %c0_16 = arith.constant 0 : index
      %17 = vector.load %arg6[%c0_15, %c0_16] : memref<128x128xf32, #tpu.memory_space<vmem>>, vector<128x128xf32>
      %c0_17 = arith.constant 0 : index
      %c0_18 = arith.constant 0 : index
      %18 = vector.load %arg5[%c0_17, %c0_18] : memref<128x128xf32, #tpu.memory_space<vmem>>, vector<128x128xf32>
      %cst_19 = arith.constant dense<0.000000e+00> : vector<128x128xf32>
      %19 = tpu.matmul %17, %18, %cst_19 {dimension_numbers = #tpu.dot_dimension_numbers<[1], [0], [0], [1], [0, 0, 1, 1], [], []>} : vector<128x128xf32>, vector<128x128xf32>, vector<128x128xf32> -> vector<128x128xf32>
      %c0_20 = arith.constant 0 : index
      %c0_21 = arith.constant 0 : index
      %20 = vector.load %arg11[%c0_20, %c0_21] : memref<128x128xf32, #tpu.memory_space<vmem>>, vector<128x128xf32>
      tpu.vector_store %arg11[%c0_20, %c0_21], %19 {strides = array<i32>} : memref<128x128xf32, #tpu.memory_space<vmem>>, vector<128x128xf32>,
      %21 = tpu.iota {dimensions = array<i32: 0>} : vector<512x128xi32>
      %c0_22 = arith.constant 0 : index
      %c0_23 = arith.constant 0 : index
      %22 = vector.load %arg7[%c0_22, %c0_23] : memref<1x128xi32, #tpu.memory_space<vmem>>, vector<1x128xi32>
      %23 = vector.broadcast %22 : vector<1x128xi32> to vector<512x128xi32>
      %24 = arith.cmpi eq, %21, %23 : vector<512x128xi32>
      %25 = arith.extui %24 : vector<512x128xi1> to vector<512x128xi32>
      %26 = arith.sitofp %25 : vector<512x128xi32> to vector<512x128xf32>
      %27 = arith.truncf %26 : vector<512x128xf32> to vector<512x128xbf16>
      %c0_24 = arith.constant 0 : index
      %c0_25 = arith.constant 0 : index
      %28 = vector.load %arg13[%c0_24, %c0_25] : memref<512x128xbf16, #tpu.memory_space<vmem>>, vector<512x128xbf16>
      tpu.vector_store %arg13[%c0_24, %c0_25], %27 {strides = array<i32>} : memref<512x128xbf16, #tpu.memory_space<vmem>>, vector<512x128xbf16>,
      %c0_26 = arith.constant 0 : index
      %c0_27 = arith.constant 0 : index
      %29 = vector.load %arg8[%c0_26, %c0_27] : memref<1x128xi32, #tpu.memory_space<vmem>>, vector<1x128xi32>
      %30 = vector.broadcast %29 : vector<1x128xi32> to vector<512x128xi32>
      %31 = arith.cmpi eq, %21, %30 : vector<512x128xi32>
      %32 = arith.extui %31 : vector<512x128xi1> to vector<512x128xi32>
      %33 = arith.sitofp %32 : vector<512x128xi32> to vector<512x128xf32>
      %34 = arith.truncf %33 : vector<512x128xf32> to vector<512x128xbf16>
      %c0_28 = arith.constant 0 : index
      %c0_29 = arith.constant 0 : index
      %35 = vector.load %arg14[%c0_28, %c0_29] : memref<512x128xbf16, #tpu.memory_space<vmem>>, vector<512x128xbf16>
      tpu.vector_store %arg14[%c0_28, %c0_29], %34 {strides = array<i32>} : memref<512x128xbf16, #tpu.memory_space<vmem>>, vector<512x128xbf16>,
    } else {
    }
    %c0 = arith.constant 0 : index
    %c0_1 = arith.constant 0 : index
    %3 = vector.load %arg4[%c0, %c0_1] : memref<128x128xf32, #tpu.memory_space<vmem>>, vector<128x128xf32>
    %c0_2 = arith.constant 0 : index
    %c0_3 = arith.constant 0 : index
    %4 = vector.load %arg3[%c0_2, %c0_3] : memref<128x256xf32, #tpu.memory_space<vmem>>, vector<128x256xf32>
    %cst = arith.constant dense<0.000000e+00> : vector<128x256xf32>
    %5 = tpu.matmul %3, %4, %cst {dimension_numbers = #tpu.dot_dimension_numbers<[1], [0], [0], [1], [0, 0, 1, 1], [], []>} : vector<128x128xf32>, vector<128x256xf32>, vector<128x256xf32> -> vector<128x256xf32>
    %c0_4 = arith.constant 0 : index
    %c0_5 = arith.constant 0 : index
    %6 = vector.load %arg10[%c0_4, %c0_5] : memref<128x512xf32, #tpu.memory_space<vmem>>, vector<128x512xf32>
    %7 = arith.truncf %5 : vector<128x256xf32> to vector<128x256xbf16>
    %c0_6 = arith.constant 0 : index
    %c0_7 = arith.constant 0 : index
    %8 = vector.load %arg2[%c0_6, %c0_7] : memref<256x512xbf16, #tpu.memory_space<vmem>>, vector<256x512xbf16>
    %cst_8 = arith.constant dense<0.000000e+00> : vector<128x512xf32>
    %9 = tpu.matmul %7, %8, %cst_8 {dimension_numbers = #tpu.dot_dimension_numbers<[1], [0], [0], [1], [0, 0, 1, 1], [], []>} : vector<128x256xbf16>, vector<256x512xbf16>, vector<128x512xf32> -> vector<128x512xf32>
    %10 = arith.addf %6, %9 : vector<128x512xf32>
    %c0_9 = arith.constant 0 : index
    %c0_10 = arith.constant 0 : index
    %11 = vector.load %arg10[%c0_9, %c0_10] : memref<128x512xf32, #tpu.memory_space<vmem>>, vector<128x512xf32>
    tpu.vector_store %arg10[%c0_9, %c0_10], %10 {strides = array<i32>} : memref<128x512xf32, #tpu.memory_space<vmem>>, vector<128x512xf32>,
    %c1_i32 = arith.constant 1 : i32
    %12 = arith.cmpi eq, %arg0, %c1_i32 : i32
    %13 = arith.extui %12 : i1 to i32
    %c0_i32_11 = arith.constant 0 : i32
    %14 = arith.cmpi ne, %13, %c0_i32_11 : i32
    scf.if %14 {
      %c0_12 = arith.constant 0 : index
      %c0_13 = arith.constant 0 : index
      %15 = vector.load %arg10[%c0_12, %c0_13] : memref<128x512xf32, #tpu.memory_space<vmem>>, vector<128x512xf32>
      %16 = arith.truncf %15 : vector<128x512xf32> to vector<128x512xbf16>
      %c0_14 = arith.constant 0 : index
      %c0_15 = arith.constant 0 : index
      %17 = vector.load %arg13[%c0_14, %c0_15] : memref<512x128xbf16, #tpu.memory_space<vmem>>, vector<512x128xbf16>
      %cst_16 = arith.constant dense<0.000000e+00> : vector<128x128xf32>
      %18 = tpu.matmul %16, %17, %cst_16 {dimension_numbers = #tpu.dot_dimension_numbers<[1], [0], [0], [1], [0, 0, 1, 1], [], []>} : vector<128x512xbf16>, vector<512x128xbf16>, vector<128x128xf32> -> vector<128x128xf32>
      %c0_17 = arith.constant 0 : index
      %c0_18 = arith.constant 0 : index
      %19 = vector.load %arg14[%c0_17, %c0_18] : memref<512x128xbf16, #tpu.memory_space<vmem>>, vector<512x128xbf16>
      %cst_19 = arith.constant dense<0.000000e+00> : vector<128x128xf32>
      %20 = tpu.matmul %16, %19, %cst_19 {dimension_numbers = #tpu.dot_dimension_numbers<[1], [0], [0], [1], [0, 0, 1, 1], [], []>} : vector<128x512xbf16>, vector<512x128xbf16>, vector<128x128xf32> -> vector<128x128xf32>
      %c0_20 = arith.constant 0 : index
      %c0_21 = arith.constant 0 : index
      %21 = vector.load %arg11[%c0_20, %c0_21] : memref<128x128xf32, #tpu.memory_space<vmem>>, vector<128x128xf32>
      %22 = arith.mulf %18, %21 : vector<128x128xf32>
      %23 = arith.mulf %22, %20 : vector<128x128xf32>
      %cst_22 = arith.constant dense<0.000000e+00> : vector<128xf32>
      %24 = vector.multi_reduction <add>, %23, %cst_22 [0] : vector<128x128xf32> to vector<128xf32>
      %25 = vector.shape_cast %24 : vector<128xf32> to vector<1x128xf32>
      %c0_23 = arith.constant 0 : index
      %c0_24 = arith.constant 0 : index
      %26 = vector.load %arg9[%c0_23, %c0_24] : memref<1x128xf32, #tpu.memory_space<vmem>>, vector<1x128xf32>
      %27 = arith.mulf %25, %26 : vector<1x128xf32>
      %c0_25 = arith.constant 0 : index
      %28 = memref.load %arg1[%c0_25] : memref<1xf32, #tpu.memory_space<smem>>
      %29 = vector.broadcast %28 : f32 to vector<1x128xf32>
      %30 = arith.mulf %27, %29 : vector<1x128xf32>
      %31 = arith.negf %30 : vector<1x128xf32>
      %32 = math.exp %31 : vector<1x128xf32>
      %cst_26 = arith.constant 1.000000e+00 : f32
      %33 = vector.broadcast %cst_26 : f32 to vector<1x128xf32>
      %34 = arith.addf %33, %32 : vector<1x128xf32>
      %35 = arith.divf %33, %34 : vector<1x128xf32>
      %c0_27 = arith.constant 0 : index
      %c0_28 = arith.constant 0 : index
      %36 = vector.load %arg12[%c0_27, %c0_28] : memref<1x128xf32, #tpu.memory_space<vmem>>, vector<1x128xf32>
      tpu.vector_store %arg12[%c0_27, %c0_28], %35 {strides = array<i32>} : memref<1x128xf32, #tpu.memory_space<vmem>>, vector<1x128xf32>,
    } else {
    }
    return
  }
  func.func @transform_0(%arg0: i32) -> i32 {
    %c0_i32 = arith.constant 0 : i32
    %c0_i32_0 = arith.constant 0 : i32
    return %c0_i32 : i32
  }
  func.func @transform_1(%arg0: i32) -> (i32, i32) {
    %c0_i32 = arith.constant 0 : i32
    %c0_i32_0 = arith.constant 0 : i32
    return %arg0, %c0_i32 : i32, i32
  }
  func.func @transform_2(%arg0: i32) -> (i32, i32) {
    %c0_i32 = arith.constant 0 : i32
    %c0_i32_0 = arith.constant 0 : i32
    return %c0_i32, %arg0 : i32, i32
  }
  func.func @transform_3(%arg0: i32) -> (i32, i32) {
    %c0_i32 = arith.constant 0 : i32
    %c0_i32_0 = arith.constant 0 : i32
    %c0_i32_1 = arith.constant 0 : i32
    return %c0_i32, %c0_i32_0 : i32, i32
  }
  func.func @transform_4(%arg0: i32) -> (i32, i32) {
    %c0_i32 = arith.constant 0 : i32
    %c0_i32_0 = arith.constant 0 : i32
    %c0_i32_1 = arith.constant 0 : i32
    return %c0_i32, %c0_i32_0 : i32, i32
  }
  func.func @transform_5(%arg0: i32) -> (i32, i32) {
    %c0_i32 = arith.constant 0 : i32
    %c0_i32_0 = arith.constant 0 : i32
    %c0_i32_1 = arith.constant 0 : i32
    return %c0_i32, %c0_i32_0 : i32, i32
  }
  func.func @transform_6(%arg0: i32) -> (i32, i32) {
    %c0_i32 = arith.constant 0 : i32
    %c0_i32_0 = arith.constant 0 : i32
    %c0_i32_1 = arith.constant 0 : i32
    return %c0_i32, %c0_i32_0 : i32, i32
  }
  func.func @transform_7(%arg0: i32) -> (i32, i32) {
    %c0_i32 = arith.constant 0 : i32
    %c0_i32_0 = arith.constant 0 : i32
    %c0_i32_1 = arith.constant 0 : i32
    return %c0_i32, %c0_i32_0 : i32, i32
  }
  func.func @transform_8(%arg0: i32) -> (i32, i32) {
    %c0_i32 = arith.constant 0 : i32
    %c0_i32_0 = arith.constant 0 : i32
    %c0_i32_1 = arith.constant 0 : i32
    return %c0_i32, %c0_i32_0 : i32, i32
  }
  func.func @transform_9(%arg0: i32) -> (i32, i32) {
    %c0_i32 = arith.constant 0 : i32
    %c0_i32_0 = arith.constant 0 : i32
    %c0_i32_1 = arith.constant 0 : i32
    return %c0_i32, %c0_i32_0 : i32, i32
  }
  func.func @transform_10(%arg0: i32) -> (i32, i32) {
    %c0_i32 = arith.constant 0 : i32
    %c0_i32_0 = arith.constant 0 : i32
    %c0_i32_1 = arith.constant 0 : i32
    return %c0_i32, %c0_i32_0 : i32, i32
  }
  func.func @transform_11(%arg0: i32) -> (i32, i32) {
    %c0_i32 = arith.constant 0 : i32
    %c0_i32_0 = arith.constant 0 : i32
    %c0_i32_1 = arith.constant 0 : i32
    return %c0_i32, %c0_i32_0 : i32, i32
  }
}

</mosaic_0001>

<bundles_post_ra>
// kernel: tpu_custom_call.1
= control target key start
LH: loop header
LB: loop body
LE: loop exit
PB: predicated region body
PF: predicated region fallthrough
CT: control target
= control target key end

     0   :  { %s6505_s0 = inlined_call_operand.<no memory space> [shape: f32[1], index: 0, kind: input, shape index: {}]   ;;  %s6506_s1 = inlined_call_operand.hbm [shape: bf16[512,512], index: 1, kind: input, shape index: {}]   ;;  %s6507_s2 = inlined_call_operand.hbm [shape: f32[128,512], index: 2, kind: input, shape index: {}]   ;;  %s6508_s3 = inlined_call_operand.hbm [shape: f32[128,128], index: 3, kind: input, shape index: {}]   ;;  %s6509_s4 = inlined_call_operand.hbm [shape: f32[128,128], index: 4, kind: input, shape index: {}]   ;;  %s6510_s5 = inlined_call_operand.hbm [shape: f32[128,128], index: 5, kind: input, shape index: {}]   ;;  %s6511_s6 = inlined_call_operand.vmem [shape: s32[1,128], index: 6, kind: input, shape index: {}]   ;;  %s6512_s7 = inlined_call_operand.vmem [shape: s32[1,128], index: 7, kind: input, shape index: {}]   ;;  %s6513_s8 = inlined_call_operand.vmem [shape: f32[1,128], index: 8, kind: input, shape index: {}]   ;;  %s6514_s9 = inlined_call_operand.hbm [shape: f32[128,512], index: 9, kind: output, shape index: {0}]   ;;  %s6515_s10 = inlined_call_operand.hbm [shape: f32[128,128], index: 10, kind: output, shape index: {1}]   ;;  %s6516_s11 = inlined_call_operand.hbm [shape: f32[1,128], index: 11, kind: output, shape index: {2}]  }
   0x1   :  { %6652 = sst [smem:[#allocation98_spill]] %s6506_s1 }
   0x2   :  { %6653 = sst [smem:[#allocation99_spill]] %s6508_s3 }
   0x3   :  { %6654 = sst [smem:[#allocation100_spill]] %s6509_s4 }
   0x4   :  { %6655 = sst [smem:[#allocation101_spill]] %s6514_s9 }
   0x5   :  { %6656 = sst [smem:[#allocation102_spill]] %s6516_s11 }
   0x6   :  { %17 = sst [smem:[#allocation4]] %s6505_s0 }
   0x7   :  { %18 = vsyncpa [#allocation6], 0 }
   0x8   :  { %20 = vsyncpa [#allocation6 + $0x1], 0 }
   0x9   :  { %21 = vsyncpa [#allocation9], 0 }
   0xa   :  { %23 = vsyncpa [#allocation9 + $0x1], 0 }
   0xb   :  { %24 = vsyncpa [#allocation12], 0 }
   0xc   :  { %25 = vsyncpa [#allocation7], 0 }
   0xd   :  { %26 = vsyncpa [#allocation16], 0  ;;  %s4391_s19 = smov 0   ;;  %s4393_s20 = smov 0  }
   0xe   :  { %s4395_s21 = smov 0   ;;  %s4397_s22 = smov 0  }
   0xf LB: > { %s4410_s0 = sadd.s32 4294967295, %s4307_s22   ;;  %p73_p0 = scmp.ne.s32.totalorder %s4299_s20, %s4295_s19  ;;  %s4307_s22 = sphi %s4397_s22, %s6941_s22   ;;  %s4303_s21 = sphi %s4395_s21, %s6940_s21   ;;  %s4299_s20 = sphi %s4393_s20, %s6939_s20   ;;  %s4295_s19 = sphi %s4391_s19, %s6938_s19  }
  0x10   : > { %p6517_p1 = scmp.eq.s32.totalorder %s4410_s0, 0  ;;  %p3141_p2 = scmp.ge.s32.totalorder %s4307_s22, 1 }
  0x11   : > { %p299_p3 = scmp.lt.s32.totalorder %s4307_s22, 3  ;;  %s4309_s25 = smov [#allocation10]  }
  0x12   : > { %p4419_p5 = por %p6517_p1, %p73_p0  ;;  %s314_s26 = sshll.u32 %s4309_s25, 4  ;;  %s4427_s26 = int_to_ptr.vmem [resolvable:$true] %s314_s26 }
  0x13   : > { %p4423_p6 = pnand %p3141_p2, %p299_p3  ;;  %s4310_s28 = smov [#allocation11]  }
  0x14   : > { %s6657_s23 = scalar_select %p4419_p5, 1, 0 }
  0x15   : > { %s6658_s24 = scalar_select %p4423_p6, 1, 0 }
  0x16   : > { %p3851_p7 = pneg %p4423_p6  ;;  %s327_s29 = sshll.u32 %s4310_s28, 4  ;;  %s4437_s29 = int_to_ptr.vmem [resolvable:$true] %s327_s29 }
  0x17   : > { %s4311_s30 = smov [#allocation13]   ;;  %s6660_s3 = sld [smem:[#allocation99_spill]] }
  0x18   : > { %p4433_p8 = pnand %p3851_p7, %p6517_p1  ;;  %s4439_s12 = sshll.u32 %s4311_s30, 4  ;;  %s341_s12 = int_to_ptr.vmem [resolvable:$true] %s4439_s12 }
  0x1a   : > { %p4449_p10 = pneg %p4433_p8 }
  0x1d   : > { %s4031_s15 = scalar_lea.hbm %s6660_s3, 2048 }
  0x1e   : > { %p4032_p9 = scmp.ne.s32.totalorder %s6660_s3, %s4031_s15  ;;  %p4038_p13 = scmp.lt.u32.totalorder %s4031_s15, %s6660_s3 }
  0x20   : > { %p4034_p11 = pnand %p4449_p10, %p4032_p9 }
  0x22   : > { %p4035_p12 = pneg %p4034_p11 }
  0x24   : > { %p4040_p0 = pnand %p4038_p13, %p4035_p12 }
  0x26   : > { %4043 = shalt.err (!%p4040_p0)
}
  0x27   : > { %s4044_s28 = scalar_lea.vmem %s4427_s26, 2048  ;;  %p4052_p4 = scmp.lt.s32.totalorder %s4427_s26, %s4427_s26 }
  0x28   : > { %p4045_p2 = scmp.ne.s32.totalorder %s4427_s26, %s4044_s28  ;;  %p4053_p1 = scmp.lt.s32.totalorder %s4044_s28, %s4044_s28 }
  0x2a   : > { %p4047_p3 = pnand %p4045_p2, %p4449_p10  ;;  %p4054_p9 = por %p4053_p1, %p4052_p4 }
  0x2c   : > { %p4048_p7 = pneg %p4047_p3 }
  0x2e   : > { %p4055_p11 = pnand %p4054_p9, %p4048_p7 }
  0x30   : > { %4058 = shalt.err (!%p4055_p11)
}
  0x31   : > { %s4312_s30 = smov 128   ;;  %s4313_s13 = smov 8  }
  0x32   : > { %3854 = dma.hbm_to_vmem [thread:$0]  (!%p4433_p8), %s6660_s3, 2048, %s4427_s26, [#allocation9], %s4312_s30, %s4312_s30, %s4313_s13  }
  0x33   : > { %s6662_s4 = sld [smem:[#allocation100_spill]] }
  0x39   : > { %s4059_s19 = scalar_lea.hbm %s6662_s4, 2048 }
  0x3a   : > { %p4060_p1 = scmp.ne.s32.totalorder %s6662_s4, %s4059_s19  ;;  %p4066_p13 = scmp.lt.u32.totalorder %s4059_s19, %s6662_s4 }
  0x3c   : > { %p4062_p4 = pnand %p4060_p1, %p4449_p10 }
  0x3e   : > { %p4063_p12 = pneg %p4062_p4 }
  0x40   : > { %p4068_p0 = pnand %p4066_p13, %p4063_p12 }
  0x42   : > { %4071 = shalt.err (!%p4068_p0)
}
  0x43   : > { %s4072_s26 = scalar_lea.vmem %s4437_s29, 2048  ;;  %p4080_p9 = scmp.lt.s32.totalorder %s4437_s29, %s4437_s29 }
  0x44   : > { %p4073_p2 = scmp.ne.s32.totalorder %s4437_s29, %s4072_s26  ;;  %p4081_p11 = scmp.lt.s32.totalorder %s4072_s26, %s4072_s26 }
  0x46   : > { %p4075_p3 = pnand %p4073_p2, %p4449_p10  ;;  %p4082_p1 = por %p4081_p11, %p4080_p9 }
  0x48   : > { %p4076_p7 = pneg %p4075_p3 }
  0x4a   : > { %p4083_p4 = pnand %p4082_p1, %p4076_p7 }
  0x4c   : > { %4086 = shalt.err (!%p4083_p4)
}
  0x4d   : > { %3857 = dma.hbm_to_vmem [thread:$0]  (!%p4433_p8), %s6662_s4, 2048, %s4437_s29, [#allocation12], %s4312_s30, %s4312_s30, %s4313_s13  }
  0x4e   : > { %s4087_s16 = scalar_lea.hbm %s6510_s5, 2048 }
  0x4f   : > { %p4088_p12 = scmp.ne.s32.totalorder %s6510_s5, %s4087_s16  ;;  %p4094_p2 = scmp.lt.u32.totalorder %s4087_s16, %s6510_s5 }
  0x51   : > { %p4090_p13 = pnand %p4088_p12, %p4449_p10 }
  0x53   : > { %p4091_p0 = pneg %p4090_p13 }
  0x55   : > { %p4096_p3 = pnand %p4094_p2, %p4091_p0 }
  0x57   : > { %4099 = shalt.err (!%p4096_p3)
}
  0x58   : > { %s4100_s26 = scalar_lea.vmem %s341_s12, 2048  ;;  %p4108_p1 = scmp.lt.s32.totalorder %s341_s12, %s341_s12 }
  0x59   : > { %p4101_p7 = scmp.ne.s32.totalorder %s341_s12, %s4100_s26  ;;  %p4109_p4 = scmp.lt.s32.totalorder %s4100_s26, %s4100_s26 }
  0x5b   : > { %p4103_p9 = pnand %p4101_p7, %p4449_p10  ;;  %p4110_p5 = por %p4109_p4, %p4108_p1 }
  0x5d   : > { %p4104_p11 = pneg %p4103_p9 }
  0x5f   : > { %p4111_p6 = pnand %p4110_p5, %p4104_p11 }
  0x61   : > { %4114 = shalt.err (!%p4111_p6)
}
  0x62   : > { %3860 = dma.hbm_to_vmem [thread:$0]  (!%p4433_p8), %s6510_s5, 2048, %s341_s12, [#allocation12], %s4312_s30, %s4312_s30, %s4313_s13  }
  0x63   : > { %s4522_s18 = sadd.s32 1, %s4307_s22   ;;  %s60_s11 = sadd.s32 1, %s4303_s21 }
  0x64   : > { %s57_s27 = ssub.s32 %s4307_s22, %s4522_s18  ;;  %p67_p6 = scmp.ne.s32.totalorder %s4303_s21, %s4299_s20 }
  0x65   : > { %p58_p5 = scmp.eq.s32.totalorder %s57_s27, 0  ;;  %p68_p10 = scmp.eq.s32.totalorder %s4307_s22, 0 }
  0x66   : > { %p3871_p12 = scmp.lt.s32.totalorder %s4307_s22, 2  ;;  %s4535_s15 = sand.u32 1, %s4303_s21  }
  0x67   : > { %s4532_s14 = scalar_select %p58_p5, %s4303_s21, %s60_s11  }
  0x68   : > { %p69_p13 = por %p68_p10, %p67_p6  ;;  %s3146_s16 = sshll.u32 %s4535_s15, 9 }
  0x69   : > { %s3365_s17 = sshll.u32 %s4307_s22, 13  ;;  %s6663_s1 = sld [smem:[#allocation98_spill]] }
  0x6a   : > { %s367_s19 = scalar_lea.vmem [#allocation5], %s3146_s16  ;;  %p4546_p8 = pnand %p3871_p12, %p69_p13 }
  0x6b   : > { %s375_s25 = sshll.u32 %s367_s19, 4  ;;  %s3150_s26 = sshll.u32 %s4535_s15, 8  ;;  %s4544_s25 = int_to_ptr.vmem [resolvable:$true] %s375_s25 }
  0x6c   : > { %s364_s29 = scalar_lea.sflag [#allocation6], %s4535_s15  ;;  %p4117_p2 = pneg %p4546_p8 }
  0x6f   : > { %s4542_s13 = scalar_lea.hbm %s6663_s1, %s3365_s17  ;;  %s4120_s16 = scalar_lea.hbm %s6663_s1, 16384 }
  0x70   : > { %s4115_s9 = scalar_lea.hbm %s4542_s13, 8192  ;;  %p4121_p9 = scmp.lt.u32.totalorder %s4542_s13, %s6663_s1 }
  0x71   : > { %p4116_p0 = scmp.ne.s32.totalorder %s4542_s13, %s4115_s9  ;;  %p4122_p11 = scmp.lt.u32.totalorder %s4120_s16, %s4115_s9 }
  0x72   : > { %p4124_p4 = scmp.lt.u32.totalorder %s4115_s9, %s4542_s13 }
  0x73   : > { %p4118_p3 = pnand %p4117_p2, %p4116_p0  ;;  %p4123_p1 = por %p4122_p11, %p4121_p9 }
  0x75   : > { %p4119_p7 = pneg %p4118_p3  ;;  %p4125_p5 = por %p4124_p4, %p4123_p1 }
  0x77   : > { %p4126_p6 = pnand %p4125_p5, %p4119_p7 }
  0x79   : > { %4129 = shalt.err (!%p4126_p6)
}
  0x7a   : > { %s4130_s30 = scalar_lea.vmem %s4544_s25, 8192  ;;  %s4314_s19 = smov [#allocation5]  }
  0x7b   : > { %p4131_p10 = scmp.ne.s32.totalorder %s4544_s25, %s4130_s30  ;;  %s4135_s27 = sshll.u32 %s4314_s19, 4  ;;  %s4136_s27 = int_to_ptr.vmem [resolvable:$false] %s4135_s27 }
  0x7c   : > { %s4137_s11 = scalar_lea.vmem %s4136_s27, 16384  ;;  %p4138_p0 = scmp.lt.s32.totalorder %s4544_s25, %s4136_s27 }
  0x7d   : > { %p4133_p12 = pnand %p4131_p10, %p4117_p2  ;;  %p4139_p3 = scmp.lt.s32.totalorder %s4137_s11, %s4130_s30 }
  0x7f   : > { %p4134_p13 = pneg %p4133_p12  ;;  %p4140_p9 = por %p4139_p3, %p4138_p0 }
  0x81   : > { %p4141_p11 = pnand %p4140_p9, %p4134_p13 }
  0x83   : > { %4144 = shalt.err (!%p4141_p11)
}
  0x84   : > { %s4315_s9 = smov 256   ;;  %s4316_s16 = smov 16  }
  0x85   : > { %3864 = dma.hbm_to_vmem [thread:$0]  (!%p4546_p8), %s4542_s13, 8192, %s4544_s25, %s364_s29, %s4315_s9, %s4315_s9, %s4316_s16  }
  0x86   : > { %s385_s17 = sand.u32 1, %s4307_s22   ;;  %s389_s12 = scalar_lea.vmem [#allocation8], %s3150_s26 }
  0x87   : > { %s396_s30 = sshll.u32 %s389_s12, 4  ;;  %s3366_s19 = sshll.u32 %s4307_s22, 8  ;;  %s4585_s30 = int_to_ptr.vmem [resolvable:$true] %s396_s30 }
  0x88   : > { %s4591_s1 = scalar_lea.hbm %s6507_s2, %s3366_s19  ;;  %s4593_s3 = scalar_lea.sflag [#allocation9], %s385_s17 }
  0x89   : > { %s4145_s4 = scalar_lea.hbm %s4591_s1, 4096  ;;  %s4150_s22 = scalar_lea.hbm %s6507_s2, 8192 }
  0x8a   : > { %p4146_p7 = scmp.ne.s32.totalorder %s4591_s1, %s4145_s4  ;;  %p4151_p5 = scmp.lt.u32.totalorder %s4591_s1, %s6507_s2 }
  0x8b   : > { %p4152_p6 = scmp.lt.u32.totalorder %s4150_s22, %s4145_s4  ;;  %p4154_p12 = scmp.lt.u32.totalorder %s4145_s4, %s4591_s1 }
  0x8c   : > { %p4148_p1 = pnand %p4146_p7, %p4117_p2 }
  0x8d   : > { %p4153_p10 = por %p4152_p6, %p4151_p5 }
  0x8e   : > { %p4149_p4 = pneg %p4148_p1 }
  0x8f   : > { %p4155_p13 = por %p4154_p12, %p4153_p10 }
  0x91   : > { %p4156_p0 = pnand %p4155_p13, %p4149_p4 }
  0x93   : > { %4159 = shalt.err (!%p4156_p0)
}
  0x94   : > { %s4160_s29 = scalar_lea.vmem %s4585_s30, 4096  ;;  %s4317_s17 = smov [#allocation8]  }
  0x95   : > { %p4161_p3 = scmp.ne.s32.totalorder %s4585_s30, %s4160_s29  ;;  %s4165_s12 = sshll.u32 %s4317_s17, 4  ;;  %s4166_s12 = int_to_ptr.vmem [resolvable:$false] %s4165_s12 }
  0x96   : > { %s4167_s19 = scalar_lea.vmem %s4166_s12, 8192  ;;  %p4168_p7 = scmp.lt.s32.totalorder %s4585_s30, %s4166_s12 }
  0x97   : > { %p4163_p9 = pnand %p4161_p3, %p4117_p2  ;;  %p4169_p1 = scmp.lt.s32.totalorder %s4167_s19, %s4160_s29 }
  0x99   : > { %p4164_p11 = pneg %p4163_p9  ;;  %p4170_p5 = por %p4169_p1, %p4168_p7 }
  0x9b   : > { %p4171_p6 = pnand %p4170_p5, %p4164_p11 }
  0x9d   : > { %4174 = shalt.err (!%p4171_p6)
}
  0x9e   : > { %s4318_s4 = smov 512   ;;  %p6665_p2 = scmp.ne.s32.totalorder %s6658_s24, 0 }
  0x9f   : > { %3867 = dma.hbm_to_vmem [thread:$0]  (!%p4546_p8), %s4591_s1, 4096, %s4585_s30, %s4593_s3, %s4318_s4, %s4315_s9, %s4316_s16  }
  0xa0   : > { %408 = sbr.rel (%p6665_p2) target bundleno = 1463 (0x5b7), region = 56  ;;  %s410_s27 = sand.u32 (!%p6665_p2), 1, %s4299_s20  }
  0xa1   : > { %s3154_s11 = sshll.u32 (!%p6665_p2), %s410_s27, 9  ;;  %s411_s15 = scalar_lea.sflag (!%p6665_p2), [#allocation6], %s410_s27 }
  0xa2   : > { %s4624_s13 = scalar_lea.vmem (!%p6665_p2), [#allocation5], %s3154_s11  ;;  %p6666_p4 = scmp.ne.s32.totalorder (!%p6665_p2), %s6657_s23, 0 }
  0xa7   : > { %4270 = dma.done.wait (%p6666_p4), %s411_s15, 8192  }
  0xa8   : > { %4272 = vsyncadd (%p6666_p4), %s411_s15, 4294959104  ;;  %s419_s28 = sand.u32 1, %s4410_s0   ;;  %s3155_s22 = sshll.u32 %s410_s27, 8 }
  0xa9   : > { %s420_s1 = scalar_lea.sflag [#allocation9], %s419_s28  ;;  %s4631_s3 = scalar_lea.vmem [#allocation8], %s3155_s22 }
  0xaa   : > { %4274 = dma.done.wait (%p6666_p4), %s420_s1, 4096  }
  0xab   : > { %4276 = vsyncadd (%p6666_p4), %s420_s1, 4294963200  ;;  %p6667_p8 = scmp.eq.s32.totalorder %s4410_s0, 0 }
  0xad   : > { %4278 = dma.done.wait (%p6667_p8), [#allocation9], 2048   ;;  %p6668_p10 = pmov %p6667_p8 }
  0xae   : > { %p6669_p12 = pmov %p6667_p8 }
  0xaf   : > { %4280 = vsyncadd (%p6668_p10), [#allocation9], 4294965248 }
  0xb0   : > { %4282 = dma.done.wait (%p6669_p12), [#allocation12], 4096   ;;  %p6670_p13 = pmov %p6667_p8 }
  0xb1   : > { %p6671_p0 = scmp.ne.s32.totalorder %s4410_s0, 0 }
  0xb2   : > { %4284 = vsyncadd (%p6670_p13), [#allocation12], 4294963200 }
  0xb3   : > { %480 = sbr.rel (%p6671_p0) target bundleno = 447 (0x1bf), region = 80 }
  0xba   : > { %v4647_v0 = vld [vmem:[#allocation11] sm:$0xff]  ;;  %v4649_v1 = vld [vmem:[#allocation11 + $0x8] sm:$0xff]  ;;  %v4651_v2 = vld [vmem:[#allocation11 + $0x10] sm:$0xff]  ;;  %v6522_v3 = vmov 0.0   ;;  %v738_v41 = vlaneseq }
  0xbb   : > { %481 = vst [vmem:[#allocation14] sm:$0xff] %v6522_v3  ;;  %482 = vst [vmem:[#allocation14 + $0x8] sm:$0xff] %v6522_v3  ;;  %v3711_v4 = vpack.c.bf16 %v4649_v1, %v4647_v0  ;;  %v564_v5 = vld [vmem:[#allocation11 + $0x18] sm:$0xff]  ;;  %v565_v7 = vld [vmem:[#allocation11 + $0x20] sm:$0xff] }
  0xbc   : > { %483 = vst [vmem:[#allocation14 + $0x10] sm:$0xff] %v6522_v3  ;;  %484 = vst [vmem:[#allocation14 + $0x18] sm:$0xff] %v6522_v3  ;;  %v3715_v6 = vpack.c.bf16 %v564_v5, %v4651_v2  ;;  %v566_v8 = vld [vmem:[#allocation11 + $0x28] sm:$0xff]  ;;  %v545_v10 = vld [vmem:[#allocation13] sm:$0xff]  ;;  %v4720_v42 = vshrl.u32 %v738_v41, 7 }
  0xbd   : > { %485 = vst [vmem:[#allocation14 + $0x20] sm:$0xff] %v6522_v3  ;;  %486 = vst [vmem:[#allocation14 + $0x28] sm:$0xff] %v6522_v3  ;;  %3712 = vmatprep.subr.bf16.mxu0 %v3711_v4  ;;  %3775 = vmatprep.subr.bf16.mxu1 %v3711_v4  ;;  %v3719_v9 = vpack.c.bf16 %v566_v8, %v565_v7  ;;  %v553_v11 = vld [vmem:[#allocation13 + $0x40] sm:$0xff]  ;;  %v567_v12 = vld [vmem:[#allocation11 + $0x30] sm:$0xff] }
  0xbe   : > { %487 = vst [vmem:[#allocation14 + $0x30] sm:$0xff] %v6522_v3  ;;  %488 = vst [vmem:[#allocation14 + $0x38] sm:$0xff] %v6522_v3  ;;  %3714 = vmatpush3.bf16.msra.mxu0 %v3711_v4  ;;  %3783 = vmatpush3.bf16.msra.mxu1 %v3711_v4  ;;  %v568_v13 = vld [vmem:[#allocation11 + $0x38] sm:$0xff]  ;;  %v569_v15 = vld [vmem:[#allocation11 + $0x40] sm:$0xff]  ;;  %v4723_v43 = vadd.s32 8, %v4720_v42  ;;  %v4726_v44 = vadd.s32 16, %v4720_v42 }
  0xbf   : > { %489 = vst [vmem:[#allocation14 + $0x40] sm:$0xff] %v6522_v3  ;;  %490 = vst [vmem:[#allocation14 + $0x48] sm:$0xff] %v6522_v3  ;;  %3716 = vmatprep.subr.bf16.mxu0 %v3715_v6  ;;  %3776 = vmatprep.subr.bf16.mxu1 %v3715_v6  ;;  %v3723_v14 = vpack.c.bf16 %v568_v13, %v567_v12  ;;  %v570_v16 = vld [vmem:[#allocation11 + $0x48] sm:$0xff]  ;;  %v571_v18 = vld [vmem:[#allocation11 + $0x50] sm:$0xff]  ;;  %v4729_v45 = vadd.s32 24, %v4720_v42  ;;  %v4732_v46 = vadd.s32 32, %v4720_v42 }
  0xc0   : > { %491 = vst [vmem:[#allocation14 + $0x50] sm:$0xff] %v6522_v3  ;;  %492 = vst [vmem:[#allocation14 + $0x58] sm:$0xff] %v6522_v3  ;;  %3687 = vmatprep.mubr.f32.mxu0 %v545_v10  ;;  %3699 = vmatprep.mubr.f32.mxu1 %v553_v11  ;;  %v3727_v17 = vpack.c.bf16 %v570_v16, %v569_v15  ;;  %v572_v19 = vld [vmem:[#allocation11 + $0x58] sm:$0xff]  ;;  %v573_v21 = vld [vmem:[#allocation11 + $0x60] sm:$0xff]  ;;  %v4735_v47 = vadd.s32 40, %v4720_v42  ;;  %v4738_v48 = vadd.s32 48, %v4720_v42 }
  0xc1   : > { %493 = vst [vmem:[#allocation14 + $0x60] sm:$0xff] %v6522_v3  ;;  %494 = vst [vmem:[#allocation14 + $0x68] sm:$0xff] %v6522_v3  ;;  %v3731_v20 = vpack.c.bf16 %v572_v19, %v571_v18  ;;  %v574_v22 = vld [vmem:[#allocation11 + $0x68] sm:$0xff]  ;;  %v575_v24 = vld [vmem:[#allocation11 + $0x70] sm:$0xff]  ;;  %v4741_v49 = vadd.s32 56, %v4720_v42  ;;  %v4744_v50 = vadd.s32 64, %v4720_v42 }
  0xc2   : > { %495 = vst [vmem:[#allocation14 + $0x70] sm:$0xff] %v6522_v3  ;;  %496 = vst [vmem:[#allocation14 + $0x78] sm:$0xff] %v6522_v3  ;;  %3718 = vmatpush3.bf16.msra.mxu0 %v3715_v6  ;;  %3784 = vmatpush3.bf16.msra.mxu1 %v3715_v6  ;;  %v3735_v23 = vpack.c.bf16 %v574_v22, %v573_v21  ;;  %v576_v25 = vld [vmem:[#allocation11 + $0x78] sm:$0xff]  ;;  %v546_v27 = vld [vmem:[#allocation13 + $0x8] sm:$0xff]  ;;  %v4747_v51 = vadd.s32 72, %v4720_v42  ;;  %v4750_v52 = vadd.s32 80, %v4720_v42 }
  0xc3   : > { %497 = vst [vmem:[#allocation14 + $0x80] sm:$0xff] %v6522_v3  ;;  %498 = vst [vmem:[#allocation14 + $0x88] sm:$0xff] %v6522_v3  ;;  %3720 = vmatprep.subr.bf16.mxu0 %v3719_v9  ;;  %3777 = vmatprep.subr.bf16.mxu1 %v3719_v9  ;;  %v3739_v26 = vpack.c.bf16 %v576_v25, %v575_v24  ;;  %v554_v28 = vld [vmem:[#allocation13 + $0x48] sm:$0xff]  ;;  %v547_v29 = vld [vmem:[#allocation13 + $0x10] sm:$0xff]  ;;  %v4753_v53 = vadd.s32 88, %v4720_v42  ;;  %v4756_v54 = vadd.s32 96, %v4720_v42 }
  0xc4   : > { %499 = vst [vmem:[#allocation14 + $0x90] sm:$0xff] %v6522_v3  ;;  %500 = vst [vmem:[#allocation14 + $0x98] sm:$0xff] %v6522_v3  ;;  %v555_v30 = vld [vmem:[#allocation13 + $0x50] sm:$0xff]  ;;  %v548_v31 = vld [vmem:[#allocation13 + $0x18] sm:$0xff]  ;;  %v4759_v55 = vadd.s32 104, %v4720_v42  ;;  %v4762_v56 = vadd.s32 112, %v4720_v42 }
  0xc5   : > { %501 = vst [vmem:[#allocation14 + $0xa0] sm:$0xff] %v6522_v3  ;;  %502 = vst [vmem:[#allocation14 + $0xa8] sm:$0xff] %v6522_v3  ;;  %v556_v32 = vld [vmem:[#allocation13 + $0x58] sm:$0xff]  ;;  %v549_v33 = vld [vmem:[#allocation13 + $0x20] sm:$0xff]  ;;  %v4765_v57 = vadd.s32 120, %v4720_v42  ;;  %v4768_v58 = vadd.s32 128, %v4720_v42 }
  0xc6   : > { %503 = vst [vmem:[#allocation14 + $0xb0] sm:$0xff] %v6522_v3  ;;  %504 = vst [vmem:[#allocation14 + $0xb8] sm:$0xff] %v6522_v3  ;;  %3722 = vmatpush3.bf16.msra.mxu0 %v3719_v9  ;;  %3785 = vmatpush3.bf16.msra.mxu1 %v3719_v9  ;;  %v557_v34 = vld [vmem:[#allocation13 + $0x60] sm:$0xff]  ;;  %v550_v35 = vld [vmem:[#allocation13 + $0x28] sm:$0xff]  ;;  %v4771_v59 = vadd.s32 136, %v4720_v42  ;;  %v4774_v60 = vadd.s32 144, %v4720_v42 }
  0xc7   : > { %505 = vst [vmem:[#allocation14 + $0xc0] sm:$0xff] %v6522_v3  ;;  %506 = vst [vmem:[#allocation14 + $0xc8] sm:$0xff] %v6522_v3  ;;  %3724 = vmatprep.subr.bf16.mxu0 %v3723_v14  ;;  %3778 = vmatprep.subr.bf16.mxu1 %v3723_v14  ;;  %v558_v36 = vld [vmem:[#allocation13 + $0x68] sm:$0xff]  ;;  %v551_v37 = vld [vmem:[#allocation13 + $0x30] sm:$0xff]  ;;  %v4777_v61 = vadd.s32 152, %v4720_v42  ;;  %v4780_v62 = vadd.s32 160, %v4720_v42 }
  0xc8   : > { %507 = vst [vmem:[#allocation14 + $0xd0] sm:$0xff] %v6522_v3  ;;  %508 = vst [vmem:[#allocation14 + $0xd8] sm:$0xff] %v6522_v3  ;;  %v559_v38 = vld [vmem:[#allocation13 + $0x70] sm:$0xff]  ;;  %v552_v39 = vld [vmem:[#allocation13 + $0x38] sm:$0xff]  ;;  %v4783_v63 = vadd.s32 168, %v4720_v42  ;;  %v4786_v0 = vadd.s32 176, %v4720_v42 }
  0xc9   : > { %509 = vst [vmem:[#allocation14 + $0xe0] sm:$0xff] %v6522_v3  ;;  %510 = vst [vmem:[#allocation14 + $0xe8] sm:$0xff] %v6522_v3  ;;  %v560_v40 = vld [vmem:[#allocation13 + $0x78] sm:$0xff]  ;;  %v4789_v1 = vadd.s32 184, %v4720_v42  ;;  %v4792_v2 = vadd.s32 192, %v4720_v42  ;;  %v4795_v4 = vadd.s32 200, %v4720_v42 }
  0xca   : > { %511 = vst [vmem:[#allocation14 + $0xf0] sm:$0xff] %v6522_v3  ;;  %512 = vst [vmem:[#allocation14 + $0xf8] sm:$0xff] %v6522_v3  ;;  %3726 = vmatpush3.bf16.msra.mxu0 %v3723_v14  ;;  %3786 = vmatpush3.bf16.msra.mxu1 %v3723_v14  ;;  %v4798_v5 = vadd.s32 208, %v4720_v42  ;;  %v4801_v6 = vadd.s32 216, %v4720_v42  ;;  %v4804_v7 = vadd.s32 224, %v4720_v42  ;;  %v4807_v8 = vadd.s32 232, %v4720_v42 }
  0xcb   : > { %513 = vst [vmem:[#allocation14 + $0x100] sm:$0xff] %v6522_v3  ;;  %514 = vst [vmem:[#allocation14 + $0x108] sm:$0xff] %v6522_v3  ;;  %3728 = vmatprep.subr.bf16.mxu0 %v3727_v17  ;;  %3779 = vmatprep.subr.bf16.mxu1 %v3727_v17  ;;  %v4810_v9 = vadd.s32 240, %v4720_v42  ;;  %v4813_v10 = vadd.s32 248, %v4720_v42  ;;  %v4816_v11 = vadd.s32 256, %v4720_v42  ;;  %v4819_v12 = vadd.s32 264, %v4720_v42 }
  0xcc   : > { %515 = vst [vmem:[#allocation14 + $0x110] sm:$0xff] %v6522_v3  ;;  %516 = vst [vmem:[#allocation14 + $0x118] sm:$0xff] %v6522_v3  ;;  %v4822_v13 = vadd.s32 272, %v4720_v42  ;;  %v4825_v14 = vadd.s32 280, %v4720_v42  ;;  %v4828_v15 = vadd.s32 288, %v4720_v42  ;;  %v4831_v16 = vadd.s32 296, %v4720_v42 }
  0xcd   : > { %517 = vst [vmem:[#allocation14 + $0x120] sm:$0xff] %v6522_v3  ;;  %518 = vst [vmem:[#allocation14 + $0x128] sm:$0xff] %v6522_v3  ;;  %v4837_v18 = vadd.s32 312, %v4720_v42  ;;  %v4840_v19 = vadd.s32 320, %v4720_v42  ;;  %v4846_v21 = vadd.s32 336, %v4720_v42  ;;  %v4849_v22 = vadd.s32 344, %v4720_v42 }
  0xce   : > { %519 = vst [vmem:[#allocation14 + $0x130] sm:$0xff] %v6522_v3  ;;  %520 = vst [vmem:[#allocation14 + $0x138] sm:$0xff] %v6522_v3  ;;  %3730 = vmatpush3.bf16.msra.mxu0 %v3727_v17  ;;  %3787 = vmatpush3.bf16.msra.mxu1 %v3727_v17  ;;  %v4834_v17 = vadd.s32 304, %v4720_v42  ;;  %v4855_v24 = vadd.s32 360, %v4720_v42  ;;  %v4858_v25 = vadd.s32 368, %v4720_v42  ;;  %v4908_v41 = vadd.s32 488, %v4720_v42 }
  0xcf   : > { %521 = vst [vmem:[#allocation14 + $0x140] sm:$0xff] %v6522_v3  ;;  %522 = vst [vmem:[#allocation14 + $0x148] sm:$0xff] %v6522_v3  ;;  %3732 = vmatprep.subr.bf16.mxu0 %v3731_v20  ;;  %3780 = vmatprep.subr.bf16.mxu1 %v3731_v20 }
  0xd0   : > { %523 = vst [vmem:[#allocation14 + $0x150] sm:$0xff] %v6522_v3  ;;  %524 = vst [vmem:[#allocation14 + $0x158] sm:$0xff] %v6522_v3 }
  0xd1   : > { %525 = vst [vmem:[#allocation14 + $0x160] sm:$0xff] %v6522_v3  ;;  %526 = vst [vmem:[#allocation14 + $0x168] sm:$0xff] %v6522_v3 }
  0xd2   : > { %527 = vst [vmem:[#allocation14 + $0x170] sm:$0xff] %v6522_v3  ;;  %528 = vst [vmem:[#allocation14 + $0x178] sm:$0xff] %v6522_v3  ;;  %3734 = vmatpush3.bf16.msra.mxu0 %v3731_v20  ;;  %3788 = vmatpush3.bf16.msra.mxu1 %v3731_v20  ;;  %v4843_v20 = vadd.s32 328, %v4720_v42 }
  0xd3   : > { %529 = vst [vmem:[#allocation14 + $0x180] sm:$0xff] %v6522_v3  ;;  %530 = vst [vmem:[#allocation14 + $0x188] sm:$0xff] %v6522_v3  ;;  %3736 = vmatprep.subr.bf16.mxu0 %v3735_v23  ;;  %3781 = vmatprep.subr.bf16.mxu1 %v3735_v23 }
  0xd4   : > { %531 = vst [vmem:[#allocation14 + $0x190] sm:$0xff] %v6522_v3  ;;  %532 = vst [vmem:[#allocation14 + $0x198] sm:$0xff] %v6522_v3 }
  0xd5   : > { %533 = vst [vmem:[#allocation14 + $0x1a0] sm:$0xff] %v6522_v3  ;;  %534 = vst [vmem:[#allocation14 + $0x1a8] sm:$0xff] %v6522_v3 }
  0xd6   : > { %535 = vst [vmem:[#allocation14 + $0x1b0] sm:$0xff] %v6522_v3  ;;  %536 = vst [vmem:[#allocation14 + $0x1b8] sm:$0xff] %v6522_v3  ;;  %3738 = vmatpush3.bf16.msra.mxu0 %v3735_v23  ;;  %3789 = vmatpush3.bf16.msra.mxu1 %v3735_v23  ;;  %v4852_v23 = vadd.s32 352, %v4720_v42 }
  0xd7   : > { %537 = vst [vmem:[#allocation14 + $0x1c0] sm:$0xff] %v6522_v3  ;;  %538 = vst [vmem:[#allocation14 + $0x1c8] sm:$0xff] %v6522_v3  ;;  %3740 = vmatprep.subr.bf16.mxu0 %v3739_v26  ;;  %3782 = vmatprep.subr.bf16.mxu1 %v3739_v26 }
  0xd8   : > { %539 = vst [vmem:[#allocation14 + $0x1d0] sm:$0xff] %v6522_v3  ;;  %540 = vst [vmem:[#allocation14 + $0x1d8] sm:$0xff] %v6522_v3 }
  0xd9   : > { %541 = vst [vmem:[#allocation14 + $0x1e0] sm:$0xff] %v6522_v3  ;;  %542 = vst [vmem:[#allocation14 + $0x1e8] sm:$0xff] %v6522_v3 }
  0xda   : > { %543 = vst [vmem:[#allocation14 + $0x1f0] sm:$0xff] %v6522_v3  ;;  %544 = vst [vmem:[#allocation14 + $0x1f8] sm:$0xff] %v6522_v3  ;;  %3742 = vmatpush3.bf16.msra.mxu0 %v3739_v26  ;;  %3790 = vmatpush3.bf16.msra.mxu1 %v3739_v26  ;;  %v4861_v26 = vadd.s32 376, %v4720_v42  ;;  %v4911_v3 = vadd.s32 496, %v4720_v42 }
  0xdb   : > { %6672 = vst [vmem:[#allocation24_spill] sm:$0xff] %v4720_v42  ;;  %6673 = vst [vmem:[#allocation25_spill] sm:$0xff] %v4723_v43 }
  0xdc   : > { %6674 = vst [vmem:[#allocation26_spill] sm:$0xff] %v4726_v44  ;;  %6675 = vst [vmem:[#allocation27_spill] sm:$0xff] %v4729_v45 }
  0xdd   : > { %3688 = vmatmul.mubr.f32.vlgmr.msra.gmra.mrb[0].mxu0 %v546_v27  ;;  %3700 = vmatmul.mubr.f32.vlgmr.msra.gmra.mrb[0].mxu1 %v554_v28  ;;  %6676 = vst [vmem:[#allocation28_spill] sm:$0xff] %v4732_v46  ;;  %6677 = vst [vmem:[#allocation29_spill] sm:$0xff] %v4735_v47  ;;  %v4864_v27 = vadd.s32 384, %v4720_v42  ;;  %v4867_v28 = vadd.s32 392, %v4720_v42 }
  0xde   : > { %3690 = vmatprep.mubr.f32.mxu0 %v547_v29  ;;  %3702 = vmatprep.mubr.f32.mxu1 %v555_v30  ;;  %6678 = vst [vmem:[#allocation30_spill] sm:$0xff] %v4738_v48  ;;  %6679 = vst [vmem:[#allocation31_spill] sm:$0xff] %v4741_v49  ;;  %v4870_v29 = vadd.s32 400, %v4720_v42  ;;  %v4873_v30 = vadd.s32 408, %v4720_v42 }
  0xdf   : > { %6680 = vst [vmem:[#allocation32_spill] sm:$0xff] %v4744_v50  ;;  %6681 = vst [vmem:[#allocation33_spill] sm:$0xff] %v4747_v51 }
  0xe0   : > { %6682 = vst [vmem:[#allocation34_spill] sm:$0xff] %v4750_v52  ;;  %6683 = vst [vmem:[#allocation35_spill] sm:$0xff] %v4753_v53 }
  0xe1   : > { %3691 = vmatmul.mubr.f32.gmra.mrb[2].mxu0 %v548_v31  ;;  %3703 = vmatmul.mubr.f32.gmra.mrb[2].mxu1 %v556_v32  ;;  %6684 = vst [vmem:[#allocation36_spill] sm:$0xff] %v4756_v54  ;;  %6685 = vst [vmem:[#allocation37_spill] sm:$0xff] %v4759_v55  ;;  %v4876_v31 = vadd.s32 416, %v4720_v42  ;;  %v4881_v32 = vld [vmem:[%s6511_s6] ss:$0 sm:$0xff] }
  0xe2   : > { %3693 = vmatprep.mubr.f32.mxu0 %v549_v33  ;;  %3705 = vmatprep.mubr.f32.mxu1 %v557_v34  ;;  %6686 = vst [vmem:[#allocation38_spill] sm:$0xff] %v4762_v56  ;;  %6687 = vst [vmem:[#allocation39_spill] sm:$0xff] %v4765_v57  ;;  %v4884_v33 = vadd.s32 424, %v4720_v42  ;;  %v4887_v34 = vadd.s32 432, %v4720_v42  ;;  %vm808_vm0 = vcmp.eq.s32.totalorder %v4720_v42, %v4881_v32 }
  0xe3   : > { %6688 = vst [vmem:[#allocation40_spill] sm:$0xff] %v4768_v58  ;;  %6689 = vst [vmem:[#allocation41_spill] sm:$0xff] %v4771_v59  ;;  %vm809_vm1 = vcmp.eq.s32.totalorder %v4723_v43, %v4881_v32  ;;  %vm810_vm2 = vcmp.eq.s32.totalorder %v4726_v44, %v4881_v32  ;;  %vm811_vm3 = vcmp.eq.s32.totalorder %v4729_v45, %v4881_v32 }
  0xe4   : > { %6690 = vst [vmem:[#allocation42_spill] sm:$0xff] %v4774_v60  ;;  %6691 = vst [vmem:[#allocation43_spill] sm:$0xff] %v4777_v61  ;;  %vm812_vm4 = vcmp.eq.s32.totalorder %v4732_v46, %v4881_v32  ;;  %vm813_vm5 = vcmp.eq.s32.totalorder %v4735_v47, %v4881_v32  ;;  %vm814_vm6 = vcmp.eq.s32.totalorder %v4738_v48, %v4881_v32 }
  0xe5   : > { %3694 = vmatmul.mubr.f32.gmra.mrb[4].mxu0 %v550_v35  ;;  %3706 = vmatmul.mubr.f32.gmra.mrb[4].mxu1 %v558_v36  ;;  %6692 = vst [vmem:[#allocation44_spill] sm:$0xff] %v4780_v62  ;;  %6693 = vst [vmem:[#allocation45_spill] sm:$0xff] %v4783_v63  ;;  %v4890_v35 = vadd.s32 440, %v4720_v42  ;;  %v4893_v36 = vadd.s32 448, %v4720_v42  ;;  %vm815_vm7 = vcmp.eq.s32.totalorder %v4741_v49, %v4881_v32 }
  0xe6   : > { %3696 = vmatprep.mubr.f32.mxu0 %v551_v37  ;;  %3708 = vmatprep.mubr.f32.mxu1 %v559_v38  ;;  %6694 = vst [vmem:[#allocation46_spill] sm:$0xff] %v4786_v0  ;;  %6695 = vst [vmem:[#allocation47_spill] sm:$0xff] %v4789_v1  ;;  %v4896_v37 = vadd.s32 456, %v4720_v42  ;;  %v4899_v38 = vadd.s32 464, %v4720_v42  ;;  %vm816_vm8 = vcmp.eq.s32.totalorder %v4744_v50, %v4881_v32 }
  0xe7   : > { %6696 = vst [vmem:[#allocation48_spill] sm:$0xff] %v4792_v2  ;;  %6697 = vst [vmem:[#allocation49_spill] sm:$0xff] %v4795_v4  ;;  %vm846_vm10 = vcmp.eq.s32.totalorder %v4834_v17, %v4881_v32  ;;  %vm847_vm11 = vcmp.eq.s32.totalorder %v4837_v18, %v4881_v32  ;;  %vm852_vm9 = vcmp.eq.s32.totalorder %v4852_v23, %v4881_v32 }
  0xe8   : > { %6698 = vst [vmem:[#allocation50_spill] sm:$0xff] %v4798_v5  ;;  %6699 = vst [vmem:[#allocation51_spill] sm:$0xff] %v4801_v6  ;;  %vm853_vm12 = vcmp.eq.s32.totalorder %v4855_v24, %v4881_v32  ;;  %vm854_vm13 = vcmp.eq.s32.totalorder %v4858_v25, %v4881_v32  ;;  %vm855_vm14 = vcmp.eq.s32.totalorder %v4861_v26, %v4881_v32 }
  0xe9   : > { %3697 = vmatmul.mubr.f32.gmra.mrb[6].mxu0 %v552_v39  ;;  %3709 = vmatmul.mubr.f32.gmra.mrb[6].mxu1 %v560_v40  ;;  %6700 = vst [vmem:[#allocation52_spill] sm:$0xff] %v4804_v7  ;;  %6701 = vst [vmem:[#allocation53_spill] sm:$0xff] %v4807_v8  ;;  %v4902_v39 = vadd.s32 472, %v4720_v42  ;;  %v4905_v40 = vadd.s32 480, %v4720_v42  ;;  %vm860_vm15 = vcmp.eq.s32.totalorder %v4876_v31, %v4881_v32 }
  0xea   : > { %6702 = vst [vmem:[#allocation54_spill] sm:$0xff] %v4810_v9  ;;  %6703 = vst [vmem:[#allocation55_spill] sm:$0xff] %v4813_v10 }
  0xeb   : > { %6704 = vst [vmem:[#allocation56_spill] sm:$0xff] %v4816_v11  ;;  %6705 = vst [vmem:[#allocation57_spill] sm:$0xff] %v4819_v12 }
  0xec   : > { %6706 = vst [vmem:[#allocation58_spill] sm:$0xff] %v4822_v13  ;;  %6707 = vst [vmem:[#allocation59_spill] sm:$0xff] %v4825_v14 }
  0xed   : > { %6708 = vst [vmem:[#allocation60_spill] sm:$0xff] %v4828_v15  ;;  %6709 = vst [vmem:[#allocation61_spill] sm:$0xff] %v4831_v16  ;;  %v6736_v16 = vmov 0.0  }
  0xee   : > { %6710 = vst [vmem:[#allocation62_spill] sm:$0xff] %v4834_v17  ;;  %6711 = vst [vmem:[#allocation63_spill] sm:$0xff] %v4837_v18  ;;  %v5010_v18 = vsel %vm808_vm0, 1.0, %v6736_v16  ;;  %vm857_vm0 = vcmp.eq.s32.totalorder %v4867_v28, %v4881_v32  ;;  %v5056_v45 = vsel %vm813_vm5, 1.0, %v6736_v16  ;;  %v5062_v46 = vsel %vm814_vm6, 1.0, %v6736_v16 }
  0xef   : > { %6712 = vst [vmem:[#allocation64_spill] sm:$0xff] %v4840_v19  ;;  %6713 = vst [vmem:[#allocation65_spill] sm:$0xff] %v4843_v20  ;;  %v5068_v44 = vsel %vm815_vm7, 1.0, %v6736_v16  ;;  %v5074_v43 = vsel %vm816_vm8, 1.0, %v6736_v16  ;;  %vm6740_vm7 = vcmp.eq.s32.totalorder %v4747_v51, %v4881_v32  ;;  %vm6741_vm8 = vcmp.eq.s32.totalorder %v4750_v52, %v4881_v32 }
  0xf0   : > { %6714 = vst [vmem:[#allocation66_spill] sm:$0xff] %v4846_v21  ;;  %6715 = vst [vmem:[#allocation67_spill] sm:$0xff] %v4849_v22  ;;  %v5088_v49 = vsel %vm6740_vm7, 1.0, %v6736_v16  ;;  %v5094_v50 = vsel %vm6741_vm8, 1.0, %v6736_v16  ;;  %vm6743_vm6 = vcmp.eq.s32.totalorder %v4756_v54, %v4881_v32  ;;  %vm865_vm7 = vcmp.eq.s32.totalorder %v4896_v37, %v4881_v32 }
  0xf1   : > { %6716 = vst [vmem:[#allocation68_spill] sm:$0xff] %v4852_v23  ;;  %6717 = vst [vmem:[#allocation69_spill] sm:$0xff] %v4855_v24  ;;  %v5024_v23 = vsel %vm809_vm1, 1.0, %v6736_v16  ;;  %vm858_vm1 = vcmp.eq.s32.totalorder %v4870_v29, %v4881_v32  ;;  %vm6746_vm5 = vcmp.eq.s32.totalorder %v4765_v57, %v4881_v32  ;;  %vm870_vm8 = vcmp.eq.s32.totalorder %v4911_v3, %v4881_v32 }
  0xf2   : > { %6718 = vst [vmem:[#allocation70_spill] sm:$0xff] %v4858_v25  ;;  %6719 = vst [vmem:[#allocation71_spill] sm:$0xff] %v4861_v26  ;;  %v5132_v52 = vsel %vm6746_vm5, 1.0, %v6736_v16  ;;  %vm6748_vm5 = vcmp.eq.s32.totalorder %v4771_v59, %v4881_v32  ;;  %v5342_v24 = vsel %vm857_vm0, 1.0, %v6736_v16  ;;  %v5348_v25 = vsel %vm858_vm1, 1.0, %v6736_v16 }
  0xf3   : > { %6720 = vst [vmem:[#allocation72_spill] sm:$0xff] %v4864_v27  ;;  %6721 = vst [vmem:[#allocation73_spill] sm:$0xff] %v4867_v28  ;;  %v5042_v27 = vsel %vm812_vm4, 1.0, %v6736_v16  ;;  %vm6742_vm4 = vcmp.eq.s32.totalorder %v4753_v53, %v4881_v32  ;;  %v5150_v57 = vsel %vm6748_vm5, 1.0, %v6736_v16  ;;  %vm6752_vm5 = vcmp.eq.s32.totalorder %v4783_v63, %v4881_v32 }
  0xf4   : > { %6722 = vst [vmem:[#allocation74_spill] sm:$0xff] %v4870_v29  ;;  %6723 = vst [vmem:[#allocation75_spill] sm:$0xff] %v4873_v30  ;;  %v5100_v47 = vsel %vm6742_vm4, 1.0, %v6736_v16  ;;  %vm6744_vm4 = vcmp.eq.s32.totalorder %v4759_v55, %v4881_v32  ;;  %v5174_v59 = vsel %vm6752_vm5, 1.0, %v6736_v16  ;;  %vm6756_vm5 = vcmp.eq.s32.totalorder %v4795_v4, %v4881_v32 }
  0xf5   : > { %6724 = vst [vmem:[#allocation76_spill] sm:$0xff] %v4876_v31  ;;  %6725 = vst [vmem:[#allocation77_spill] sm:$0xff] %v4884_v33  ;;  %v5120_v53 = vsel %vm6744_vm4, 1.0, %v6736_v16  ;;  %vm6750_vm4 = vcmp.eq.s32.totalorder %v4777_v61, %v4881_v32  ;;  %v5198_v63 = vsel %vm6756_vm5, 1.0, %v6736_v16  ;;  %vm6760_vm5 = vcmp.eq.s32.totalorder %v4807_v8, %v4881_v32 }
  0xf6   : > { %6726 = vst [vmem:[#allocation78_spill] sm:$0xff] %v4887_v34  ;;  %6727 = vst [vmem:[#allocation79_spill] sm:$0xff] %v4890_v35  ;;  %v5222_v4 = vsel %vm6760_vm5, 1.0, %v6736_v16  ;;  %vm6764_vm5 = vcmp.eq.s32.totalorder %v4819_v12, %v4881_v32  ;;  %v6770_v12 = vld [vmem:[#allocation61_spill] sm:$0xff]  ;;  %vm6786_vm0 = vcmp.eq.s32.totalorder %v4899_v38, %v4881_v32  ;;  %vm6787_vm1 = vcmp.eq.s32.totalorder %v4902_v39, %v4881_v32 }
  0xf7   : > { %6728 = vst [vmem:[#allocation80_spill] sm:$0xff] %v4893_v36  ;;  %6729 = vst [vmem:[#allocation81_spill] sm:$0xff] %v4896_v37  ;;  %v4914_v36 = vadd.s32 504, %v4720_v42  ;;  %v5030_v42 = vsel %vm810_vm2, 1.0, %v6736_v16  ;;  %vm859_vm2 = vcmp.eq.s32.totalorder %v4873_v30, %v4881_v32  ;;  %v5246_v8 = vsel %vm6764_vm5, 1.0, %v6736_v16 }
  0xf8   : > { %6730 = vst [vmem:[#allocation82_spill] sm:$0xff] %v4899_v38  ;;  %6731 = vst [vmem:[#allocation83_spill] sm:$0xff] %v4902_v39  ;;  %vm6771_vm5 = vcmp.eq.s32.totalorder %v6770_v12, %v4881_v32  ;;  %v5354_v26 = vsel %vm859_vm2, 1.0, %v6736_v16  ;;  %vm6789_vm2 = vcmp.eq.s32.totalorder %v4905_v40, %v4881_v32  ;;  %v5420_v38 = vsel %vm870_vm8, 1.0, %v6736_v16 }
  0xf9   : > { %6732 = vst [vmem:[#allocation84_spill] sm:$0xff] %v4905_v40  ;;  %6733 = vst [vmem:[#allocation85_spill] sm:$0xff] %v4908_v41 }
  0xfa   : > { %6734 = vst [vmem:[#allocation86_spill] sm:$0xff] %v4911_v3  ;;  %6735 = vst [vmem:[#allocation87_spill] sm:$0xff] %v4914_v36  ;;  %v1003_v3 = vpack.c.bf16 %v5068_v44, %v5062_v46 }
  0xfb   : > { %6737 = vst [vmem:[#allocation88_spill] sm:$0xff] %v5010_v18  ;;  %v5036_v18 = vsel %vm811_vm3, 1.0, %v6736_v16  ;;  %6738 = vst [vmem:[#allocation89_spill] sm:$0xff] %v5074_v43  ;;  %v5106_v43 = vsel %vm6743_vm6, 1.0, %v6736_v16  ;;  %vm6745_vm6 = vcmp.eq.s32.totalorder %v4762_v56, %v4881_v32  ;;  %vm6747_vm3 = vcmp.eq.s32.totalorder %v4768_v58, %v4881_v32 }
  0xfc   : > { %v5126_v54 = vsel %vm6745_vm6, 1.0, %v6736_v16  ;;  %v5138_v51 = vsel %vm6747_vm3, 1.0, %v6736_v16  ;;  %vm6749_vm3 = vcmp.eq.s32.totalorder %v4774_v60, %v4881_v32  ;;  %v5162_v56 = vsel %vm6750_vm4, 1.0, %v6736_v16  ;;  %6765 = vst [vmem:[#allocation90_spill] sm:$0xff] %v5246_v8  ;;  %6793 = vst [vmem:[#allocation97_spill] sm:$0xff] %v5420_v38 }
  0xfd   : > { %v5156_v58 = vsel %vm6749_vm3, 1.0, %v6736_v16  ;;  %vm6751_vm6 = vcmp.eq.s32.totalorder %v4780_v62, %v4881_v32  ;;  %vm6753_vm3 = vcmp.eq.s32.totalorder %v4786_v0, %v4881_v32  ;;  %vm6754_vm4 = vcmp.eq.s32.totalorder %v4789_v1, %v4881_v32  ;;  %1035 = vst [vmem:[#allocation2 + $0x18] sm:$0xff] %v1003_v3 }
  0xfe   : > { %v6739_v48 = vld [vmem:[#allocation80_spill] sm:$0xff]  ;;  %v5168_v55 = vsel %vm6751_vm6, 1.0, %v6736_v16  ;;  %v5180_v60 = vsel %vm6753_vm3, 1.0, %v6736_v16  ;;  %v5186_v61 = vsel %vm6754_vm4, 1.0, %v6736_v16  ;;  %vm6755_vm6 = vcmp.eq.s32.totalorder %v4792_v2, %v4881_v32 }
  0xff   : > { %v5192_v62 = vsel %vm6755_vm6, 1.0, %v6736_v16  ;;  %vm6757_vm3 = vcmp.eq.s32.totalorder %v4798_v5, %v4881_v32  ;;  %vm6758_vm4 = vcmp.eq.s32.totalorder %v4801_v6, %v4881_v32  ;;  %vm6759_vm6 = vcmp.eq.s32.totalorder %v4804_v7, %v4881_v32 }
 0x100   : > { %v5204_v0 = vsel %vm6757_vm3, 1.0, %v6736_v16  ;;  %v5210_v1 = vsel %vm6758_vm4, 1.0, %v6736_v16  ;;  %v5216_v2 = vsel %vm6759_vm6, 1.0, %v6736_v16  ;;  %vm6761_vm3 = vcmp.eq.s32.totalorder %v4810_v9, %v4881_v32 }
 0x101   : > { %v5228_v5 = vsel %vm6761_vm3, 1.0, %v6736_v16  ;;  %vm6762_vm4 = vcmp.eq.s32.totalorder %v4813_v10, %v4881_v32  ;;  %vm6763_vm6 = vcmp.eq.s32.totalorder %v4816_v11, %v4881_v32  ;;  %vm6766_vm3 = vcmp.eq.s32.totalorder %v4822_v13, %v4881_v32 }
 0x102   : > { %v5234_v6 = vsel %vm6762_vm4, 1.0, %v6736_v16  ;;  %v5240_v7 = vsel %vm6763_vm6, 1.0, %v6736_v16  ;;  %v5252_v9 = vsel %vm6766_vm3, 1.0, %v6736_v16  ;;  %vm6767_vm4 = vcmp.eq.s32.totalorder %v4825_v14, %v4881_v32  ;;  %v6795_v40 = vld [vmem:[#allocation88_spill] sm:$0xff] }
 0x103   : > { %v5258_v10 = vsel %vm6767_vm4, 1.0, %v6736_v16  ;;  %vm6769_vm6 = vcmp.eq.s32.totalorder %v4828_v15, %v4881_v32  ;;  %v5270_v8 = vsel %vm6771_vm5, 1.0, %v6736_v16  ;;  %v5276_v13 = vsel %vm846_vm10, 1.0, %v6736_v16 }
 0x104   : > { %6768 = vst [vmem:[#allocation91_spill] sm:$0xff] %v5258_v10  ;;  %v5264_v11 = vsel %vm6769_vm6, 1.0, %v6736_v16  ;;  %v5282_v10 = vsel %vm847_vm11, 1.0, %v6736_v16  ;;  %vm6773_vm3 = vcmp.eq.s32.totalorder %v4840_v19, %v4881_v32  ;;  %vm6775_vm4 = vcmp.eq.s32.totalorder %v4843_v20, %v4881_v32  ;;  %v6780_v19 = vld [vmem:[#allocation72_spill] sm:$0xff] }
 0x105   : > { %v5288_v15 = vsel %vm6773_vm3, 1.0, %v6736_v16  ;;  %v5294_v12 = vsel %vm6775_vm4, 1.0, %v6736_v16  ;;  %vm6776_vm10 = vcmp.eq.s32.totalorder %v4846_v21, %v4881_v32  ;;  %vm6777_vm11 = vcmp.eq.s32.totalorder %v4849_v22, %v4881_v32 }
 0x106   : > { %6774 = vst [vmem:[#allocation92_spill] sm:$0xff] %v5288_v15  ;;  %v5300_v17 = vsel %vm6776_vm10, 1.0, %v6736_v16  ;;  %v5306_v14 = vsel %vm6777_vm11, 1.0, %v6736_v16  ;;  %v5312_v15 = vsel %vm852_vm9, 1.0, %v6736_v16  ;;  %v5318_v20 = vsel %vm853_vm12, 1.0, %v6736_v16 }
 0x107   : > { %6779 = vst [vmem:[#allocation93_spill] sm:$0xff] %v5312_v15  ;;  %v5324_v21 = vsel %vm854_vm13, 1.0, %v6736_v16  ;;  %v5330_v22 = vsel %vm855_vm14, 1.0, %v6736_v16  ;;  %vm6781_vm9 = vcmp.eq.s32.totalorder %v6780_v19, %v4881_v32  ;;  %v5360_v19 = vsel %vm860_vm15, 1.0, %v6736_v16 }
 0x108   : > { %v5336_v15 = vsel %vm6781_vm9, 1.0, %v6736_v16  ;;  %vm6782_vm12 = vcmp.eq.s32.totalorder %v4884_v33, %v4881_v32  ;;  %vm6783_vm13 = vcmp.eq.s32.totalorder %v4887_v34, %v4881_v32  ;;  %vm6784_vm14 = vcmp.eq.s32.totalorder %v4890_v35, %v4881_v32 }
 0x109   : > { %v5366_v28 = vsel %vm6782_vm12, 1.0, %v6736_v16  ;;  %v5372_v29 = vsel %vm6783_vm13, 1.0, %v6736_v16  ;;  %v5378_v30 = vsel %vm6784_vm14, 1.0, %v6736_v16  ;;  %vm6785_vm15 = vcmp.eq.s32.totalorder %v6739_v48, %v4881_v32 }
 0x10a   : > { %v5384_v31 = vsel %vm6785_vm15, 1.0, %v6736_v16  ;;  %v5390_v33 = vsel %vm865_vm7, 1.0, %v6736_v16  ;;  %v5396_v34 = vsel %vm6786_vm0, 1.0, %v6736_v16  ;;  %v5402_v35 = vsel %vm6787_vm1, 1.0, %v6736_v16 }
 0x10b   : > { %6788 = vst [vmem:[#allocation94_spill] sm:$0xff] %v5402_v35  ;;  %v5408_v48 = vsel %vm6789_vm2, 1.0, %v6736_v16  ;;  %vm6791_vm7 = vcmp.eq.s32.totalorder %v4908_v41, %v4881_v32  ;;  %vm6794_vm6 = vcmp.eq.s32.totalorder %v4914_v36, %v4881_v32  ;;  %v1001_v41 = vpack.c.bf16 %v5036_v18, %v5030_v42  ;;  %v6796_v35 = vld [vmem:[#allocation89_spill] sm:$0xff]  ;;  %v6811_v18 = vld [vmem:[#allocation30_spill] sm:$0xff] }
 0x10c   : > { %6790 = vst [vmem:[#allocation95_spill] sm:$0xff] %v5408_v48  ;;  %v5414_v37 = vsel %vm6791_vm7, 1.0, %v6736_v16  ;;  %v5426_v39 = vsel %vm6794_vm6, 1.0, %v6736_v16  ;;  %v1000_v48 = vpack.c.bf16 %v5024_v23, %v6795_v40  ;;  %v1004_v38 = vpack.c.bf16 %v5088_v49, %v6796_v35  ;;  %v6826_v35 = vld [vmem:[#allocation45_spill] sm:$0xff]  ;;  %v6831_v40 = vld [vmem:[#allocation50_spill] sm:$0xff] }
 0x10d   : > { %6792 = vst [vmem:[#allocation96_spill] sm:$0xff] %v5414_v37  ;;  %v1002_v37 = vpack.c.bf16 %v5056_v45, %v5042_v27  ;;  %v1005_v32 = vpack.c.bf16 %v5100_v47, %v5094_v50  ;;  %v1006_v36 = vpack.c.bf16 %v5120_v53, %v5106_v43  ;;  %v1007_v23 = vpack.c.bf16 %v5132_v52, %v5126_v54  ;;  %v6797_v50 = vld [vmem:[#allocation90_spill] sm:$0xff]  ;;  %v6798_v52 = vld [vmem:[#allocation91_spill] sm:$0xff] }
 0x10e   : > { %v1008_v42 = vpack.c.bf16 %v5150_v57, %v5138_v51  ;;  %1032 = vst [vmem:[#allocation2] sm:$0xff] %v1000_v48  ;;  %v1009_v45 = vpack.c.bf16 %v5162_v56, %v5156_v58  ;;  %v1010_v44 = vpack.c.bf16 %v5174_v59, %v5168_v55  ;;  %v1011_v46 = vpack.c.bf16 %v5186_v61, %v5180_v60  ;;  %v6799_v55 = vld [vmem:[#allocation92_spill] sm:$0xff]  ;;  %v6800_v58 = vld [vmem:[#allocation93_spill] sm:$0xff]  ;;  %v6819_v27 = vld [vmem:[#allocation38_spill] sm:$0xff] }
 0x10f   : > { %v1012_v47 = vpack.c.bf16 %v5198_v63, %v5192_v62  ;;  %1033 = vst [vmem:[#allocation2 + $0x8] sm:$0xff] %v1001_v41  ;;  %1034 = vst [vmem:[#allocation2 + $0x10] sm:$0xff] %v1002_v37  ;;  %v1013_v43 = vpack.c.bf16 %v5210_v1, %v5204_v0  ;;  %v1014_v48 = vpack.c.bf16 %v5222_v4, %v5216_v2  ;;  %v6828_v37 = vld [vmem:[#allocation47_spill] sm:$0xff] }
 0x110   : > { %1036 = vst [vmem:[#allocation2 + $0x20] sm:$0xff] %v1004_v38  ;;  %v1015_v49 = vpack.c.bf16 %v5234_v6, %v5228_v5  ;;  %v1016_v51 = vpack.c.bf16 %v6797_v50, %v5240_v7  ;;  %1037 = vst [vmem:[#allocation2 + $0x28] sm:$0xff] %v1005_v32  ;;  %v1017_v3 = vpack.c.bf16 %v6798_v52, %v5252_v9  ;;  %v6829_v38 = vld [vmem:[#allocation48_spill] sm:$0xff]  ;;  %v6832_v41 = vld [vmem:[#allocation51_spill] sm:$0xff] }
 0x111   : > { %1038 = vst [vmem:[#allocation2 + $0x30] sm:$0xff] %v1006_v36  ;;  %1039 = vst [vmem:[#allocation2 + $0x38] sm:$0xff] %v1007_v23  ;;  %v1018_v53 = vpack.c.bf16 %v5270_v8, %v5264_v11  ;;  %v1019_v54 = vpack.c.bf16 %v5282_v10, %v5276_v13  ;;  %v1020_v56 = vpack.c.bf16 %v5294_v12, %v6799_v55  ;;  %v6804_v8 = vld [vmem:[#allocation97_spill] sm:$0xff]  ;;  %v5495_v10 = vld [vmem:[%s6512_s7] ss:$0 sm:$0xff] }
 0x112   : > { %1040 = vst [vmem:[#allocation2 + $0x40] sm:$0xff] %v1008_v42  ;;  %1041 = vst [vmem:[#allocation2 + $0x48] sm:$0xff] %v1009_v45  ;;  %v1021_v57 = vpack.c.bf16 %v5306_v14, %v5300_v17  ;;  %v1022_v59 = vpack.c.bf16 %v5318_v20, %v6800_v58  ;;  %v1023_v60 = vpack.c.bf16 %v5330_v22, %v5324_v21  ;;  %v6801_v2 = vld [vmem:[#allocation94_spill] sm:$0xff]  ;;  %v6805_v11 = vld [vmem:[#allocation24_spill] sm:$0xff] }
 0x113   : > { %1042 = vst [vmem:[#allocation2 + $0x50] sm:$0xff] %v1010_v44  ;;  %1043 = vst [vmem:[#allocation2 + $0x58] sm:$0xff] %v1011_v46  ;;  %v1024_v61 = vpack.c.bf16 %v5342_v24, %v5336_v15  ;;  %v1025_v62 = vpack.c.bf16 %v5354_v26, %v5348_v25  ;;  %v1026_v63 = vpack.c.bf16 %v5366_v28, %v5360_v19  ;;  %v6802_v5 = vld [vmem:[#allocation95_spill] sm:$0xff]  ;;  %v6806_v12 = vld [vmem:[#allocation25_spill] sm:$0xff] }
 0x114   : > { %1044 = vst [vmem:[#allocation2 + $0x60] sm:$0xff] %v1012_v47  ;;  %1045 = vst [vmem:[#allocation2 + $0x68] sm:$0xff] %v1013_v43  ;;  %v1027_v0 = vpack.c.bf16 %v5378_v30, %v5372_v29  ;;  %v1028_v1 = vpack.c.bf16 %v5390_v33, %v5384_v31  ;;  %v1029_v4 = vpack.c.bf16 %v6801_v2, %v5396_v34  ;;  %v6803_v6 = vld [vmem:[#allocation96_spill] sm:$0xff]  ;;  %v6807_v13 = vld [vmem:[#allocation26_spill] sm:$0xff] }
 0x115   : > { %1046 = vst [vmem:[#allocation2 + $0x70] sm:$0xff] %v1014_v48  ;;  %1047 = vst [vmem:[#allocation2 + $0x78] sm:$0xff] %v1015_v49  ;;  %v1030_v7 = vpack.c.bf16 %v6803_v6, %v6802_v5  ;;  %v1031_v9 = vpack.c.bf16 %v5426_v39, %v6804_v8  ;;  %vm1069_vm8 = vcmp.eq.s32.totalorder %v6805_v11, %v5495_v10  ;;  %v6808_v14 = vld [vmem:[#allocation27_spill] sm:$0xff]  ;;  %v6809_v15 = vld [vmem:[#allocation28_spill] sm:$0xff] }
 0x116   : > { %1048 = vst [vmem:[#allocation2 + $0x80] sm:$0xff] %v1016_v51  ;;  %1049 = vst [vmem:[#allocation2 + $0x88] sm:$0xff] %v1017_v3  ;;  %vm1070_vm5 = vcmp.eq.s32.totalorder %v6806_v12, %v5495_v10  ;;  %vm1071_vm3 = vcmp.eq.s32.totalorder %v6807_v13, %v5495_v10  ;;  %vm1072_vm4 = vcmp.eq.s32.totalorder %v6808_v14, %v5495_v10  ;;  %v6810_v17 = vld [vmem:[#allocation29_spill] sm:$0xff]  ;;  %v6812_v19 = vld [vmem:[#allocation31_spill] sm:$0xff] }
 0x117   : > { %1050 = vst [vmem:[#allocation2 + $0x90] sm:$0xff] %v1018_v53  ;;  %1051 = vst [vmem:[#allocation2 + $0x98] sm:$0xff] %v1019_v54  ;;  %vm1073_vm10 = vcmp.eq.s32.totalorder %v6809_v15, %v5495_v10  ;;  %vm1074_vm11 = vcmp.eq.s32.totalorder %v6810_v17, %v5495_v10  ;;  %vm1075_vm9 = vcmp.eq.s32.totalorder %v6811_v18, %v5495_v10  ;;  %v6813_v20 = vld [vmem:[#allocation32_spill] sm:$0xff]  ;;  %v6814_v21 = vld [vmem:[#allocation33_spill] sm:$0xff] }
 0x118   : > { %1052 = vst [vmem:[#allocation2 + $0xa0] sm:$0xff] %v1020_v56  ;;  %1053 = vst [vmem:[#allocation2 + $0xa8] sm:$0xff] %v1021_v57  ;;  %vm1076_vm12 = vcmp.eq.s32.totalorder %v6812_v19, %v5495_v10  ;;  %vm1077_vm13 = vcmp.eq.s32.totalorder %v6813_v20, %v5495_v10  ;;  %v6815_v22 = vld [vmem:[#allocation34_spill] sm:$0xff]  ;;  %v6816_v24 = vld [vmem:[#allocation35_spill] sm:$0xff]  ;;  %v5591_v56 = vsel %vm1069_vm8, 1.0, %v6736_v16  ;;  %v5637_v6 = vsel %vm1074_vm11, 1.0, %v6736_v16 }
 0x119   : > { %1054 = vst [vmem:[#allocation2 + $0xb0] sm:$0xff] %v1022_v59  ;;  %1055 = vst [vmem:[#allocation2 + $0xb8] sm:$0xff] %v1023_v60  ;;  %v6817_v25 = vld [vmem:[#allocation36_spill] sm:$0xff]  ;;  %v6818_v26 = vld [vmem:[#allocation37_spill] sm:$0xff]  ;;  %v5649_v8 = vsel %vm1076_vm12, 1.0, %v6736_v16  ;;  %vm6862_vm12 = vcmp.eq.s32.totalorder %v6814_v21, %v5495_v10 }
 0x11a   : > { %1056 = vst [vmem:[#allocation2 + $0xc0] sm:$0xff] %v1024_v61  ;;  %1057 = vst [vmem:[#allocation2 + $0xc8] sm:$0xff] %v1025_v62  ;;  %v6820_v28 = vld [vmem:[#allocation39_spill] sm:$0xff]  ;;  %v6821_v29 = vld [vmem:[#allocation40_spill] sm:$0xff]  ;;  %v5605_v61 = vsel %vm1070_vm5, 1.0, %v6736_v16  ;;  %v5611_v62 = vsel %vm1071_vm3, 1.0, %v6736_v16 }
 0x11b   : > { %1058 = vst [vmem:[#allocation2 + $0xd0] sm:$0xff] %v1026_v63  ;;  %1059 = vst [vmem:[#allocation2 + $0xd8] sm:$0xff] %v1027_v0  ;;  %v6822_v30 = vld [vmem:[#allocation41_spill] sm:$0xff]  ;;  %v6823_v31 = vld [vmem:[#allocation42_spill] sm:$0xff]  ;;  %v5617_v63 = vsel %vm1072_vm4, 1.0, %v6736_v16  ;;  %v5623_v0 = vsel %vm1073_vm10, 1.0, %v6736_v16  ;;  %vm6865_vm10 = vcmp.eq.s32.totalorder %v6816_v24, %v5495_v10  ;;  %vm6876_vm11 = vcmp.eq.s32.totalorder %v6820_v28, %v5495_v10 }
 0x11c   : > { %1060 = vst [vmem:[#allocation2 + $0xe0] sm:$0xff] %v1028_v1  ;;  %1061 = vst [vmem:[#allocation2 + $0xe8] sm:$0xff] %v1029_v4  ;;  %v6824_v33 = vld [vmem:[#allocation43_spill] sm:$0xff]  ;;  %v6825_v34 = vld [vmem:[#allocation44_spill] sm:$0xff]  ;;  %v5669_v15 = vsel %vm6862_vm12, 1.0, %v6736_v16  ;;  %v5681_v18 = vsel %vm6865_vm10, 1.0, %v6736_v16  ;;  %vm6873_vm10 = vcmp.eq.s32.totalorder %v6818_v26, %v5495_v10  ;;  %vm6878_vm4 = vcmp.eq.s32.totalorder %v6821_v29, %v5495_v10 }
 0x11d   : > { %1062 = vst [vmem:[#allocation2 + $0xf0] sm:$0xff] %v1030_v7  ;;  %1063 = vst [vmem:[#allocation2 + $0xf8] sm:$0xff] %v1031_v9  ;;  %v6827_v36 = vld [vmem:[#allocation46_spill] sm:$0xff]  ;;  %v6830_v39 = vld [vmem:[#allocation49_spill] sm:$0xff]  ;;  %v5643_v7 = vsel %vm1075_vm9, 1.0, %v6736_v16  ;;  %v5655_v9 = vsel %vm1077_vm13, 1.0, %v6736_v16  ;;  %vm6863_vm13 = vcmp.eq.s32.totalorder %v6815_v22, %v5495_v10  ;;  %vm6867_vm9 = vcmp.eq.s32.totalorder %v6817_v25, %v5495_v10 }
 0x11e   : > { %v6833_v32 = vld [vmem:[#allocation52_spill] sm:$0xff]  ;;  %v6834_v23 = vld [vmem:[#allocation53_spill] sm:$0xff]  ;;  %v6835_v42 = vld [vmem:[#allocation54_spill] sm:$0xff]  ;;  %v5675_v17 = vsel %vm6863_vm13, 1.0, %v6736_v16  ;;  %6866 = vst [vmem:[#allocation89_spill] sm:$0xff] %v5681_v18  ;;  %v5687_v19 = vsel %vm6867_vm9, 1.0, %v6736_v16  ;;  %vm6875_vm9 = vcmp.eq.s32.totalorder %v6819_v27, %v5495_v10 }
 0x11f   : > { %v6836_v45 = vld [vmem:[#allocation55_spill] sm:$0xff]  ;;  %v6837_v44 = vld [vmem:[#allocation56_spill] sm:$0xff]  ;;  %v6838_v46 = vld [vmem:[#allocation57_spill] sm:$0xff]  ;;  %6864 = vst [vmem:[#allocation88_spill] sm:$0xff] %v5675_v17  ;;  %v5701_v24 = vsel %vm6873_vm10, 1.0, %v6736_v16  ;;  %v5707_v25 = vsel %vm6875_vm9, 1.0, %v6736_v16  ;;  %vm6885_vm10 = vcmp.eq.s32.totalorder %v6824_v33, %v5495_v10  ;;  %vm6886_vm9 = vcmp.eq.s32.totalorder %v6825_v34, %v5495_v10 }
 0x120   : > { %v6839_v47 = vld [vmem:[#allocation58_spill] sm:$0xff]  ;;  %v6840_v43 = vld [vmem:[#allocation59_spill] sm:$0xff]  ;;  %v6841_v48 = vld [vmem:[#allocation60_spill] sm:$0xff]  ;;  %6868 = vst [vmem:[#allocation90_spill] sm:$0xff] %v5687_v19  ;;  %v5713_v19 = vsel %vm6876_vm11, 1.0, %v6736_v16  ;;  %v5719_v18 = vsel %vm6878_vm4, 1.0, %v6736_v16  ;;  %vm6883_vm11 = vcmp.eq.s32.totalorder %v6822_v30, %v5495_v10  ;;  %vm6884_vm4 = vcmp.eq.s32.totalorder %v6823_v31, %v5495_v10 }
 0x121   : > { %v6842_v49 = vld [vmem:[#allocation61_spill] sm:$0xff]  ;;  %v6843_v50 = vld [vmem:[#allocation62_spill] sm:$0xff]  ;;  %v6844_v51 = vld [vmem:[#allocation63_spill] sm:$0xff]  ;;  %6874 = vst [vmem:[#allocation91_spill] sm:$0xff] %v5701_v24  ;;  %v5731_v28 = vsel %vm6883_vm11, 1.0, %v6736_v16  ;;  %v5737_v29 = vsel %vm6884_vm4, 1.0, %v6736_v16  ;;  %vm6887_vm11 = vcmp.eq.s32.totalorder %v6826_v35, %v5495_v10  ;;  %vm6888_vm4 = vcmp.eq.s32.totalorder %v6827_v36, %v5495_v10 }
 0x122   : > { %vm1107_vm15 = vcmp.eq.s32.totalorder %v6843_v50, %v5495_v10  ;;  %vm1108_vm0 = vcmp.eq.s32.totalorder %v6844_v51, %v5495_v10  ;;  %v6845_v52 = vld [vmem:[#allocation64_spill] sm:$0xff]  ;;  %v6846_v3 = vld [vmem:[#allocation65_spill] sm:$0xff]  ;;  %v6847_v53 = vld [vmem:[#allocation66_spill] sm:$0xff]  ;;  %6877 = vst [vmem:[#allocation92_spill] sm:$0xff] %v5713_v19  ;;  %v5749_v19 = vsel %vm6886_vm9, 1.0, %v6736_v16  ;;  %v5755_v30 = vsel %vm6887_vm11, 1.0, %v6736_v16 }
 0x123   : > { %v6848_v54 = vld [vmem:[#allocation67_spill] sm:$0xff]  ;;  %v6849_v55 = vld [vmem:[#allocation68_spill] sm:$0xff]  ;;  %v6850_v57 = vld [vmem:[#allocation69_spill] sm:$0xff]  ;;  %6879 = vst [vmem:[#allocation93_spill] sm:$0xff] %v5719_v18  ;;  %v5743_v18 = vsel %vm6885_vm10, 1.0, %v6736_v16  ;;  %v5761_v31 = vsel %vm6888_vm4, 1.0, %v6736_v16  ;;  %vm6889_vm10 = vcmp.eq.s32.totalorder %v6828_v37, %v5495_v10  ;;  %vm6890_vm9 = vcmp.eq.s32.totalorder %v6829_v38, %v5495_v10 }
 0x124   : > { %vm1113_vm14 = vcmp.eq.s32.totalorder %v6849_v55, %v5495_v10  ;;  %vm1114_vm1 = vcmp.eq.s32.totalorder %v6850_v57, %v5495_v10  ;;  %v6851_v58 = vld [vmem:[#allocation70_spill] sm:$0xff]  ;;  %v6852_v59 = vld [vmem:[#allocation71_spill] sm:$0xff]  ;;  %v6853_v60 = vld [vmem:[#allocation72_spill] sm:$0xff]  ;;  %v5767_v33 = vsel %vm6889_vm10, 1.0, %v6736_v16  ;;  %v5773_v34 = vsel %vm6890_vm9, 1.0, %v6736_v16 }
 0x125   : > { %vm1115_vm2 = vcmp.eq.s32.totalorder %v6851_v58, %v5495_v10  ;;  %vm1116_vm7 = vcmp.eq.s32.totalorder %v6852_v59, %v5495_v10  ;;  %v6854_v1 = vld [vmem:[#allocation73_spill] sm:$0xff]  ;;  %v6855_v2 = vld [vmem:[#allocation74_spill] sm:$0xff]  ;;  %v6856_v4 = vld [vmem:[#allocation75_spill] sm:$0xff]  ;;  %vm6891_vm11 = vcmp.eq.s32.totalorder %v6830_v39, %v5495_v10  ;;  %vm6892_vm4 = vcmp.eq.s32.totalorder %v6831_v40, %v5495_v10 }
 0x126   : > { %vm1118_vm8 = vcmp.eq.s32.totalorder %v6854_v1, %v5495_v10  ;;  %vm1119_vm5 = vcmp.eq.s32.totalorder %v6855_v2, %v5495_v10  ;;  %vm1120_vm3 = vcmp.eq.s32.totalorder %v6856_v4, %v5495_v10  ;;  %v6857_v5 = vld [vmem:[#allocation76_spill] sm:$0xff]  ;;  %v6858_v11 = vld [vmem:[#allocation77_spill] sm:$0xff]  ;;  %v6859_v12 = vld [vmem:[#allocation78_spill] sm:$0xff]  ;;  %v5779_v35 = vsel %vm6891_vm11, 1.0, %v6736_v16 }
 0x127   : > { %vm1121_vm6 = vcmp.eq.s32.totalorder %v6857_v5, %v5495_v10  ;;  %v6860_v13 = vld [vmem:[#allocation79_spill] sm:$0xff]  ;;  %v6861_v14 = vld [vmem:[#allocation80_spill] sm:$0xff]  ;;  %v6869_v20 = vld [vmem:[#allocation81_spill] sm:$0xff]  ;;  %v5785_v36 = vsel %vm6892_vm4, 1.0, %v6736_v16  ;;  %vm6893_vm10 = vcmp.eq.s32.totalorder %v6832_v41, %v5495_v10  ;;  %vm6894_vm9 = vcmp.eq.s32.totalorder %v6833_v32, %v5495_v10 }
 0x128   : > { %vm1126_vm12 = vcmp.eq.s32.totalorder %v6869_v20, %v5495_v10  ;;  %v6870_v21 = vld [vmem:[#allocation82_spill] sm:$0xff]  ;;  %v6871_v22 = vld [vmem:[#allocation83_spill] sm:$0xff]  ;;  %v6872_v17 = vld [vmem:[#allocation84_spill] sm:$0xff]  ;;  %v5791_v37 = vsel %vm6893_vm10, 1.0, %v6736_v16  ;;  %v5797_v38 = vsel %vm6894_vm9, 1.0, %v6736_v16  ;;  %vm6895_vm11 = vcmp.eq.s32.totalorder %v6834_v23, %v5495_v10 }
 0x129   : > { %v6880_v26 = vld [vmem:[#allocation85_spill] sm:$0xff]  ;;  %v6881_v24 = vld [vmem:[#allocation86_spill] sm:$0xff]  ;;  %v6882_v27 = vld [vmem:[#allocation87_spill] sm:$0xff]  ;;  %v5803_v39 = vsel %vm6895_vm11, 1.0, %v6736_v16  ;;  %vm6896_vm4 = vcmp.eq.s32.totalorder %v6835_v42, %v5495_v10  ;;  %vm6897_vm10 = vcmp.eq.s32.totalorder %v6836_v45, %v5495_v10  ;;  %vm6898_vm9 = vcmp.eq.s32.totalorder %v6837_v44, %v5495_v10 }
 0x12a   : > { %vm1131_vm13 = vcmp.eq.s32.totalorder %v6881_v24, %v5495_v10  ;;  %v5809_v40 = vsel %vm6896_vm4, 1.0, %v6736_v16  ;;  %v5815_v41 = vsel %vm6897_vm10, 1.0, %v6736_v16  ;;  %v5821_v32 = vsel %vm6898_vm9, 1.0, %v6736_v16 }
 0x12b   : > { %vm6899_vm11 = vcmp.eq.s32.totalorder %v6838_v46, %v5495_v10  ;;  %vm6900_vm4 = vcmp.eq.s32.totalorder %v6839_v47, %v5495_v10  ;;  %vm6901_vm10 = vcmp.eq.s32.totalorder %v6840_v43, %v5495_v10  ;;  %vm6902_vm9 = vcmp.eq.s32.totalorder %v6841_v48, %v5495_v10  ;;  %v3930_v48 = vld [vmem:[#allocation14] sm:$0xff] }
 0x12c   : > { %v5827_v23 = vsel %vm6899_vm11, 1.0, %v6736_v16  ;;  %v5833_v42 = vsel %vm6900_vm4, 1.0, %v6736_v16  ;;  %v5839_v45 = vsel %vm6901_vm10, 1.0, %v6736_v16  ;;  %v5845_v44 = vsel %vm6902_vm9, 1.0, %v6736_v16 }
 0x12d   : > { %6903 = vst [vmem:[#allocation94_spill] sm:$0xff] %v5845_v44  ;;  %vm6904_vm11 = vcmp.eq.s32.totalorder %v6842_v49, %v5495_v10  ;;  %v5857_v47 = vsel %vm1107_vm15, 1.0, %v6736_v16  ;;  %v5863_v43 = vsel %vm1108_vm0, 1.0, %v6736_v16  ;;  %vm6905_vm4 = vcmp.eq.s32.totalorder %v6845_v52, %v5495_v10 }
 0x12e   : > { %v5851_v46 = vsel %vm6904_vm11, 1.0, %v6736_v16  ;;  %v5868_v44 = vsel %vm6905_vm4, 1.0, %v3930_v48  ;;  %vm6906_vm10 = vcmp.eq.s32.totalorder %v6846_v3, %v5495_v10  ;;  %vm6907_vm15 = vcmp.eq.s32.totalorder %v6847_v53, %v5495_v10 }
 0x12f   : > { %v5873_v49 = vsel %vm6906_vm10, 1.0, %v3930_v48  ;;  %v5878_v50 = vsel %vm6907_vm15, 1.0, %v3930_v48  ;;  %vm6908_vm0 = vcmp.eq.s32.totalorder %v6848_v54, %v5495_v10  ;;  %v5888_v51 = vsel %vm1113_vm14, 1.0, %v3930_v48 }
 0x130   : > { %v5883_v16 = vsel %vm6908_vm0, 1.0, %v3930_v48  ;;  %v5893_v52 = vsel %vm1114_vm1, 1.0, %v3930_v48  ;;  %v5898_v3 = vsel %vm1115_vm2, 1.0, %v3930_v48  ;;  %v5903_v53 = vsel %vm1116_vm7, 1.0, %v3930_v48 }
 0x131   : > { %vm6909_vm9 = vcmp.eq.s32.totalorder %v6853_v60, %v5495_v10  ;;  %v5913_v55 = vsel %vm1118_vm8, 1.0, %v3930_v48  ;;  %v5918_v57 = vsel %vm1119_vm5, 1.0, %v3930_v48  ;;  %v5923_v58 = vsel %vm1120_vm3, 1.0, %v3930_v48 }
 0x132   : > { %v5908_v54 = vsel %vm6909_vm9, 1.0, %v3930_v48  ;;  %v5928_v59 = vsel %vm1121_vm6, 1.0, %v3930_v48  ;;  %vm6910_vm14 = vcmp.eq.s32.totalorder %v6858_v11, %v5495_v10  ;;  %vm6911_vm1 = vcmp.eq.s32.totalorder %v6859_v12, %v5495_v10 }
 0x133   : > { %v5933_v60 = vsel %vm6910_vm14, 1.0, %v3930_v48  ;;  %v5938_v1 = vsel %vm6911_vm1, 1.0, %v3930_v48  ;;  %vm6912_vm2 = vcmp.eq.s32.totalorder %v6860_v13, %v5495_v10  ;;  %vm6913_vm7 = vcmp.eq.s32.totalorder %v6861_v14, %v5495_v10 }
 0x134   : > { %v5943_v2 = vsel %vm6912_vm2, 1.0, %v3930_v48  ;;  %v5948_v4 = vsel %vm6913_vm7, 1.0, %v3930_v48  ;;  %v5953_v5 = vsel %vm1126_vm12, 1.0, %v3930_v48  ;;  %vm6914_vm6 = vcmp.eq.s32.totalorder %v6870_v21, %v5495_v10 }
 0x135   : > { %v5958_v11 = vsel %vm6914_vm6, 1.0, %v3930_v48  ;;  %vm6915_vm8 = vcmp.eq.s32.totalorder %v6871_v22, %v5495_v10  ;;  %vm6917_vm5 = vcmp.eq.s32.totalorder %v6872_v17, %v5495_v10  ;;  %vm6919_vm3 = vcmp.eq.s32.totalorder %v6880_v26, %v5495_v10 }
 0x136   : > { %v5963_v12 = vsel %vm6915_vm8, 1.0, %v3930_v48  ;;  %v5968_v13 = vsel %vm6917_vm5, 1.0, %v3930_v48  ;;  %v5973_v14 = vsel %vm6919_vm3, 1.0, %v3930_v48  ;;  %v5978_v20 = vsel %vm1131_vm13, 1.0, %v3930_v48 }
 0x137   : > { %6916 = vst [vmem:[#allocation95_spill] sm:$0xff] %v5963_v12  ;;  %6918 = vst [vmem:[#allocation96_spill] sm:$0xff] %v5968_v13  ;;  %vm6922_vm12 = vcmp.eq.s32.totalorder %v6882_v27, %v5495_v10  ;;  %v1261_v17 = vpack.c.bf16 %v5605_v61, %v5591_v56  ;;  %v1262_v22 = vpack.c.bf16 %v5617_v63, %v5611_v62  ;;  %v6925_v13 = vld [vmem:[#allocation89_spill] sm:$0xff]  ;;  %v6926_v27 = vld [vmem:[#allocation90_spill] sm:$0xff] }
 0x138   : > { %6920 = vst [vmem:[#allocation97_spill] sm:$0xff] %v5973_v14  ;;  %6921 = vst [vmem:[#allocation24_spill] sm:$0xff] %v5978_v20  ;;  %v5983_v21 = vsel %vm6922_vm12, 1.0, %v3930_v48  ;;  %v1263_v26 = vpack.c.bf16 %v5637_v6, %v5623_v0  ;;  %v1264_v14 = vpack.c.bf16 %v5649_v8, %v5643_v7  ;;  %v1265_v24 = vpack.c.bf16 %v5669_v15, %v5655_v9  ;;  %v6924_v20 = vld [vmem:[#allocation88_spill] sm:$0xff]  ;;  %v6927_v48 = vld [vmem:[#allocation91_spill] sm:$0xff] }
 0x139   : > { %6923 = vst [vmem:[#allocation25_spill] sm:$0xff] %v5983_v21  ;;  %v1266_v10 = vpack.c.bf16 %v6925_v13, %v6924_v20  ;;  %v1267_v21 = vpack.c.bf16 %v6927_v48, %v6926_v27  ;;  %v6928_v56 = vld [vmem:[#allocation92_spill] sm:$0xff]  ;;  %v6929_v12 = vld [vmem:[#allocation93_spill] sm:$0xff]  ;;  %1293 = vst [vmem:[#allocation3] sm:$0xff] %v1261_v17  ;;  %v1270_v63 = vpack.c.bf16 %v5743_v18, %v5737_v29 }
 0x13a   : > { %v1268_v61 = vpack.c.bf16 %v6928_v56, %v5707_v25  ;;  %v1269_v62 = vpack.c.bf16 %v5731_v28, %v6929_v12  ;;  %v1271_v0 = vpack.c.bf16 %v5755_v30, %v5749_v19  ;;  %v1272_v6 = vpack.c.bf16 %v5767_v33, %v5761_v31  ;;  %1294 = vst [vmem:[#allocation3 + $0x8] sm:$0xff] %v1262_v22  ;;  %v6930_v25 = vld [vmem:[#allocation94_spill] sm:$0xff] }
 0x13b   : > { %v1273_v7 = vpack.c.bf16 %v5779_v35, %v5773_v34  ;;  %1295 = vst [vmem:[#allocation3 + $0x10] sm:$0xff] %v1263_v26  ;;  %1296 = vst [vmem:[#allocation3 + $0x18] sm:$0xff] %v1264_v14  ;;  %v1274_v8 = vpack.c.bf16 %v5791_v37, %v5785_v36  ;;  %v1275_v9 = vpack.c.bf16 %v5803_v39, %v5797_v38 }
 0x13c   : > { %1297 = vst [vmem:[#allocation3 + $0x20] sm:$0xff] %v1265_v24  ;;  %v1276_v15 = vpack.c.bf16 %v5815_v41, %v5809_v40  ;;  %v1277_v18 = vpack.c.bf16 %v5827_v23, %v5821_v32  ;;  %1298 = vst [vmem:[#allocation3 + $0x28] sm:$0xff] %v1266_v10  ;;  %v1278_v19 = vpack.c.bf16 %v5839_v45, %v5833_v42 }
 0x13d   : > { %1299 = vst [vmem:[#allocation3 + $0x30] sm:$0xff] %v1267_v21  ;;  %1300 = vst [vmem:[#allocation3 + $0x38] sm:$0xff] %v1268_v61  ;;  %v1279_v28 = vpack.c.bf16 %v5851_v46, %v6930_v25  ;;  %v1280_v29 = vpack.c.bf16 %v5863_v43, %v5857_v47  ;;  %v1281_v30 = vpack.c.bf16 %v5873_v49, %v5868_v44 }
 0x13e   : > { %1301 = vst [vmem:[#allocation3 + $0x40] sm:$0xff] %v1269_v62  ;;  %1302 = vst [vmem:[#allocation3 + $0x48] sm:$0xff] %v1270_v63  ;;  %v1282_v31 = vpack.c.bf16 %v5883_v16, %v5878_v50  ;;  %v1283_v33 = vpack.c.bf16 %v5893_v52, %v5888_v51  ;;  %v1284_v34 = vpack.c.bf16 %v5903_v53, %v5898_v3  ;;  %v6931_v40 = vld [vmem:[#allocation95_spill] sm:$0xff]  ;;  %v6932_v32 = vld [vmem:[#allocation96_spill] sm:$0xff] }
 0x13f   : > { %1303 = vst [vmem:[#allocation3 + $0x50] sm:$0xff] %v1271_v0  ;;  %1304 = vst [vmem:[#allocation3 + $0x58] sm:$0xff] %v1272_v6  ;;  %v1285_v35 = vpack.c.bf16 %v5913_v55, %v5908_v54  ;;  %v1286_v36 = vpack.c.bf16 %v5923_v58, %v5918_v57  ;;  %v1287_v37 = vpack.c.bf16 %v5933_v60, %v5928_v59  ;;  %v6933_v23 = vld [vmem:[#allocation97_spill] sm:$0xff]  ;;  %v6934_v45 = vld [vmem:[#allocation24_spill] sm:$0xff] }
 0x140   : > { %1305 = vst [vmem:[#allocation3 + $0x60] sm:$0xff] %v1273_v7  ;;  %1306 = vst [vmem:[#allocation3 + $0x68] sm:$0xff] %v1274_v8  ;;  %v1288_v38 = vpack.c.bf16 %v5943_v2, %v5938_v1  ;;  %v1289_v39 = vpack.c.bf16 %v5953_v5, %v5948_v4  ;;  %v1290_v41 = vpack.c.bf16 %v6931_v40, %v5958_v11  ;;  %v6935_v44 = vld [vmem:[#allocation25_spill] sm:$0xff] }
 0x141   : > { %1307 = vst [vmem:[#allocation3 + $0x70] sm:$0xff] %v1275_v9  ;;  %1308 = vst [vmem:[#allocation3 + $0x78] sm:$0xff] %v1276_v15  ;;  %v1291_v42 = vpack.c.bf16 %v6933_v23, %v6932_v32  ;;  %v1292_v46 = vpack.c.bf16 %v6935_v44, %v6934_v45 }
 0x142   : > { %1309 = vst [vmem:[#allocation3 + $0x80] sm:$0xff] %v1277_v18  ;;  %1310 = vst [vmem:[#allocation3 + $0x88] sm:$0xff] %v1278_v19 }
 0x143   : > { %1311 = vst [vmem:[#allocation3 + $0x90] sm:$0xff] %v1279_v28  ;;  %1312 = vst [vmem:[#allocation3 + $0x98] sm:$0xff] %v1280_v29 }
 0x144   : > { %1313 = vst [vmem:[#allocation3 + $0xa0] sm:$0xff] %v1281_v30  ;;  %1314 = vst [vmem:[#allocation3 + $0xa8] sm:$0xff] %v1282_v31 }
 0x145   : > { %1315 = vst [vmem:[#allocation3 + $0xb0] sm:$0xff] %v1283_v33  ;;  %1316 = vst [vmem:[#allocation3 + $0xb8] sm:$0xff] %v1284_v34 }
 0x146   : > { %1317 = vst [vmem:[#allocation3 + $0xc0] sm:$0xff] %v1285_v35  ;;  %1318 = vst [vmem:[#allocation3 + $0xc8] sm:$0xff] %v1286_v36 }
 0x147   : > { %1319 = vst [vmem:[#allocation3 + $0xd0] sm:$0xff] %v1287_v37  ;;  %1320 = vst [vmem:[#allocation3 + $0xd8] sm:$0xff] %v1288_v38 }
 0x148   : > { %1321 = vst [vmem:[#allocation3 + $0xe0] sm:$0xff] %v1289_v39  ;;  %1322 = vst [vmem:[#allocation3 + $0xe8] sm:$0xff] %v1290_v41 }
 0x149   : > { %1323 = vst [vmem:[#allocation3 + $0xf0] sm:$0xff] %v1291_v42  ;;  %1324 = vst [vmem:[#allocation3 + $0xf8] sm:$0xff] %v1292_v46 }
 0x1b0   : > { %v3689_v47 = vpop.f32.mrb[0].mxu0  ;;  %v3701_v43 = vpop.f32.mrb[0].mxu1 }
 0x1b1   : > { %723 = vst [vmem:[#allocation15 + $0x8] sm:$0xff] %v3689_v47  ;;  %731 = vst [vmem:[#allocation15 + $0x48] sm:$0xff] %v3701_v43  ;;  %v643_v49 = vpop.f32.mrb[1].mxu0  ;;  %v683_v50 = vpop.f32.mrb[1].mxu1 }
 0x1b2   : > { %722 = vst [vmem:[#allocation15] sm:$0xff] %v643_v49  ;;  %730 = vst [vmem:[#allocation15 + $0x40] sm:$0xff] %v683_v50 }
 0x1b4   : > { %v3692_v16 = vpop.f32.mrb[2].mxu0  ;;  %v3704_v51 = vpop.f32.mrb[2].mxu1 }
 0x1b5   : > { %725 = vst [vmem:[#allocation15 + $0x18] sm:$0xff] %v3692_v16  ;;  %733 = vst [vmem:[#allocation15 + $0x58] sm:$0xff] %v3704_v51  ;;  %v653_v52 = vpop.f32.mrb[3].mxu0  ;;  %v693_v3 = vpop.f32.mrb[3].mxu1 }
 0x1b6   : > { %724 = vst [vmem:[#allocation15 + $0x10] sm:$0xff] %v653_v52  ;;  %732 = vst [vmem:[#allocation15 + $0x50] sm:$0xff] %v693_v3 }
 0x1b8   : > { %v3695_v53 = vpop.f32.mrb[4].mxu0  ;;  %v3707_v54 = vpop.f32.mrb[4].mxu1 }
 0x1b9   : > { %727 = vst [vmem:[#allocation15 + $0x28] sm:$0xff] %v3695_v53  ;;  %735 = vst [vmem:[#allocation15 + $0x68] sm:$0xff] %v3707_v54  ;;  %v663_v55 = vpop.f32.mrb[5].mxu0  ;;  %v703_v57 = vpop.f32.mrb[5].mxu1 }
 0x1ba   : > { %726 = vst [vmem:[#allocation15 + $0x20] sm:$0xff] %v663_v55  ;;  %734 = vst [vmem:[#allocation15 + $0x60] sm:$0xff] %v703_v57 }
 0x1bc   : > { %v3698_v58 = vpop.f32.mrb[6].mxu0  ;;  %v3710_v59 = vpop.f32.mrb[6].mxu1 }
 0x1bd   : > { %729 = vst [vmem:[#allocation15 + $0x38] sm:$0xff] %v3698_v58  ;;  %737 = vst [vmem:[#allocation15 + $0x78] sm:$0xff] %v3710_v59  ;;  %v673_v60 = vpop.f32.mrb[7].mxu0  ;;  %v713_v1 = vpop.f32.mrb[7].mxu1 }
 0x1be   : > { %728 = vst [vmem:[#allocation15 + $0x30] sm:$0xff] %v673_v60  ;;  %736 = vst [vmem:[#allocation15 + $0x70] sm:$0xff] %v713_v1 }
 0x1bf PF: > { %v1342_v2 = vld [vmem:[%s4631_s3 + $0x8] sm:$0xff]  ;;  %v1344_v4 = vld [vmem:[%s4631_s3 + $0x18] sm:$0xff]  ;;  %v1341_v5 = vld [vmem:[%s4631_s3] sm:$0xff]  ;;  %v4320_v20 = vmov 0.0   ;;  %p3354_p3 = scmp.ne.s32.totalorder %s4410_s0, 1 }
 0x1c0   : > { %v3743_v11 = vpack.c.bf16 %v1344_v4, %v1342_v2  ;;  %v1343_v12 = vld [vmem:[%s4631_s3 + $0x10] sm:$0xff]  ;;  %v1346_v13 = vld [vmem:[%s4631_s3 + $0x28] sm:$0xff]  ;;  %v1348_v14 = vld [vmem:[%s4631_s3 + $0x38] sm:$0xff]  ;;  %1437 = vmatprep.mubr.f32.mxu0 %v4320_v20  ;;  %s2975_s30 = sld [smem:[#allocation4]] (!%p3354_p3) }
 0x1c1   : > { %v3745_v21 = vpack.c.bf16 %v1343_v12, %v1341_v5  ;;  %v3747_v17 = vpack.c.bf16 %v1348_v14, %v1346_v13  ;;  %v1345_v22 = vld [vmem:[%s4631_s3 + $0x20] sm:$0xff]  ;;  %v1347_v26 = vld [vmem:[%s4631_s3 + $0x30] sm:$0xff]  ;;  %v1350_v24 = vld [vmem:[%s4631_s3 + $0x48] sm:$0xff] }
 0x1c2   : > { %3744 = vmatprep.subr.bf16.mxu0 %v3743_v11  ;;  %v1352_v10 = vld [vmem:[%s4631_s3 + $0x58] sm:$0xff]  ;;  %v3749_v27 = vpack.c.bf16 %v1347_v26, %v1345_v22  ;;  %v1349_v56 = vld [vmem:[%s4631_s3 + $0x40] sm:$0xff]  ;;  %v1351_v61 = vld [vmem:[%s4631_s3 + $0x50] sm:$0xff] }
 0x1c3   : > { %3746 = vmatpush1.bf16.msra.mxu0 %v3745_v21  ;;  %v3751_v48 = vpack.c.bf16 %v1352_v10, %v1350_v24  ;;  %v1354_v62 = vld [vmem:[%s4631_s3 + $0x68] sm:$0xff]  ;;  %v1356_v63 = vld [vmem:[%s4631_s3 + $0x78] sm:$0xff]  ;;  %v3753_v0 = vpack.c.bf16 %v1351_v61, %v1349_v56  ;;  %v1353_v7 = vld [vmem:[%s4631_s3 + $0x60] sm:$0xff] }
 0x1c4   : > { %3748 = vmatprep.subr.bf16.mxu0 %v3747_v17  ;;  %v3755_v6 = vpack.c.bf16 %v1356_v63, %v1354_v62  ;;  %v1355_v8 = vld [vmem:[%s4631_s3 + $0x70] sm:$0xff]  ;;  %v1358_v9 = vld [vmem:[%s4631_s3 + $0x88] sm:$0xff]  ;;  %v1360_v15 = vld [vmem:[%s4631_s3 + $0x98] sm:$0xff] }
 0x1c5   : > { %v3757_v18 = vpack.c.bf16 %v1355_v8, %v1353_v7  ;;  %v3759_v19 = vpack.c.bf16 %v1360_v15, %v1358_v9  ;;  %v1357_v25 = vld [vmem:[%s4631_s3 + $0x80] sm:$0xff]  ;;  %v1359_v28 = vld [vmem:[%s4631_s3 + $0x90] sm:$0xff]  ;;  %v1362_v29 = vld [vmem:[%s4631_s3 + $0xa8] sm:$0xff] }
 0x1c6   : > { %v1364_v30 = vld [vmem:[%s4631_s3 + $0xb8] sm:$0xff]  ;;  %v1361_v31 = vld [vmem:[%s4631_s3 + $0xa0] sm:$0xff]  ;;  %v1363_v33 = vld [vmem:[%s4631_s3 + $0xb0] sm:$0xff]  ;;  %v3761_v34 = vpack.c.bf16 %v1359_v28, %v1357_v25 }
 0x1c7   : > { %3750 = vmatpush1.bf16.msra.mxu0 %v3749_v27  ;;  %v3931_v35 = vld [vmem:[%s4624_s13 + $0x4] ss:$16 sps:$4 sm:$0xff]   ;;  %v3763_v36 = vpack.c.bf16 %v1364_v30, %v1362_v29  ;;  %v3933_v37 = vld [vmem:[%s4624_s13] ss:$16 sps:$4 sm:$0xff]   ;;  %v1366_v38 = vld [vmem:[%s4631_s3 + $0xc8] sm:$0xff]  ;;  %v3765_v23 = vpack.c.bf16 %v1363_v33, %v1361_v31 }
 0x1c8   : > { %3752 = vmatprep.subr.bf16.mxu0 %v3751_v48  ;;  %v1368_v39 = vld [vmem:[%s4631_s3 + $0xd8] sm:$0xff]  ;;  %1998 = vmatprep.subr.bf16.mxu1 %v3931_v35  ;;  %v1365_v40 = vld [vmem:[%s4631_s3 + $0xc0] sm:$0xff]  ;;  %v1367_v42 = vld [vmem:[%s4631_s3 + $0xd0] sm:$0xff] }
 0x1c9   : > { %1999 = vmatpush1.bf16.msra.mxu1 %v3933_v37  ;;  %v3937_v41 = vld [vmem:[%s4624_s13 + $0x24] ss:$16 sps:$4 sm:$0xff]   ;;  %v3939_v32 = vld [vmem:[%s4624_s13 + $0x20] ss:$16 sps:$4 sm:$0xff]   ;;  %v3767_v45 = vpack.c.bf16 %v1368_v39, %v1366_v38  ;;  %v1370_v44 = vld [vmem:[%s4631_s3 + $0xe8] sm:$0xff]  ;;  %v3769_v50 = vpack.c.bf16 %v1367_v42, %v1365_v40 }
 0x1ca   : > { %2000 = vmatprep.subr.bf16.mxu1 %v3937_v41  ;;  %v1372_v46 = vld [vmem:[%s4631_s3 + $0xf8] sm:$0xff]  ;;  %v3943_v47 = vld [vmem:[%s4624_s13 + $0x44] ss:$16 sps:$4 sm:$0xff]   ;;  %v3945_v49 = vld [vmem:[%s4624_s13 + $0x40] ss:$16 sps:$4 sm:$0xff]  }
 0x1cb   : > { %3754 = vmatpush1.bf16.msra.mxu0 %v3753_v0  ;;  %v1369_v43 = vld [vmem:[%s4631_s3 + $0xe0] sm:$0xff]  ;;  %v3771_v51 = vpack.c.bf16 %v1372_v46, %v1370_v44  ;;  %v1371_v52 = vld [vmem:[%s4631_s3 + $0xf0] sm:$0xff]  ;;  %v6092_v55 = vld [vmem:[%s4624_s13 + $0xc] ss:$16 sps:$4 sm:$0xff]  }
 0x1cc   : > { %3756 = vmatprep.subr.bf16.mxu0 %v3755_v6  ;;  %v3949_v16 = vld [vmem:[%s4624_s13 + $0x64] ss:$16 sps:$4 sm:$0xff]   ;;  %v3951_v3 = vld [vmem:[%s4624_s13 + $0x60] ss:$16 sps:$4 sm:$0xff]   ;;  %v3773_v53 = vpack.c.bf16 %v1371_v52, %v1369_v43  ;;  %v6095_v58 = vld [vmem:[%s4624_s13 + $0x8] ss:$16 sps:$4 sm:$0xff]  }
 0x1cd   : > { %2001 = vmatpush1.bf16.msra.mxu1 %v3939_v32  ;;  %v3955_v54 = vld [vmem:[%s4624_s13 + $0x84] ss:$16 sps:$4 sm:$0xff]   ;;  %v3957_v59 = vld [vmem:[%s4624_s13 + $0x80] ss:$16 sps:$4 sm:$0xff]   ;;  %v6099_v60 = vld [vmem:[%s4624_s13 + $0x2c] ss:$16 sps:$4 sm:$0xff]  }
 0x1ce   : > { %2002 = vmatprep.subr.bf16.mxu1 %v3943_v47  ;;  %v1325_v57 = vld [vmem:[#allocation10] sm:$0xff]  ;;  %v1326_v2 = vld [vmem:[#allocation10 + $0x8] sm:$0xff]  ;;  %v1327_v13 = vld [vmem:[#allocation10 + $0x10] sm:$0xff] }
 0x1cf   : > { %3758 = vmatpush1.bf16.msra.mxu0 %v3757_v18  ;;  %v3961_v1 = vld [vmem:[%s4624_s13 + $0xa4] ss:$16 sps:$4 sm:$0xff]   ;;  %v6104_v4 = vld [vmem:[%s4624_s13 + $0x28] ss:$16 sps:$4 sm:$0xff]   ;;  %v3963_v5 = vld [vmem:[%s4624_s13 + $0xa0] ss:$16 sps:$4 sm:$0xff]  }
 0x1d0   : > { %3760 = vmatprep.subr.bf16.mxu0 %v3759_v19  ;;  %v6110_v11 = vld [vmem:[%s4624_s13 + $0x4c] ss:$16 sps:$4 sm:$0xff]   ;;  %v3967_v12 = vld [vmem:[%s4624_s13 + $0xc4] ss:$16 sps:$4 sm:$0xff]   ;;  %v6115_v14 = vld [vmem:[%s4624_s13 + $0x48] ss:$16 sps:$4 sm:$0xff]  }
 0x1d1   : > { %2003 = vmatpush1.bf16.msra.mxu1 %v3945_v49  ;;  %v3969_v21 = vld [vmem:[%s4624_s13 + $0xc0] ss:$16 sps:$4 sm:$0xff]   ;;  %v6121_v17 = vld [vmem:[%s4624_s13 + $0x6c] ss:$16 sps:$4 sm:$0xff]   ;;  %v3973_v22 = vld [vmem:[%s4624_s13 + $0xe4] ss:$16 sps:$4 sm:$0xff]  }
 0x1d2   : > { %2004 = vmatprep.subr.bf16.mxu1 %v3949_v16  ;;  %v1328_v26 = vld [vmem:[#allocation10 + $0x18] sm:$0xff]  ;;  %v3975_v10 = vld [vmem:[%s4624_s13 + $0xe0] ss:$16 sps:$4 sm:$0xff]   ;;  %v3979_v48 = vld [vmem:[%s4624_s13 + $0x104] ss:$16 sps:$4 sm:$0xff]  }
 0x1d3   : > { %3762 = vmatpush1.bf16.msra.mxu0 %v3761_v34  ;;  %v6126_v24 = vld [vmem:[%s4624_s13 + $0x68] ss:$16 sps:$4 sm:$0xff]   ;;  %v6132_v27 = vld [vmem:[%s4624_s13 + $0x8c] ss:$16 sps:$4 sm:$0xff]   ;;  %v1329_v56 = vld [vmem:[#allocation10 + $0x20] sm:$0xff] }
 0x1d4   : > { %3764 = vmatprep.subr.bf16.mxu0 %v3763_v36  ;;  %v6137_v61 = vld [vmem:[%s4624_s13 + $0x88] ss:$16 sps:$4 sm:$0xff]   ;;  %v3981_v62 = vld [vmem:[%s4624_s13 + $0x100] ss:$16 sps:$4 sm:$0xff]   ;;  %v6143_v63 = vld [vmem:[%s4624_s13 + $0xac] ss:$16 sps:$4 sm:$0xff]  }
 0x1d5   : > { %2005 = vmatpush1.bf16.msra.mxu1 %v3951_v3  ;;  %v3985_v0 = vld [vmem:[%s4624_s13 + $0x124] ss:$16 sps:$4 sm:$0xff]   ;;  %v1330_v6 = vld [vmem:[#allocation10 + $0x28] sm:$0xff]  ;;  %v3987_v9 = vld [vmem:[%s4624_s13 + $0x120] ss:$16 sps:$4 sm:$0xff]  }
 0x1d6   : > { %2006 = vmatprep.subr.bf16.mxu1 %v3955_v54  ;;  %v6148_v7 = vld [vmem:[%s4624_s13 + $0xa8] ss:$16 sps:$4 sm:$0xff]   ;;  %v6151_v8 = vld [vmem:[%s4624_s13 + $0xcc] ss:$16 sps:$4 sm:$0xff]   ;;  %v3991_v15 = vld [vmem:[%s4624_s13 + $0x144] ss:$16 sps:$4 sm:$0xff]  }
 0x1d7   : > { %3766 = vmatpush1.bf16.msra.mxu0 %v3765_v23  ;;  %v3993_v18 = vld [vmem:[%s4624_s13 + $0x140] ss:$16 sps:$4 sm:$0xff]   ;;  %v6162_v25 = vld [vmem:[%s4624_s13 + $0xc8] ss:$16 sps:$4 sm:$0xff]   ;;  %v6166_v28 = vld [vmem:[%s4624_s13 + $0xec] ss:$16 sps:$4 sm:$0xff]  }
 0x1d8   : > { %3768 = vmatprep.subr.bf16.mxu0 %v3767_v45  ;;  %v1331_v19 = vld [vmem:[#allocation10 + $0x30] sm:$0xff]  ;;  %v1332_v31 = vld [vmem:[#allocation10 + $0x38] sm:$0xff]  ;;  %v1333_v37 = vld [vmem:[#allocation10 + $0x40] sm:$0xff] }
 0x1d9   : > { %2007 = vmatpush1.bf16.msra.mxu1 %v3957_v59  ;;  %v3997_v29 = vld [vmem:[%s4624_s13 + $0x164] ss:$16 sps:$4 sm:$0xff]   ;;  %v3999_v30 = vld [vmem:[%s4624_s13 + $0x160] ss:$16 sps:$4 sm:$0xff]   ;;  %v6173_v33 = vld [vmem:[%s4624_s13 + $0xe8] ss:$16 sps:$4 sm:$0xff]  }
 0x1da   : > { %2008 = vmatprep.subr.bf16.mxu1 %v3961_v1  ;;  %v6177_v34 = vld [vmem:[%s4624_s13 + $0x10c] ss:$16 sps:$4 sm:$0xff]   ;;  %v4003_v35 = vld [vmem:[%s4624_s13 + $0x184] ss:$16 sps:$4 sm:$0xff]   ;;  %v4005_v36 = vld [vmem:[%s4624_s13 + $0x180] ss:$16 sps:$4 sm:$0xff]  }
 0x1db   : > { %3770 = vmatpush1.bf16.msra.mxu0 %v3769_v50  ;;  %v6184_v38 = vld [vmem:[%s4624_s13 + $0x108] ss:$16 sps:$4 sm:$0xff]   ;;  %v6188_v39 = vld [vmem:[%s4624_s13 + $0x12c] ss:$16 sps:$4 sm:$0xff]   ;;  %v4009_v40 = vld [vmem:[%s4624_s13 + $0x1a4] ss:$16 sps:$4 sm:$0xff]  }
 0x1dc   : > { %3772 = vmatprep.subr.bf16.mxu0 %v3771_v51  ;;  %v4011_v41 = vld [vmem:[%s4624_s13 + $0x1a0] ss:$16 sps:$4 sm:$0xff]   ;;  %v1334_v32 = vld [vmem:[#allocation10 + $0x48] sm:$0xff]  ;;  %v1336_v47 = vld [vmem:[#allocation10 + $0x58] sm:$0xff] }
 0x1dd   : > { %2009 = vmatpush1.bf16.msra.mxu1 %v3963_v5  ;;  %v6195_v23 = vld [vmem:[%s4624_s13 + $0x128] ss:$16 sps:$4 sm:$0xff]   ;;  %v6199_v42 = vld [vmem:[%s4624_s13 + $0x14c] ss:$16 sps:$4 sm:$0xff]   ;;  %v1335_v45 = vld [vmem:[#allocation10 + $0x50] sm:$0xff] }
 0x1de   : > { %2010 = vmatprep.subr.bf16.mxu1 %v3967_v12  ;;  %v6204_v44 = vld [vmem:[%s4624_s13 + $0x148] ss:$16 sps:$4 sm:$0xff]   ;;  %v6208_v46 = vld [vmem:[%s4624_s13 + $0x16c] ss:$16 sps:$4 sm:$0xff]   ;;  %v1337_v50 = vld [vmem:[#allocation10 + $0x60] sm:$0xff] }
 0x1df   : > { %3774 = vmatpush1.bf16.msra.mxu0 %v3773_v53  ;;  %v6213_v43 = vld [vmem:[%s4624_s13 + $0x168] ss:$16 sps:$4 sm:$0xff]   ;;  %v6217_v49 = vld [vmem:[%s4624_s13 + $0x18c] ss:$16 sps:$4 sm:$0xff]   ;;  %v1339_v53 = vld [vmem:[#allocation10 + $0x70] sm:$0xff] }
 0x1e0   : > { %2111 = vmatprep.subr.bf16.mxu0 %v6092_v55  ;;  %v6222_v16 = vld [vmem:[%s4624_s13 + $0x188] ss:$16 sps:$4 sm:$0xff]   ;;  %v6226_v51 = vld [vmem:[%s4624_s13 + $0x1ac] ss:$16 sps:$4 sm:$0xff]   ;;  %v4017_v1 = vld [vmem:[%s4624_s13 + $0x1c0] ss:$16 sps:$4 sm:$0xff]  }
 0x1e1   : > { %2011 = vmatpush1.bf16.msra.mxu1 %v3969_v21  ;;  %v1338_v52 = vld [vmem:[#allocation10 + $0x68] sm:$0xff]  ;;  %v1340_v54 = vld [vmem:[#allocation10 + $0x78] sm:$0xff]  ;;  %v4021_v5 = vld [vmem:[%s4624_s13 + $0x1e4] ss:$16 sps:$4 sm:$0xff]  }
 0x1e2   : > { %1438 = vmatmul.mubr.f32.vlgmr.msra.gmra.mrb[0].mxu0 %v1325_v57  ;;  %2012 = vmatprep.subr.bf16.mxu1 %v3973_v22  ;;  %v6231_v3 = vld [vmem:[%s4624_s13 + $0x1a8] ss:$16 sps:$4 sm:$0xff]   ;;  %v4015_v57 = vld [vmem:[%s4624_s13 + $0x1c4] ss:$16 sps:$4 sm:$0xff]   ;;  %v6239_v59 = vld [vmem:[%s4624_s13 + $0x1cc] ss:$16 sps:$4 sm:$0xff]  }
 0x1e3   : > { %1443 = vmatprep.mubr.f32.mxu0 %v4320_v20  ;;  %2112 = vmatpush1.bf16.msra.mxu0 %v6095_v58  ;;  %v6249_v12 = vld [vmem:[%s4624_s13 + $0x1ec] ss:$16 sps:$4 sm:$0xff]   ;;  %v6253_v21 = vld [vmem:[%s4624_s13 + $0x1e8] ss:$16 sps:$4 sm:$0xff]  }
 0x1e4   : > { %2113 = vmatprep.subr.bf16.mxu0 %v6099_v60 }
 0x1e5   : > { %2013 = vmatpush1.bf16.msra.mxu1 %v3975_v10 }
 0x1e6   : > { %1444 = vmatmul.mubr.f32.gmra.mrb[2].mxu0 %v1326_v2  ;;  %2014 = vmatprep.subr.bf16.mxu1 %v3979_v48  ;;  %v6243_v2 = vld [vmem:[%s4624_s13 + $0x1c8] ss:$16 sps:$4 sm:$0xff]  }
 0x1e7   : > { %1449 = vmatprep.mubr.f32.mxu0 %v4320_v20  ;;  %2114 = vmatpush1.bf16.msra.mxu0 %v6104_v4 }
 0x1e8   : > { %2115 = vmatprep.subr.bf16.mxu0 %v6110_v11 }
 0x1e9   : > { %2015 = vmatpush1.bf16.msra.mxu1 %v3981_v62 }
 0x1ea   : > { %1450 = vmatmul.mubr.f32.gmra.mrb[4].mxu0 %v1327_v13  ;;  %2016 = vmatprep.subr.bf16.mxu1 %v3985_v0  ;;  %v4023_v13 = vld [vmem:[%s4624_s13 + $0x1e0] ss:$16 sps:$4 sm:$0xff]  }
 0x1eb   : > { %1455 = vmatprep.mubr.f32.mxu0 %v4320_v20  ;;  %2116 = vmatpush1.bf16.msra.mxu0 %v6115_v14 }
 0x1ec   : > { %2117 = vmatprep.subr.bf16.mxu0 %v6121_v17 }
 0x1ed   : > { %2017 = vmatpush1.bf16.msra.mxu1 %v3987_v9 }
 0x1ee   : > { %1456 = vmatmul.mubr.f32.gmra.mrb[6].mxu0 %v1328_v26  ;;  %2018 = vmatprep.subr.bf16.mxu1 %v3991_v15 }
 0x1ef   : > { %1461 = vmatprep.mubr.f32.mxu0 %v4320_v20  ;;  %2118 = vmatpush1.bf16.msra.mxu0 %v6126_v24 }
 0x1f0   : > { %2119 = vmatprep.subr.bf16.mxu0 %v6132_v27 }
 0x1f1   : > { %2019 = vmatpush1.bf16.msra.mxu1 %v3993_v18 }
 0x1f2   : > { %1462 = vmatmul.mubr.f32.gmra.mrb[8].mxu0 %v1329_v56  ;;  %2020 = vmatprep.subr.bf16.mxu1 %v3997_v29 }
 0x1f3   : > { %1467 = vmatprep.mubr.f32.mxu0 %v4320_v20  ;;  %2120 = vmatpush1.bf16.msra.mxu0 %v6137_v61 }
 0x1f4   : > { %2121 = vmatprep.subr.bf16.mxu0 %v6143_v63 }
 0x1f5   : > { %2021 = vmatpush1.bf16.msra.mxu1 %v3999_v30 }
 0x1f6   : > { %1468 = vmatmul.mubr.f32.gmra.mrb[10].mxu0 %v1330_v6  ;;  %2022 = vmatprep.subr.bf16.mxu1 %v4003_v35 }
 0x1f7   : > { %1473 = vmatprep.mubr.f32.mxu0 %v4320_v20  ;;  %2122 = vmatpush1.bf16.msra.mxu0 %v6148_v7 }
 0x1f8   : > { %2123 = vmatprep.subr.bf16.mxu0 %v6151_v8 }
 0x1f9   : > { %2023 = vmatpush1.bf16.msra.mxu1 %v4005_v36 }
 0x1fa   : > { %1474 = vmatmul.mubr.f32.gmra.mrb[12].mxu0 %v1331_v19  ;;  %2024 = vmatprep.subr.bf16.mxu1 %v4009_v40 }
 0x1fb   : > { %1479 = vmatprep.mubr.f32.mxu0 %v4320_v20  ;;  %2124 = vmatpush1.bf16.msra.mxu0 %v6162_v25 }
 0x1fc   : > { %2125 = vmatprep.subr.bf16.mxu0 %v6166_v28 }
 0x1fd   : > { %2025 = vmatpush1.bf16.msra.mxu1 %v4011_v41 }
 0x1fe   : > { %1480 = vmatmul.mubr.f32.gmra.mrb[14].mxu0 %v1332_v31  ;;  %2026 = vmatprep.subr.bf16.mxu1 %v4015_v57 }
 0x1ff   : > { %1485 = vmatprep.mubr.f32.mxu0 %v4320_v20  ;;  %2126 = vmatpush1.bf16.msra.mxu0 %v6173_v33 }
 0x200   : > { %2127 = vmatprep.subr.bf16.mxu0 %v6177_v34 }
 0x201   : > { %2027 = vmatpush1.bf16.msra.mxu1 %v4017_v1 }
 0x202   : > { %1486 = vmatmul.mubr.f32.gmra.mrb[16].mxu0 %v1333_v37  ;;  %2028 = vmatprep.subr.bf16.mxu1 %v4021_v5  ;;  %v1539_v5 = vld [vmem:[#allocation14 + $0x28] sm:$0xff] }
 0x203   : > { %1491 = vmatprep.mubr.f32.mxu0 %v4320_v20  ;;  %2128 = vmatpush1.bf16.msra.mxu0 %v6184_v38 }
 0x204   : > { %2129 = vmatprep.subr.bf16.mxu0 %v6188_v39 }
 0x205   : > { %2029 = vmatpush1.bf16.msra.mxu1 %v4023_v13  ;;  %v1541_v13 = vld [vmem:[#allocation14 + $0x38] sm:$0xff] }
 0x206   : > { %1492 = vmatmul.mubr.f32.gmra.mrb[18].mxu0 %v1334_v32  ;;  %3791 = vmatprep.subr.bf16.mxu1 %v6092_v55 }
 0x207   : > { %1497 = vmatprep.mubr.f32.mxu0 %v4320_v20  ;;  %2130 = vmatpush1.bf16.msra.mxu0 %v6195_v23 }
 0x208   : > { %2131 = vmatprep.subr.bf16.mxu0 %v6199_v42 }
 0x20a   : > { %1498 = vmatmul.mubr.f32.gmra.mrb[20].mxu0 %v1335_v45 }
 0x20b   : > { %1503 = vmatprep.mubr.f32.mxu0 %v4320_v20  ;;  %2132 = vmatpush1.bf16.msra.mxu0 %v6204_v44 }
 0x20c   : > { %2133 = vmatprep.subr.bf16.mxu0 %v6208_v46 }
 0x20e   : > { %1504 = vmatmul.mubr.f32.gmra.mrb[22].mxu0 %v1336_v47 }
 0x20f   : > { %1509 = vmatprep.mubr.f32.mxu0 %v4320_v20  ;;  %2134 = vmatpush1.bf16.msra.mxu0 %v6213_v43 }
 0x210   : > { %2135 = vmatprep.subr.bf16.mxu0 %v6217_v49 }
 0x212   : > { %1510 = vmatmul.mubr.f32.gmra.mrb[24].mxu0 %v1337_v50 }
 0x213   : > { %1515 = vmatprep.mubr.f32.mxu0 %v4320_v20  ;;  %2136 = vmatpush1.bf16.msra.mxu0 %v6222_v16 }
 0x214   : > { %2137 = vmatprep.subr.bf16.mxu0 %v6226_v51 }
 0x216   : > { %1516 = vmatmul.mubr.f32.gmra.mrb[26].mxu0 %v1338_v52 }
 0x217   : > { %1521 = vmatprep.mubr.f32.mxu0 %v4320_v20  ;;  %2138 = vmatpush1.bf16.msra.mxu0 %v6231_v3 }
 0x218   : > { %2139 = vmatprep.subr.bf16.mxu0 %v6239_v59 }
 0x21a   : > { %1522 = vmatmul.mubr.f32.gmra.mrb[28].mxu0 %v1339_v53  ;;  %v1538_v53 = vld [vmem:[#allocation14 + $0x20] sm:$0xff] }
 0x21b   : > { %1527 = vmatprep.mubr.f32.mxu0 %v4320_v20  ;;  %2140 = vmatpush1.bf16.msra.mxu0 %v6243_v2 }
 0x21c   : > { %2141 = vmatprep.subr.bf16.mxu0 %v6249_v12 }
 0x21e   : > { %1528 = vmatmul.mubr.f32.gmra.mrb[30].mxu0 %v1340_v54  ;;  %v1540_v54 = vld [vmem:[#allocation14 + $0x30] sm:$0xff] }
 0x21f   : > { %2142 = vmatpush1.bf16.msra.mxu0 %v6253_v21 }
 0x2b5   : > { %v1439_v20 = vpop.f32.mrb[0].mxu0 }
 0x2b6   : > { %v1441_v22 = vpop.f32.mrb[1].mxu0 }
 0x2b9   : > { %v1445_v26 = vpop.f32.mrb[2].mxu0 }
 0x2ba   : > { %v1598_v10 = vpack.c.bf16 %v1445_v26, %v1439_v20  ;;  %v1447_v48 = vpop.f32.mrb[3].mxu0 }
 0x2bb   : > { %v1599_v56 = vpack.c.bf16 %v1447_v48, %v1441_v22 }
 0x2bd   : > { %v1451_v62 = vpop.f32.mrb[4].mxu0  ;;  %2030 = vmatprep.mubr.bf16.mxu1 %v1599_v56  ;;  %2143 = vmatprep.mubr.bf16.mxu0 %v1599_v56 }
 0x2be   : > { %v1453_v0 = vpop.f32.mrb[5].mxu0  ;;  %2031 = vmatmul.mubr.bf16.vlgmr.msra.gmra.mrb[0].mxu1 %v1598_v10  ;;  %2144 = vmatmul.mubr.bf16.vlgmr.msra.gmra.mrb[32].mxu0 %v1598_v10 }
 0x2bf   : > { %3807 = vmatpush1.bf16.msra.mxu1 %v6095_v58 }
 0x2c0   : > { %3792 = vmatprep.subr.bf16.mxu1 %v6099_v60 }
 0x2c1   : > { %v1457_v6 = vpop.f32.mrb[6].mxu0 }
 0x2c2   : > { %v1600_v9 = vpack.c.bf16 %v1457_v6, %v1451_v62  ;;  %v1459_v15 = vpop.f32.mrb[7].mxu0  ;;  %v1542_v6 = vld [vmem:[#allocation14 + $0x40] sm:$0xff] }
 0x2c3   : > { %v1601_v55 = vpack.c.bf16 %v1459_v15, %v1453_v0  ;;  %3808 = vmatpush1.bf16.msra.mxu1 %v6104_v4  ;;  %v1543_v15 = vld [vmem:[#allocation14 + $0x48] sm:$0xff] }
 0x2c4   : > { %3793 = vmatprep.subr.bf16.mxu1 %v6110_v11 }
 0x2c5   : > { %v1463_v18 = vpop.f32.mrb[8].mxu0  ;;  %2040 = vmatprep.mubr.bf16.mxu1 %v1601_v55  ;;  %2153 = vmatprep.mubr.bf16.mxu0 %v1601_v55  ;;  %v1545_v55 = vld [vmem:[#allocation14 + $0x58] sm:$0xff] }
 0x2c6   : > { %v1465_v19 = vpop.f32.mrb[9].mxu0  ;;  %2041 = vmatmul.mubr.bf16.gmra.mrb[4].mxu1 %v1600_v9  ;;  %2154 = vmatmul.mubr.bf16.gmra.mrb[36].mxu0 %v1600_v9  ;;  %v1544_v9 = vld [vmem:[#allocation14 + $0x50] sm:$0xff] }
 0x2c7   : > { %3809 = vmatpush1.bf16.msra.mxu1 %v6115_v14 }
 0x2c8   : > { %3794 = vmatprep.subr.bf16.mxu1 %v6121_v17 }
 0x2c9   : > { %v1469_v58 = vpop.f32.mrb[10].mxu0 }
 0x2ca   : > { %v1602_v60 = vpack.c.bf16 %v1469_v58, %v1463_v18  ;;  %v1471_v29 = vpop.f32.mrb[11].mxu0  ;;  %v1546_v58 = vld [vmem:[#allocation14 + $0x60] sm:$0xff] }
 0x2cb   : > { %v1603_v30 = vpack.c.bf16 %v1471_v29, %v1465_v19  ;;  %3810 = vmatpush1.bf16.msra.mxu1 %v6126_v24 }
 0x2cc   : > { %3795 = vmatprep.subr.bf16.mxu1 %v6132_v27 }
 0x2cd   : > { %v1475_v4 = vpop.f32.mrb[12].mxu0  ;;  %2050 = vmatprep.mubr.bf16.mxu1 %v1603_v30  ;;  %2163 = vmatprep.mubr.bf16.mxu0 %v1603_v30 }
 0x2ce   : > { %v1477_v11 = vpop.f32.mrb[13].mxu0  ;;  %2051 = vmatmul.mubr.bf16.gmra.mrb[8].mxu1 %v1602_v60  ;;  %2164 = vmatmul.mubr.bf16.gmra.mrb[40].mxu0 %v1602_v60  ;;  %v1548_v60 = vld [vmem:[#allocation14 + $0x70] sm:$0xff] }
 0x2cf   : > { %3811 = vmatpush1.bf16.msra.mxu1 %v6137_v61 }
 0x2d0   : > { %3796 = vmatprep.subr.bf16.mxu1 %v6143_v63 }
 0x2d1   : > { %v1481_v14 = vpop.f32.mrb[14].mxu0 }
 0x2d2   : > { %v1604_v17 = vpack.c.bf16 %v1481_v14, %v1475_v4  ;;  %v1483_v31 = vpop.f32.mrb[15].mxu0  ;;  %v1547_v14 = vld [vmem:[#allocation14 + $0x68] sm:$0xff] }
 0x2d3   : > { %v1605_v35 = vpack.c.bf16 %v1483_v31, %v1477_v11  ;;  %3812 = vmatpush1.bf16.msra.mxu1 %v6148_v7 }
 0x2d4   : > { %3797 = vmatprep.subr.bf16.mxu1 %v6151_v8 }
 0x2d5   : > { %v1487_v24 = vpop.f32.mrb[16].mxu0  ;;  %2060 = vmatprep.mubr.bf16.mxu1 %v1605_v35  ;;  %2173 = vmatprep.mubr.bf16.mxu0 %v1605_v35 }
 0x2d6   : > { %v1489_v27 = vpop.f32.mrb[17].mxu0  ;;  %2061 = vmatmul.mubr.bf16.gmra.mrb[12].mxu1 %v1604_v17  ;;  %2174 = vmatmul.mubr.bf16.gmra.mrb[44].mxu0 %v1604_v17  ;;  %v1549_v17 = vld [vmem:[#allocation14 + $0x78] sm:$0xff] }
 0x2d7   : > { %3813 = vmatpush1.bf16.msra.mxu1 %v6162_v25 }
 0x2d8   : > { %3798 = vmatprep.subr.bf16.mxu1 %v6166_v28 }
 0x2d9   : > { %v1493_v61 = vpop.f32.mrb[18].mxu0 }
 0x2da   : > { %v1606_v63 = vpack.c.bf16 %v1493_v61, %v1487_v24  ;;  %v1495_v36 = vpop.f32.mrb[19].mxu0 }
 0x2db   : > { %v1607_v37 = vpack.c.bf16 %v1495_v36, %v1489_v27  ;;  %3814 = vmatpush1.bf16.msra.mxu1 %v6173_v33 }
 0x2dc   : > { %3799 = vmatprep.subr.bf16.mxu1 %v6177_v34 }
 0x2dd   : > { %v1499_v7 = vpop.f32.mrb[20].mxu0  ;;  %2070 = vmatprep.mubr.bf16.mxu1 %v1607_v37  ;;  %2183 = vmatprep.mubr.bf16.mxu0 %v1607_v37 }
 0x2de   : > { %v1501_v8 = vpop.f32.mrb[21].mxu0  ;;  %2071 = vmatmul.mubr.bf16.gmra.mrb[16].mxu1 %v1606_v63  ;;  %2184 = vmatmul.mubr.bf16.gmra.mrb[48].mxu0 %v1606_v63 }
 0x2df   : > { %3815 = vmatpush1.bf16.msra.mxu1 %v6184_v38 }
 0x2e0   : > { %3800 = vmatprep.subr.bf16.mxu1 %v6188_v39 }
 0x2e1   : > { %v1505_v25 = vpop.f32.mrb[22].mxu0 }
 0x2e2   : > { %v1608_v28 = vpack.c.bf16 %v1505_v25, %v1499_v7  ;;  %v1507_v40 = vpop.f32.mrb[23].mxu0  ;;  %v1550_v25 = vld [vmem:[#allocation14 + $0x80] sm:$0xff] }
 0x2e3   : > { %v1609_v41 = vpack.c.bf16 %v1507_v40, %v1501_v8  ;;  %3816 = vmatpush1.bf16.msra.mxu1 %v6195_v23  ;;  %v1551_v40 = vld [vmem:[#allocation14 + $0x88] sm:$0xff] }
 0x2e4   : > { %3801 = vmatprep.subr.bf16.mxu1 %v6199_v42 }
 0x2e5   : > { %v1511_v33 = vpop.f32.mrb[24].mxu0  ;;  %2080 = vmatprep.mubr.bf16.mxu1 %v1609_v41  ;;  %2193 = vmatprep.mubr.bf16.mxu0 %v1609_v41  ;;  %v1553_v41 = vld [vmem:[#allocation14 + $0x98] sm:$0xff] }
 0x2e6   : > { %v1513_v34 = vpop.f32.mrb[25].mxu0  ;;  %2081 = vmatmul.mubr.bf16.gmra.mrb[20].mxu1 %v1608_v28  ;;  %2194 = vmatmul.mubr.bf16.gmra.mrb[52].mxu0 %v1608_v28  ;;  %v1552_v28 = vld [vmem:[#allocation14 + $0x90] sm:$0xff] }
 0x2e7   : > { %3817 = vmatpush1.bf16.msra.mxu1 %v6204_v44 }
 0x2e8   : > { %3802 = vmatprep.subr.bf16.mxu1 %v6208_v46 }
 0x2e9   : > { %v1517_v38 = vpop.f32.mrb[26].mxu0 }
 0x2ea   : > { %v1610_v39 = vpack.c.bf16 %v1517_v38, %v1511_v33  ;;  %v1519_v32 = vpop.f32.mrb[27].mxu0  ;;  %v1554_v38 = vld [vmem:[#allocation14 + $0xa0] sm:$0xff] }
 0x2eb   : > { %v1611_v45 = vpack.c.bf16 %v1519_v32, %v1513_v34  ;;  %3818 = vmatpush1.bf16.msra.mxu1 %v6213_v43  ;;  %v1534_v43 = vld [vmem:[#allocation14] sm:$0xff] }
 0x2ec   : > { %3803 = vmatprep.subr.bf16.mxu1 %v6217_v49  ;;  %v1536_v49 = vld [vmem:[#allocation14 + $0x10] sm:$0xff] }
 0x2ed   : > { %v1523_v23 = vpop.f32.mrb[28].mxu0  ;;  %2090 = vmatprep.mubr.bf16.mxu1 %v1611_v45 }
 0x2ee   : > { %v1525_v42 = vpop.f32.mrb[29].mxu0  ;;  %2091 = vmatmul.mubr.bf16.gmra.mrb[24].mxu1 %v1610_v39 }
 0x2ef   : > { %3819 = vmatpush1.bf16.msra.mxu1 %v6222_v16  ;;  %v1535_v16 = vld [vmem:[#allocation14 + $0x8] sm:$0xff] }
 0x2f0   : > { %3804 = vmatprep.subr.bf16.mxu1 %v6226_v51  ;;  %v1537_v51 = vld [vmem:[#allocation14 + $0x18] sm:$0xff] }
 0x2f1   : > { %v1529_v47 = vpop.f32.mrb[30].mxu0 }
 0x2f2   : > { %v1612_v44 = vpack.c.bf16 %v1529_v47, %v1523_v23  ;;  %v1531_v50 = vpop.f32.mrb[31].mxu0  ;;  %v1555_v47 = vld [vmem:[#allocation14 + $0xa8] sm:$0xff] }
 0x2f3   : > { %v1613_v46 = vpack.c.bf16 %v1531_v50, %v1525_v42  ;;  %3820 = vmatpush1.bf16.msra.mxu1 %v6231_v3 }
 0x2f4   : > { %3805 = vmatprep.subr.bf16.mxu1 %v6239_v59 }
 0x2f5   : > { %2100 = vmatprep.mubr.bf16.mxu1 %v1613_v46 }
 0x2f6   : > { %2101 = vmatmul.mubr.bf16.gmra.mrb[28].mxu1 %v1612_v44 }
 0x2f7   : > { %3821 = vmatpush1.bf16.msra.mxu1 %v6243_v2  ;;  %2203 = vmatprep.mubr.bf16.mxu1 %v1611_v45 }
 0x2f8   : > { %3806 = vmatprep.subr.bf16.mxu1 %v6249_v12 }
 0x2fb   : > { %3822 = vmatpush1.bf16.msra.mxu1 %v6253_v21 }
 0x2fe   : > { %2204 = vmatmul.mubr.bf16.vlgmr.msra.gmra.mrb[32].mxu1 %v1610_v39  ;;  %v1556_v39 = vld [vmem:[#allocation14 + $0xb0] sm:$0xff] }
 0x2ff   : > { %2213 = vmatprep.mubr.bf16.mxu1 %v1613_v46 }
 0x306   : > { %2214 = vmatmul.mubr.bf16.gmra.mrb[36].mxu1 %v1612_v44  ;;  %v1557_v44 = vld [vmem:[#allocation14 + $0xb8] sm:$0xff] }
 0x391   : > { %v2032_v52 = vpop.f32.mrb[0].mxu1  ;;  %v2145_v3 = vpop.f32.mrb[32].mxu0 }
 0x392   : > { %v2224_v57 = vadd.f32 %v2032_v52, %v1534_v43  ;;  %v2226_v59 = vadd.f32 %v2145_v3, %v1536_v49  ;;  %v2034_v1 = vpop.f32.mrb[1].mxu1  ;;  %v2147_v2 = vpop.f32.mrb[33].mxu0 }
 0x393   : > { %v2225_v12 = vadd.f32 %v2034_v1, %v1535_v16  ;;  %v2227_v20 = vadd.f32 %v2147_v2, %v1537_v51  ;;  %v2036_v21 = vpop.f32.mrb[2].mxu1  ;;  %v2149_v22 = vpop.f32.mrb[34].mxu0  ;;  %v1559_v1 = vld [vmem:[#allocation14 + $0xc8] sm:$0xff]  ;;  %v1561_v2 = vld [vmem:[#allocation14 + $0xd8] sm:$0xff] }
 0x394   : > { %2288 = vst [vmem:[#allocation14] sm:$0xff] %v2224_v57  ;;  %2290 = vst [vmem:[#allocation14 + $0x10] sm:$0xff] %v2226_v59  ;;  %v2228_v26 = vadd.f32 %v2036_v21, %v1538_v53  ;;  %v2230_v10 = vadd.f32 %v2149_v22, %v1540_v54  ;;  %v2038_v48 = vpop.f32.mrb[3].mxu1  ;;  %v2151_v56 = vpop.f32.mrb[35].mxu0  ;;  %v1558_v57 = vld [vmem:[#allocation14 + $0xc0] sm:$0xff]  ;;  %v1560_v59 = vld [vmem:[#allocation14 + $0xd0] sm:$0xff] }
 0x395   : > { %2289 = vst [vmem:[#allocation14 + $0x8] sm:$0xff] %v2225_v12  ;;  %2291 = vst [vmem:[#allocation14 + $0x18] sm:$0xff] %v2227_v20  ;;  %v2229_v62 = vadd.f32 %v2038_v48, %v1539_v5  ;;  %v2231_v0 = vadd.f32 %v2151_v56, %v1541_v13  ;;  %v1562_v12 = vld [vmem:[#allocation14 + $0xe0] sm:$0xff]  ;;  %v1564_v20 = vld [vmem:[#allocation14 + $0xf0] sm:$0xff] }
 0x396   : > { %2292 = vst [vmem:[#allocation14 + $0x20] sm:$0xff] %v2228_v26  ;;  %2294 = vst [vmem:[#allocation14 + $0x30] sm:$0xff] %v2230_v10  ;;  %v1563_v48 = vld [vmem:[#allocation14 + $0xe8] sm:$0xff]  ;;  %v1565_v56 = vld [vmem:[#allocation14 + $0xf8] sm:$0xff] }
 0x397   : > { %2293 = vst [vmem:[#allocation14 + $0x28] sm:$0xff] %v2229_v62  ;;  %2295 = vst [vmem:[#allocation14 + $0x38] sm:$0xff] %v2231_v0 }
 0x399   : > { %v2042_v18 = vpop.f32.mrb[4].mxu1  ;;  %v2155_v19 = vpop.f32.mrb[36].mxu0 }
 0x39a   : > { %v2232_v29 = vadd.f32 %v2042_v18, %v1542_v6  ;;  %v2234_v30 = vadd.f32 %v2155_v19, %v1544_v9  ;;  %v2044_v4 = vpop.f32.mrb[5].mxu1  ;;  %v2157_v11 = vpop.f32.mrb[37].mxu0 }
 0x39b   : > { %v2233_v31 = vadd.f32 %v2044_v4, %v1543_v15  ;;  %v2235_v35 = vadd.f32 %v2157_v11, %v1545_v55  ;;  %v2046_v24 = vpop.f32.mrb[6].mxu1  ;;  %v2159_v27 = vpop.f32.mrb[38].mxu0  ;;  %v1567_v4 = vld [vmem:[#allocation14 + $0x108] sm:$0xff]  ;;  %v1569_v11 = vld [vmem:[#allocation14 + $0x118] sm:$0xff] }
 0x39c   : > { %2296 = vst [vmem:[#allocation14 + $0x40] sm:$0xff] %v2232_v29  ;;  %2298 = vst [vmem:[#allocation14 + $0x50] sm:$0xff] %v2234_v30  ;;  %v2236_v61 = vadd.f32 %v2046_v24, %v1546_v58  ;;  %v2238_v63 = vadd.f32 %v2159_v27, %v1548_v60  ;;  %v2048_v36 = vpop.f32.mrb[7].mxu1  ;;  %v2161_v37 = vpop.f32.mrb[39].mxu0  ;;  %v1566_v29 = vld [vmem:[#allocation14 + $0x100] sm:$0xff]  ;;  %v1568_v30 = vld [vmem:[#allocation14 + $0x110] sm:$0xff] }
 0x39d   : > { %2297 = vst [vmem:[#allocation14 + $0x48] sm:$0xff] %v2233_v31  ;;  %2299 = vst [vmem:[#allocation14 + $0x58] sm:$0xff] %v2235_v35  ;;  %v2237_v7 = vadd.f32 %v2048_v36, %v1547_v14  ;;  %v2239_v8 = vadd.f32 %v2161_v37, %v1549_v17  ;;  %v1570_v31 = vld [vmem:[#allocation14 + $0x120] sm:$0xff]  ;;  %v1572_v35 = vld [vmem:[#allocation14 + $0x130] sm:$0xff] }
 0x39e   : > { %2300 = vst [vmem:[#allocation14 + $0x60] sm:$0xff] %v2236_v61  ;;  %2302 = vst [vmem:[#allocation14 + $0x70] sm:$0xff] %v2238_v63  ;;  %v1571_v36 = vld [vmem:[#allocation14 + $0x128] sm:$0xff]  ;;  %v1573_v37 = vld [vmem:[#allocation14 + $0x138] sm:$0xff] }
 0x39f   : > { %2301 = vst [vmem:[#allocation14 + $0x68] sm:$0xff] %v2237_v7  ;;  %2303 = vst [vmem:[#allocation14 + $0x78] sm:$0xff] %v2239_v8 }
 0x3a1   : > { %v2052_v33 = vpop.f32.mrb[8].mxu1  ;;  %v2165_v34 = vpop.f32.mrb[40].mxu0 }
 0x3a2   : > { %v2240_v32 = vadd.f32 %v2052_v33, %v1550_v25  ;;  %v2242_v45 = vadd.f32 %v2165_v34, %v1552_v28  ;;  %v2054_v23 = vpop.f32.mrb[9].mxu1  ;;  %v2167_v42 = vpop.f32.mrb[41].mxu0 }
 0x3a3   : > { %v2241_v50 = vadd.f32 %v2054_v23, %v1551_v40  ;;  %v2243_v46 = vadd.f32 %v2167_v42, %v1553_v41  ;;  %v2056_v43 = vpop.f32.mrb[10].mxu1  ;;  %v2169_v49 = vpop.f32.mrb[42].mxu0  ;;  %v1575_v23 = vld [vmem:[#allocation14 + $0x148] sm:$0xff]  ;;  %v1577_v42 = vld [vmem:[#allocation14 + $0x158] sm:$0xff] }
 0x3a4   : > { %2304 = vst [vmem:[#allocation14 + $0x80] sm:$0xff] %v2240_v32  ;;  %2306 = vst [vmem:[#allocation14 + $0x90] sm:$0xff] %v2242_v45  ;;  %v2244_v16 = vadd.f32 %v2056_v43, %v1554_v38  ;;  %v2246_v51 = vadd.f32 %v2169_v49, %v1556_v39  ;;  %v2058_v52 = vpop.f32.mrb[11].mxu1  ;;  %v2171_v3 = vpop.f32.mrb[43].mxu0  ;;  %v1574_v32 = vld [vmem:[#allocation14 + $0x140] sm:$0xff]  ;;  %v1576_v45 = vld [vmem:[#allocation14 + $0x150] sm:$0xff] }
 0x3a5   : > { %2305 = vst [vmem:[#allocation14 + $0x88] sm:$0xff] %v2241_v50  ;;  %2307 = vst [vmem:[#allocation14 + $0x98] sm:$0xff] %v2243_v46  ;;  %v2245_v53 = vadd.f32 %v2058_v52, %v1555_v47  ;;  %v2247_v54 = vadd.f32 %v2171_v3, %v1557_v44  ;;  %v1578_v50 = vld [vmem:[#allocation14 + $0x160] sm:$0xff]  ;;  %v1580_v46 = vld [vmem:[#allocation14 + $0x170] sm:$0xff] }
 0x3a6   : > { %2308 = vst [vmem:[#allocation14 + $0xa0] sm:$0xff] %v2244_v16  ;;  %2310 = vst [vmem:[#allocation14 + $0xb0] sm:$0xff] %v2246_v51  ;;  %v1579_v52 = vld [vmem:[#allocation14 + $0x168] sm:$0xff]  ;;  %v1581_v3 = vld [vmem:[#allocation14 + $0x178] sm:$0xff] }
 0x3a7   : > { %2309 = vst [vmem:[#allocation14 + $0xa8] sm:$0xff] %v2245_v53  ;;  %2311 = vst [vmem:[#allocation14 + $0xb8] sm:$0xff] %v2247_v54 }
 0x3a9   : > { %v2062_v5 = vpop.f32.mrb[12].mxu1  ;;  %v2175_v13 = vpop.f32.mrb[44].mxu0 }
 0x3aa   : > { %v2248_v21 = vadd.f32 %v2062_v5, %v1558_v57  ;;  %v2250_v22 = vadd.f32 %v2175_v13, %v1560_v59  ;;  %v2064_v26 = vpop.f32.mrb[13].mxu1  ;;  %v2177_v10 = vpop.f32.mrb[45].mxu0 }
 0x3ab   : > { %v2249_v62 = vadd.f32 %v2064_v26, %v1559_v1  ;;  %v2251_v0 = vadd.f32 %v2177_v10, %v1561_v2  ;;  %v2066_v6 = vpop.f32.mrb[14].mxu1  ;;  %v2179_v9 = vpop.f32.mrb[46].mxu0  ;;  %v1586_v10 = vld [vmem:[#allocation14 + $0x1a0] sm:$0xff] }
 0x3ac   : > { %2312 = vst [vmem:[#allocation14 + $0xc0] sm:$0xff] %v2248_v21  ;;  %2314 = vst [vmem:[#allocation14 + $0xd0] sm:$0xff] %v2250_v22  ;;  %v2252_v15 = vadd.f32 %v2066_v6, %v1562_v12  ;;  %v2254_v55 = vadd.f32 %v2179_v9, %v1564_v20  ;;  %v2068_v18 = vpop.f32.mrb[15].mxu1  ;;  %v2181_v19 = vpop.f32.mrb[47].mxu0  ;;  %v1582_v21 = vld [vmem:[#allocation14 + $0x180] sm:$0xff]  ;;  %v1583_v22 = vld [vmem:[#allocation14 + $0x188] sm:$0xff] }
 0x3ad   : > { %2313 = vst [vmem:[#allocation14 + $0xc8] sm:$0xff] %v2249_v62  ;;  %2315 = vst [vmem:[#allocation14 + $0xd8] sm:$0xff] %v2251_v0  ;;  %v2253_v58 = vadd.f32 %v2068_v18, %v1563_v48  ;;  %v2255_v60 = vadd.f32 %v2181_v19, %v1565_v56  ;;  %v1587_v62 = vld [vmem:[#allocation14 + $0x1a8] sm:$0xff]  ;;  %v1590_v18 = vld [vmem:[#allocation14 + $0x1c0] sm:$0xff] }
 0x3ae   : > { %2316 = vst [vmem:[#allocation14 + $0xe0] sm:$0xff] %v2252_v15  ;;  %2318 = vst [vmem:[#allocation14 + $0xf0] sm:$0xff] %v2254_v55  ;;  %v1591_v19 = vld [vmem:[#allocation14 + $0x1c8] sm:$0xff] }
 0x3af   : > { %2317 = vst [vmem:[#allocation14 + $0xe8] sm:$0xff] %v2253_v58  ;;  %2319 = vst [vmem:[#allocation14 + $0xf8] sm:$0xff] %v2255_v60  ;;  %v1594_v60 = vld [vmem:[#allocation14 + $0x1e0] sm:$0xff] }
 0x3b1   : > { %v2072_v14 = vpop.f32.mrb[16].mxu1  ;;  %v2185_v17 = vpop.f32.mrb[48].mxu0 }
 0x3b2   : > { %v2256_v24 = vadd.f32 %v2072_v14, %v1566_v29  ;;  %v2258_v27 = vadd.f32 %v2185_v17, %v1568_v30  ;;  %v2074_v61 = vpop.f32.mrb[17].mxu1  ;;  %v2187_v63 = vpop.f32.mrb[49].mxu0 }
 0x3b3   : > { %v2257_v7 = vadd.f32 %v2074_v61, %v1567_v4  ;;  %v2259_v8 = vadd.f32 %v2187_v63, %v1569_v11  ;;  %v2076_v25 = vpop.f32.mrb[18].mxu1  ;;  %v2189_v28 = vpop.f32.mrb[50].mxu0  ;;  %v1595_v4 = vld [vmem:[#allocation14 + $0x1e8] sm:$0xff]  ;;  %v1588_v63 = vld [vmem:[#allocation14 + $0x1b0] sm:$0xff] }
 0x3b4   : > { %2320 = vst [vmem:[#allocation14 + $0x100] sm:$0xff] %v2256_v24  ;;  %2322 = vst [vmem:[#allocation14 + $0x110] sm:$0xff] %v2258_v27  ;;  %v2260_v40 = vadd.f32 %v2076_v25, %v1570_v31  ;;  %v2262_v41 = vadd.f32 %v2189_v28, %v1572_v35  ;;  %v2078_v33 = vpop.f32.mrb[19].mxu1  ;;  %v2191_v34 = vpop.f32.mrb[51].mxu0  ;;  %v1584_v24 = vld [vmem:[#allocation14 + $0x190] sm:$0xff]  ;;  %v1585_v27 = vld [vmem:[#allocation14 + $0x198] sm:$0xff] }
 0x3b5   : > { %2321 = vst [vmem:[#allocation14 + $0x108] sm:$0xff] %v2257_v7  ;;  %2323 = vst [vmem:[#allocation14 + $0x118] sm:$0xff] %v2259_v8  ;;  %v2261_v38 = vadd.f32 %v2078_v33, %v1571_v36  ;;  %v2263_v39 = vadd.f32 %v2191_v34, %v1573_v37  ;;  %v1589_v7 = vld [vmem:[#allocation14 + $0x1b8] sm:$0xff]  ;;  %v1592_v33 = vld [vmem:[#allocation14 + $0x1d0] sm:$0xff] }
 0x3b6   : > { %2324 = vst [vmem:[#allocation14 + $0x120] sm:$0xff] %v2260_v40  ;;  %2326 = vst [vmem:[#allocation14 + $0x130] sm:$0xff] %v2262_v41  ;;  %v1593_v34 = vld [vmem:[#allocation14 + $0x1d8] sm:$0xff] }
 0x3b7   : > { %2325 = vst [vmem:[#allocation14 + $0x128] sm:$0xff] %v2261_v38  ;;  %2327 = vst [vmem:[#allocation14 + $0x138] sm:$0xff] %v2263_v39  ;;  %v1596_v39 = vld [vmem:[#allocation14 + $0x1f0] sm:$0xff] }
 0x3b9   : > { %v2082_v47 = vpop.f32.mrb[20].mxu1  ;;  %v2195_v44 = vpop.f32.mrb[52].mxu0 }
 0x3ba   : > { %v2264_v43 = vadd.f32 %v2082_v47, %v1574_v32  ;;  %v2266_v49 = vadd.f32 %v2195_v44, %v1576_v45  ;;  %v2084_v16 = vpop.f32.mrb[21].mxu1  ;;  %v2197_v51 = vpop.f32.mrb[53].mxu0 }
 0x3bb   : > { %v2265_v53 = vadd.f32 %v2084_v16, %v1575_v23  ;;  %v2267_v54 = vadd.f32 %v2197_v51, %v1577_v42  ;;  %v2086_v57 = vpop.f32.mrb[22].mxu1  ;;  %v2199_v59 = vpop.f32.mrb[54].mxu0  ;;  %v1597_v23 = vld [vmem:[#allocation14 + $0x1f8] sm:$0xff]  ;;  %v2452_v16 = vld [vmem:[#allocation2] sm:$0xff] (!%p3354_p3) }
 0x3bc   : > { %2328 = vst [vmem:[#allocation14 + $0x140] sm:$0xff] %v2264_v43  ;;  %2330 = vst [vmem:[#allocation14 + $0x150] sm:$0xff] %v2266_v49  ;;  %v2268_v1 = vadd.f32 %v2086_v57, %v1578_v50  ;;  %v2270_v2 = vadd.f32 %v2199_v59, %v1580_v46  ;;  %v2088_v5 = vpop.f32.mrb[23].mxu1  ;;  %v2201_v13 = vpop.f32.mrb[55].mxu0  ;;  %v2460_v43 = vld [vmem:[#allocation2 + $0x40] sm:$0xff] (!%p3354_p3)  ;;  %v2462_v57 = vld [vmem:[#allocation2 + $0x50] sm:$0xff] (!%p3354_p3) }
 0x3bd   : > { %2329 = vst [vmem:[#allocation14 + $0x148] sm:$0xff] %v2265_v53  ;;  %2331 = vst [vmem:[#allocation14 + $0x158] sm:$0xff] %v2267_v54  ;;  %v2269_v12 = vadd.f32 %v2088_v5, %v1579_v52  ;;  %v2271_v20 = vadd.f32 %v2201_v13, %v1581_v3  ;;  %v2476_v49 = vld [vmem:[#allocation2 + $0xc0] sm:$0xff] (!%p3354_p3)  ;;  %3399 = vmatprep.subr.bf16.mxu0 (!%p3354_p3), %v2460_v43  ;;  %v2461_v52 = vld [vmem:[#allocation2 + $0x48] sm:$0xff] (!%p3354_p3) }
 0x3be   : > { %2332 = vst [vmem:[#allocation14 + $0x160] sm:$0xff] %v2268_v1  ;;  %2334 = vst [vmem:[#allocation14 + $0x170] sm:$0xff] %v2270_v2  ;;  %3463 = vmatprep.subr.bf16.mxu1 (!%p3354_p3), %v2476_v49  ;;  %v2468_v51 = vld [vmem:[#allocation2 + $0x80] sm:$0xff] (!%p3354_p3)  ;;  %v2477_v3 = vld [vmem:[#allocation2 + $0xc8] sm:$0xff] (!%p3354_p3)  ;;  %3400 = vmatpush3.bf16.msra.mxu0 (!%p3354_p3), %v2452_v16 }
 0x3bf   : > { %2333 = vst [vmem:[#allocation14 + $0x168] sm:$0xff] %v2269_v12  ;;  %2335 = vst [vmem:[#allocation14 + $0x178] sm:$0xff] %v2271_v20  ;;  %3464 = vmatpush3.bf16.msra.mxu1 (!%p3354_p3), %v2468_v51  ;;  %3401 = vmatprep.subr.bf16.mxu0 (!%p3354_p3), %v2461_v52  ;;  %v2453_v53 = vld [vmem:[#allocation2 + $0x8] sm:$0xff] (!%p3354_p3)  ;;  %v2478_v59 = vld [vmem:[#allocation2 + $0xd0] sm:$0xff] (!%p3354_p3) }
 0x3c0   : > { %3465 = vmatprep.subr.bf16.mxu1 (!%p3354_p3), %v2477_v3  ;;  %v2469_v54 = vld [vmem:[#allocation2 + $0x88] sm:$0xff] (!%p3354_p3)  ;;  %v2454_v1 = vld [vmem:[#allocation2 + $0x10] sm:$0xff] (!%p3354_p3)  ;;  %v2463_v5 = vld [vmem:[#allocation2 + $0x58] sm:$0xff] (!%p3354_p3) }
 0x3c1   : > { %v2092_v26 = vpop.f32.mrb[24].mxu1  ;;  %v2470_v2 = vld [vmem:[#allocation2 + $0x90] sm:$0xff] (!%p3354_p3)  ;;  %v2479_v13 = vld [vmem:[#allocation2 + $0xd8] sm:$0xff] (!%p3354_p3) }
 0x3c2   : > { %v2272_v48 = vadd.f32 %v2092_v26, %v1582_v21  ;;  %v2094_v56 = vpop.f32.mrb[25].mxu1  ;;  %3402 = vmatpush3.bf16.msra.mxu0 (!%p3354_p3), %v2453_v53  ;;  %v2455_v12 = vld [vmem:[#allocation2 + $0x18] sm:$0xff] (!%p3354_p3)  ;;  %v2357_v21 = vld [vmem:[#allocation14 + $0x8] sm:$0xff] (!%p3354_p3)  ;;  %v2688_v16 = vld [vmem:[#allocation3 + $0x50] sm:$0xff] (!%p3354_p3) }
 0x3c3   : > { %v2273_v0 = vadd.f32 %v2094_v56, %v1583_v22  ;;  %v2096_v6 = vpop.f32.mrb[26].mxu1  ;;  %3466 = vmatpush3.bf16.msra.mxu1 (!%p3354_p3), %v2469_v54  ;;  %3403 = vmatprep.subr.bf16.mxu0 (!%p3354_p3), %v2462_v57  ;;  %v2471_v20 = vld [vmem:[#allocation2 + $0x98] sm:$0xff] (!%p3354_p3)  ;;  %v2361_v22 = vld [vmem:[#allocation14 + $0x28] sm:$0xff] (!%p3354_p3)  ;;  %v2480_v56 = vld [vmem:[#allocation2 + $0xe0] sm:$0xff] (!%p3354_p3) }
 0x3c4   : > { %2336 = vst [vmem:[#allocation14 + $0x180] sm:$0xff] %v2272_v48  ;;  %v2276_v9 = vadd.f32 %v2096_v6, %v1586_v10  ;;  %v2098_v15 = vpop.f32.mrb[27].mxu1  ;;  %3467 = vmatprep.subr.bf16.mxu1 (!%p3354_p3), %v2478_v59  ;;  %v2359_v26 = vld [vmem:[#allocation14 + $0x18] sm:$0xff] (!%p3354_p3)  ;;  %v2464_v48 = vld [vmem:[#allocation2 + $0x60] sm:$0xff] (!%p3354_p3)  ;;  %v2704_v51 = vld [vmem:[#allocation3 + $0xd0] sm:$0xff] (!%p3354_p3) }
 0x3c5   : > { %2337 = vst [vmem:[#allocation14 + $0x188] sm:$0xff] %v2273_v0  ;;  %v2277_v55 = vadd.f32 %v2098_v15, %v1587_v62  ;;  %v2363_v10 = vld [vmem:[#allocation14 + $0x38] sm:$0xff] (!%p3354_p3)  ;;  %v6290_v62 = vpack.c.bf16 (!%p3354_p3), %v2361_v22, %v2357_v21  ;;  %v2456_v6 = vld [vmem:[#allocation2 + $0x20] sm:$0xff] (!%p3354_p3)  ;;  %v2465_v15 = vld [vmem:[#allocation2 + $0x68] sm:$0xff] (!%p3354_p3) }
 0x3c6   : > { %2340 = vst [vmem:[#allocation14 + $0x1a0] sm:$0xff] %v2276_v9  ;;  %3404 = vmatpush3.bf16.msra.mxu0 (!%p3354_p3), %v2454_v1  ;;  %v6292_v0 = vpack.c.bf16 (!%p3354_p3), %v2363_v10, %v2359_v26  ;;  %v2472_v9 = vld [vmem:[#allocation2 + $0xa0] sm:$0xff] (!%p3354_p3)  ;;  %v2375_v43 = vld [vmem:[#allocation14 + $0x98] sm:$0xff] (!%p3354_p3)  ;;  %v2680_v59 = vld [vmem:[#allocation3 + $0x10] sm:$0xff] (!%p3354_p3) }
 0x3c7   : > { %2341 = vst [vmem:[#allocation14 + $0x1a8] sm:$0xff] %v2277_v55  ;;  %3468 = vmatpush3.bf16.msra.mxu1 (!%p3354_p3), %v2470_v2  ;;  %3405 = vmatprep.subr.bf16.mxu0 (!%p3354_p3), %v2463_v5  ;;  %v2481_v55 = vld [vmem:[#allocation2 + $0xe8] sm:$0xff] (!%p3354_p3)  ;;  %v2379_v49 = vld [vmem:[#allocation14 + $0xb8] sm:$0xff] (!%p3354_p3)  ;;  %v2372_v57 = vld [vmem:[#allocation14 + $0x80] sm:$0xff] (!%p3354_p3) }
 0x3c8   : > { %3469 = vmatprep.subr.bf16.mxu1 (!%p3354_p3), %v2479_v13  ;;  %2516 = vmatprep.mubr.bf16.mxu0 (!%p3354_p3), %v6290_v62  ;;  %v6314_v54 = vpack.c.bf16 (!%p3354_p3), %v2379_v49, %v2375_v43  ;;  %v2696_v1 = vld [vmem:[#allocation3 + $0x90] sm:$0xff] (!%p3354_p3)  ;;  %v2376_v2 = vld [vmem:[#allocation14 + $0xa0] sm:$0xff] (!%p3354_p3)  ;;  %v2689_v5 = vld [vmem:[#allocation3 + $0x58] sm:$0xff] (!%p3354_p3) }
 0x3c9   : > { %v2102_v58 = vpop.f32.mrb[28].mxu1  ;;  %2613 = vmatprep.mubr.bf16.mxu1 (!%p3354_p3), %v6292_v0  ;;  %v2705_v13 = vld [vmem:[#allocation3 + $0xd8] sm:$0xff] (!%p3354_p3)  ;;  %v2381_v21 = vld [vmem:[#allocation14 + $0xc8] sm:$0xff] (!%p3354_p3) }
 0x3ca   : > { %v2280_v29 = vadd.f32 %v2102_v58, %v1590_v18  ;;  %v2104_v30 = vpop.f32.mrb[29].mxu1  ;;  %3406 = vmatpush3.bf16.msra.mxu0 (!%p3354_p3), %v2455_v12  ;;  %v2457_v18 = vld [vmem:[#allocation2 + $0x28] sm:$0xff] (!%p3354_p3)  ;;  %v2466_v58 = vld [vmem:[#allocation2 + $0x70] sm:$0xff] (!%p3354_p3)  ;;  %v2383_v26 = vld [vmem:[#allocation14 + $0xd8] sm:$0xff] (!%p3354_p3) }
 0x3cb   : > { %v2281_v11 = vadd.f32 %v2104_v30, %v1591_v19  ;;  %v2106_v14 = vpop.f32.mrb[30].mxu1  ;;  %3470 = vmatpush3.bf16.msra.mxu1 (!%p3354_p3), %v2471_v20  ;;  %3407 = vmatprep.subr.bf16.mxu0 (!%p3354_p3), %v2464_v48  ;;  %v2473_v19 = vld [vmem:[#allocation2 + $0xa8] sm:$0xff] (!%p3354_p3)  ;;  %v2474_v30 = vld [vmem:[#allocation2 + $0xb0] sm:$0xff] (!%p3354_p3)  ;;  %v2387_v10 = vld [vmem:[#allocation14 + $0xf8] sm:$0xff] (!%p3354_p3) }
 0x3cc   : > { %2344 = vst [vmem:[#allocation14 + $0x1c0] sm:$0xff] %v2280_v29  ;;  %v2284_v17 = vadd.f32 %v2106_v14, %v1594_v60  ;;  %v2108_v31 = vpop.f32.mrb[31].mxu1  ;;  %3471 = vmatprep.subr.bf16.mxu1 (!%p3354_p3), %v2480_v56  ;;  %v2482_v60 = vld [vmem:[#allocation2 + $0xf0] sm:$0xff] (!%p3354_p3)  ;;  %v2459_v14 = vld [vmem:[#allocation2 + $0x38] sm:$0xff] (!%p3354_p3)  ;;  %v2385_v22 = vld [vmem:[#allocation14 + $0xe8] sm:$0xff] (!%p3354_p3) }
 0x3cd   : > { %2345 = vst [vmem:[#allocation14 + $0x1c8] sm:$0xff] %v2281_v11  ;;  %v2285_v35 = vadd.f32 %v2108_v31, %v1595_v4  ;;  %v2458_v29 = vld [vmem:[#allocation2 + $0x30] sm:$0xff] (!%p3354_p3)  ;;  %v2467_v4 = vld [vmem:[#allocation2 + $0x78] sm:$0xff] (!%p3354_p3)  ;;  %v2356_v31 = vld [vmem:[#allocation14] sm:$0xff] (!%p3354_p3) }
 0x3ce   : > { %2348 = vst [vmem:[#allocation14 + $0x1e0] sm:$0xff] %v2284_v17  ;;  %3408 = vmatpush3.bf16.msra.mxu0 (!%p3354_p3), %v2456_v6  ;;  %v2483_v11 = vld [vmem:[#allocation2 + $0xf8] sm:$0xff] (!%p3354_p3)  ;;  %v2374_v12 = vld [vmem:[#allocation14 + $0x90] sm:$0xff] (!%p3354_p3)  ;;  %v6320_v6 = vpack.c.bf16 (!%p3354_p3), %v2376_v2, %v2372_v57 }
 0x3cf   : > { %2349 = vst [vmem:[#allocation14 + $0x1e8] sm:$0xff] %v2285_v35  ;;  %3472 = vmatpush3.bf16.msra.mxu1 (!%p3354_p3), %v2472_v9  ;;  %3409 = vmatprep.subr.bf16.mxu0 (!%p3354_p3), %v2465_v15  ;;  %v2475_v17 = vld [vmem:[#allocation2 + $0xb8] sm:$0xff] (!%p3354_p3)  ;;  %v2360_v35 = vld [vmem:[#allocation14 + $0x20] sm:$0xff] (!%p3354_p3)  ;;  %v2378_v20 = vld [vmem:[#allocation14 + $0xb0] sm:$0xff] (!%p3354_p3) }
 0x3d0   : > { %3473 = vmatprep.subr.bf16.mxu1 (!%p3354_p3), %v2481_v55  ;;  %v2681_v48 = vld [vmem:[#allocation3 + $0x18] sm:$0xff] (!%p3354_p3)  ;;  %v6322_v9 = vpack.c.bf16 (!%p3354_p3), %v2378_v20, %v2374_v12  ;;  %v2690_v15 = vld [vmem:[#allocation3 + $0x60] sm:$0xff] (!%p3354_p3)  ;;  %v2398_v12 = vld [vmem:[#allocation14 + $0x150] sm:$0xff] (!%p3354_p3) }
 0x3d1   : > { %v2205_v61 = vpop.f32.mrb[32].mxu1  ;;  %v2697_v56 = vld [vmem:[#allocation3 + $0x98] sm:$0xff] (!%p3354_p3)  ;;  %v2706_v55 = vld [vmem:[#allocation3 + $0xe0] sm:$0xff] (!%p3354_p3)  ;;  %v2402_v20 = vld [vmem:[#allocation14 + $0x170] sm:$0xff] (!%p3354_p3) }
 0x3d2   : > { %v2274_v36 = vadd.f32 %v2205_v61, %v1584_v24  ;;  %v2207_v37 = vpop.f32.mrb[33].mxu1  ;;  %3410 = vmatpush3.bf16.msra.mxu0 (!%p3354_p3), %v2457_v18  ;;  %v2358_v24 = vld [vmem:[#allocation14 + $0x10] sm:$0xff] (!%p3354_p3)  ;;  %v2686_v61 = vld [vmem:[#allocation3 + $0x40] sm:$0xff] (!%p3354_p3)  ;;  %v6324_v18 = vpack.c.bf16 (!%p3354_p3), %v2385_v22, %v2381_v21  ;;  %v2399_v43 = vld [vmem:[#allocation14 + $0x158] sm:$0xff] (!%p3354_p3) }
 0x3d3   : > { %v2275_v8 = vadd.f32 %v2207_v37, %v1585_v27  ;;  %v2209_v25 = vpop.f32.mrb[34].mxu1  ;;  %3474 = vmatpush3.bf16.msra.mxu1 (!%p3354_p3), %v2473_v19  ;;  %3411 = vmatprep.subr.bf16.mxu0 (!%p3354_p3), %v2466_v58  ;;  %v2362_v27 = vld [vmem:[#allocation14 + $0x30] sm:$0xff] (!%p3354_p3)  ;;  %v2369_v37 = vld [vmem:[#allocation14 + $0x68] sm:$0xff] (!%p3354_p3)  ;;  %v6326_v19 = vpack.c.bf16 (!%p3354_p3), %v2387_v10, %v2383_v26  ;;  %v2380_v58 = vld [vmem:[#allocation14 + $0xc0] sm:$0xff] (!%p3354_p3) }
 0x3d4   : > { %2338 = vst [vmem:[#allocation14 + $0x190] sm:$0xff] %v2274_v36  ;;  %v2278_v28 = vadd.f32 %v2209_v25, %v1588_v63  ;;  %v2211_v40 = vpop.f32.mrb[35].mxu1  ;;  %3475 = vmatprep.subr.bf16.mxu1 (!%p3354_p3), %v2482_v60  ;;  %v2702_v63 = vld [vmem:[#allocation3 + $0xc0] sm:$0xff] (!%p3354_p3)  ;;  %v2365_v36 = vld [vmem:[#allocation14 + $0x48] sm:$0xff] (!%p3354_p3)  ;;  %v6296_v25 = vpack.c.bf16 (!%p3354_p3), %v2360_v35, %v2356_v31  ;;  %v2403_v49 = vld [vmem:[#allocation14 + $0x178] sm:$0xff] (!%p3354_p3) }
 0x3d5   : > { %2339 = vst [vmem:[#allocation14 + $0x198] sm:$0xff] %v2275_v8  ;;  %v2279_v41 = vadd.f32 %v2211_v40, %v1589_v7  ;;  %v2367_v7 = vld [vmem:[#allocation14 + $0x58] sm:$0xff] (!%p3354_p3)  ;;  %v2678_v40 = vld [vmem:[#allocation3] sm:$0xff] (!%p3354_p3)  ;;  %v2389_v31 = vld [vmem:[#allocation14 + $0x108] sm:$0xff] (!%p3354_p3)  ;;  %v6350_v2 = vpack.c.bf16 (!%p3354_p3), %v2403_v49, %v2399_v43 }
 0x3d6   : > { %2342 = vst [vmem:[#allocation14 + $0x1b0] sm:$0xff] %v2278_v28  ;;  %3412 = vmatpush3.bf16.msra.mxu0 (!%p3354_p3), %v2458_v29  ;;  %v2371_v8 = vld [vmem:[#allocation14 + $0x78] sm:$0xff] (!%p3354_p3)  ;;  %v6298_v28 = vpack.c.bf16 (!%p3354_p3), %v2362_v27, %v2358_v24  ;;  %v2682_v60 = vld [vmem:[#allocation3 + $0x20] sm:$0xff] (!%p3354_p3)  ;;  %v2393_v35 = vld [vmem:[#allocation14 + $0x128] sm:$0xff] (!%p3354_p3) }
 0x3d7   : > { %2343 = vst [vmem:[#allocation14 + $0x1b8] sm:$0xff] %v2279_v41  ;;  %3476 = vmatpush3.bf16.msra.mxu1 (!%p3354_p3), %v2474_v30  ;;  %3413 = vmatprep.subr.bf16.mxu0 (!%p3354_p3), %v2467_v4  ;;  %v2694_v41 = vld [vmem:[#allocation3 + $0x80] sm:$0xff] (!%p3354_p3)  ;;  %v2691_v4 = vld [vmem:[#allocation3 + $0x68] sm:$0xff] (!%p3354_p3)  ;;  %v2391_v24 = vld [vmem:[#allocation14 + $0x118] sm:$0xff] (!%p3354_p3) }
 0x3d8   : > { %3477 = vmatprep.subr.bf16.mxu1 (!%p3354_p3), %v2483_v11  ;;  %v2698_v29 = vld [vmem:[#allocation3 + $0xa0] sm:$0xff] (!%p3354_p3)  ;;  %v2707_v11 = vld [vmem:[#allocation3 + $0xe8] sm:$0xff] (!%p3354_p3)  ;;  %v2395_v27 = vld [vmem:[#allocation14 + $0x138] sm:$0xff] (!%p3354_p3) }
 0x3d9   : > { %v2215_v38 = vpop.f32.mrb[36].mxu1  ;;  %2355 = sbr.rel (%p3354_p3) target bundleno = 1376 (0x560), region = 84  ;;  %v2384_v30 = vld [vmem:[#allocation14 + $0xe0] sm:$0xff] (!%p3354_p3)  ;;  %v2405_v21 = vld [vmem:[#allocation14 + $0x188] sm:$0xff] (!%p3354_p3) }
 0x3da   : > { %v2282_v32 = vadd.f32 %v2215_v38, %v1592_v33  ;;  %v2217_v45 = vpop.f32.mrb[37].mxu1  ;;  %3414 = vmatpush3.bf16.msra.mxu0 (!%p3354_p3), %v2459_v14  ;;  %v6300_v33 = vpack.c.bf16 (!%p3354_p3), %v2369_v37, %v2365_v36  ;;  %v2364_v38 = vld [vmem:[#allocation14 + $0x40] sm:$0xff] (!%p3354_p3)  ;;  %v2382_v14 = vld [vmem:[#allocation14 + $0xd0] sm:$0xff] (!%p3354_p3)  ;;  %v6332_v36 = vpack.c.bf16 (!%p3354_p3), %v2384_v30, %v2380_v58  ;;  %v2409_v22 = vld [vmem:[#allocation14 + $0x1a8] sm:$0xff] (!%p3354_p3) }
 0x3db   : > { %v2283_v42 = vadd.f32 %v2217_v45, %v1593_v34  ;;  %v2219_v47 = vpop.f32.mrb[38].mxu1  ;;  %3478 = vmatpush3.bf16.msra.mxu1 (!%p3354_p3), %v2475_v17  ;;  %3527 = vmatprep.subr.bf16.mxu0 (!%p3354_p3), %v2686_v61  ;;  %v6302_v34 = vpack.c.bf16 (!%p3354_p3), %v2371_v8, %v2367_v7  ;;  %v2370_v45 = vld [vmem:[#allocation14 + $0x70] sm:$0xff] (!%p3354_p3)  ;;  %v2683_v61 = vld [vmem:[#allocation3 + $0x28] sm:$0xff] (!%p3354_p3)  ;;  %v2404_v58 = vld [vmem:[#allocation14 + $0x180] sm:$0xff] (!%p3354_p3) }
 0x3dc   : > { %2346 = vst [vmem:[#allocation14 + $0x1d0] sm:$0xff] %v2282_v32  ;;  %v2286_v44 = vadd.f32 %v2219_v47, %v1596_v39  ;;  %v2221_v50 = vpop.f32.mrb[39].mxu1  ;;  %3591 = vmatprep.subr.bf16.mxu1 (!%p3354_p3), %v2702_v63  ;;  %v2368_v39 = vld [vmem:[#allocation14 + $0x60] sm:$0xff] (!%p3354_p3)  ;;  %v2366_v32 = vld [vmem:[#allocation14 + $0x50] sm:$0xff] (!%p3354_p3)  ;;  %v2679_v47 = vld [vmem:[#allocation3 + $0x8] sm:$0xff] (!%p3354_p3) }
 0x3dd   : > { %2347 = vst [vmem:[#allocation14 + $0x1d8] sm:$0xff] %v2283_v42  ;;  %v2287_v46 = vadd.f32 %v2221_v50, %v1597_v23  ;;  %2517 = vmatmul.mubr.bf16.vlgmr.msra.gmra.mrb[0].mxu0 (!%p3354_p3), %v6296_v25  ;;  %v2687_v23 = vld [vmem:[#allocation3 + $0x48] sm:$0xff] (!%p3354_p3)  ;;  %v6308_v52 = vpack.c.bf16 (!%p3354_p3), %v2368_v39, %v2364_v38  ;;  %v6310_v3 = vpack.c.bf16 (!%p3354_p3), %v2370_v45, %v2366_v32  ;;  %v2386_v17 = vld [vmem:[#allocation14 + $0xf0] sm:$0xff] (!%p3354_p3)  ;;  %v2388_v38 = vld [vmem:[#allocation14 + $0x100] sm:$0xff] (!%p3354_p3) }
 0x3de   : > { %2350 = vst [vmem:[#allocation14 + $0x1f0] sm:$0xff] %v2286_v44  ;;  %2614 = vmatmul.mubr.bf16.vlgmr.msra.gmra.mrb[0].mxu1 (!%p3354_p3), %v6298_v28  ;;  %v2703_v42 = vld [vmem:[#allocation3 + $0xc8] sm:$0xff] (!%p3354_p3)  ;;  %3528 = vmatpush3.bf16.msra.mxu0 (!%p3354_p3), %v2678_v40  ;;  %v6334_v37 = vpack.c.bf16 (!%p3354_p3), %v2386_v17, %v2382_v14  ;;  %v2692_v7 = vld [vmem:[#allocation3 + $0x70] sm:$0xff] (!%p3354_p3)  ;;  %v6336_v40 = vpack.c.bf16 (!%p3354_p3), %v2393_v35, %v2389_v31  ;;  %v2392_v45 = vld [vmem:[#allocation14 + $0x120] sm:$0xff] (!%p3354_p3) }
 0x3df   : > { %2351 = vst [vmem:[#allocation14 + $0x1f8] sm:$0xff] %v2287_v46  ;;  %3592 = vmatpush3.bf16.msra.mxu1 (!%p3354_p3), %v2694_v41  ;;  %v2695_v44 = vld [vmem:[#allocation3 + $0x88] sm:$0xff] (!%p3354_p3)  ;;  %2524 = vmatprep.mubr.bf16.mxu0 (!%p3354_p3), %v6300_v33  ;;  %v2708_v8 = vld [vmem:[#allocation3 + $0xf0] sm:$0xff] (!%p3354_p3)  ;;  %v6338_v41 = vpack.c.bf16 (!%p3354_p3), %v2395_v27, %v2391_v24  ;;  %v6344_v57 = vpack.c.bf16 (!%p3354_p3), %v2392_v45, %v2388_v38  ;;  %v2407_v26 = vld [vmem:[#allocation14 + $0x198] sm:$0xff] (!%p3354_p3) }
 0x3e0   : > { %v2373_v50 = vld [vmem:[#allocation14 + $0x88] sm:$0xff]  ;;  %2621 = vmatprep.mubr.bf16.mxu1 %v6302_v34  ;;  %3529 = vmatprep.subr.bf16.mxu0 %v2687_v23  ;;  %v2684_v39 = vld [vmem:[#allocation3 + $0x30] sm:$0xff]  ;;  %v2693_v23 = vld [vmem:[#allocation3 + $0x78] sm:$0xff] }
 0x3e1   : > { %v2377_v46 = vld [vmem:[#allocation14 + $0xa8] sm:$0xff]  ;;  %3593 = vmatprep.subr.bf16.mxu1 %v2703_v42  ;;  %v2700_v32 = vld [vmem:[#allocation3 + $0xb0] sm:$0xff]  ;;  %v2709_v42 = vld [vmem:[#allocation3 + $0xf8] sm:$0xff] }
 0x3e2   : > { %3530 = vmatpush3.bf16.msra.mxu0 %v2679_v47  ;;  %v6312_v53 = vpack.c.bf16 %v2377_v46, %v2373_v50  ;;  %v2699_v63 = vld [vmem:[#allocation3 + $0xa8] sm:$0xff]  ;;  %v2390_v47 = vld [vmem:[#allocation14 + $0x110] sm:$0xff]  ;;  %v2411_v10 = vld [vmem:[#allocation14 + $0x1b8] sm:$0xff] }
 0x3e3   : > { %3594 = vmatpush3.bf16.msra.mxu1 %v2695_v44  ;;  %3531 = vmatprep.subr.bf16.mxu0 %v2688_v16  ;;  %v2394_v44 = vld [vmem:[#allocation14 + $0x130] sm:$0xff]  ;;  %v2397_v50 = vld [vmem:[#allocation14 + $0x148] sm:$0xff]  ;;  %v2685_v16 = vld [vmem:[#allocation3 + $0x38] sm:$0xff] }
 0x3e4   : > { %3595 = vmatprep.subr.bf16.mxu1 %v2704_v51  ;;  %v2401_v46 = vld [vmem:[#allocation14 + $0x168] sm:$0xff]  ;;  %v2701_v51 = vld [vmem:[#allocation3 + $0xb8] sm:$0xff]  ;;  %v2410_v30 = vld [vmem:[#allocation14 + $0x1b0] sm:$0xff] }
 0x3e5   : > { %2525 = vmatmul.mubr.bf16.gmra.mrb[4].mxu0 %v6308_v52  ;;  %v2415_v14 = vld [vmem:[#allocation14 + $0x1d8] sm:$0xff] }
 0x3e6   : > { %2622 = vmatmul.mubr.bf16.gmra.mrb[4].mxu1 %v6310_v3  ;;  %2532 = vmatprep.mubr.bf16.mxu0 %v6312_v53  ;;  %v2419_v17 = vld [vmem:[#allocation14 + $0x1f8] sm:$0xff] }
 0x3e7   : > { %2629 = vmatprep.mubr.bf16.mxu1 %v6314_v54  ;;  %3532 = vmatpush3.bf16.msra.mxu0 %v2680_v59  ;;  %v6346_v59 = vpack.c.bf16 %v2394_v44, %v2390_v47  ;;  %v2451_v27 = vpack.c.bf16 %v2419_v17, %v2415_v14 }
 0x3e8   : > { %3596 = vmatpush3.bf16.msra.mxu1 %v2696_v1  ;;  %3533 = vmatprep.subr.bf16.mxu0 %v2689_v5  ;;  %v6348_v1 = vpack.c.bf16 %v2401_v46, %v2397_v50  ;;  %v2396_v5 = vld [vmem:[#allocation14 + $0x140] sm:$0xff] }
 0x3e9   : > { %3597 = vmatprep.subr.bf16.mxu1 %v2705_v13  ;;  %v2400_v13 = vld [vmem:[#allocation14 + $0x160] sm:$0xff] }
 0x3eb   : > { %3534 = vmatpush3.bf16.msra.mxu0 %v2681_v48  ;;  %v2440_v48 = vpack.c.bf16 %v2400_v13, %v2396_v5 }
 0x3ec   : > { %3598 = vmatpush3.bf16.msra.mxu1 %v2697_v56  ;;  %3535 = vmatprep.subr.bf16.mxu0 %v2690_v15  ;;  %v2442_v56 = vpack.c.bf16 %v2402_v20, %v2398_v12  ;;  %v2445_v15 = vpack.c.bf16 %v2409_v22, %v2405_v21 }
 0x3ed   : > { %3599 = vmatprep.subr.bf16.mxu1 %v2706_v55  ;;  %2533 = vmatmul.mubr.bf16.gmra.mrb[8].mxu0 %v6320_v6  ;;  %v2447_v55 = vpack.c.bf16 %v2411_v10, %v2407_v26 }
 0x3ee   : > { %2630 = vmatmul.mubr.bf16.gmra.mrb[8].mxu1 %v6322_v9  ;;  %2540 = vmatprep.mubr.bf16.mxu0 %v6324_v18 }
 0x3ef   : > { %2637 = vmatprep.mubr.bf16.mxu1 %v6326_v19  ;;  %3536 = vmatpush3.bf16.msra.mxu0 %v2682_v60  ;;  %v2408_v60 = vld [vmem:[#allocation14 + $0x1a0] sm:$0xff] }
 0x3f0   : > { %3600 = vmatpush3.bf16.msra.mxu1 %v2698_v29  ;;  %3537 = vmatprep.subr.bf16.mxu0 %v2691_v4  ;;  %v2406_v29 = vld [vmem:[#allocation14 + $0x190] sm:$0xff]  ;;  %v2413_v4 = vld [vmem:[#allocation14 + $0x1c8] sm:$0xff]  ;;  %v2444_v31 = vpack.c.bf16 %v2408_v60, %v2404_v58 }
 0x3f1   : > { %3601 = vmatprep.subr.bf16.mxu1 %v2707_v11  ;;  %v2417_v11 = vld [vmem:[#allocation14 + $0x1e8] sm:$0xff]  ;;  %v2446_v35 = vpack.c.bf16 %v2410_v30, %v2406_v29 }
 0x3f2   : > { %v2449_v24 = vpack.c.bf16 %v2417_v11, %v2413_v4 }
 0x3f3   : > { %3538 = vmatpush3.bf16.msra.mxu0 %v2683_v61  ;;  %v2412_v61 = vld [vmem:[#allocation14 + $0x1c0] sm:$0xff] }
 0x3f4   : > { %3602 = vmatpush3.bf16.msra.mxu1 %v2699_v63  ;;  %3539 = vmatprep.subr.bf16.mxu0 %v2692_v7  ;;  %v2416_v63 = vld [vmem:[#allocation14 + $0x1e0] sm:$0xff]  ;;  %v2414_v7 = vld [vmem:[#allocation14 + $0x1d0] sm:$0xff] }
 0x3f5   : > { %3603 = vmatprep.subr.bf16.mxu1 %v2708_v8  ;;  %2541 = vmatmul.mubr.bf16.gmra.mrb[12].mxu0 %v6332_v36  ;;  %v2418_v8 = vld [vmem:[#allocation14 + $0x1f0] sm:$0xff]  ;;  %v2448_v38 = vpack.c.bf16 %v2416_v63, %v2412_v61 }
 0x3f6   : > { %2638 = vmatmul.mubr.bf16.gmra.mrb[12].mxu1 %v6334_v37  ;;  %2548 = vmatprep.mubr.bf16.mxu0 %v6336_v40 }
 0x3f7   : > { %2645 = vmatprep.mubr.bf16.mxu1 %v6338_v41  ;;  %3540 = vmatpush3.bf16.msra.mxu0 %v2684_v39  ;;  %v2450_v39 = vpack.c.bf16 %v2418_v8, %v2414_v7 }
 0x3f8   : > { %3604 = vmatpush3.bf16.msra.mxu1 %v2700_v32  ;;  %3541 = vmatprep.subr.bf16.mxu0 %v2693_v23 }
 0x3f9   : > { %3605 = vmatprep.subr.bf16.mxu1 %v2709_v42 }
 0x3fb   : > { %3542 = vmatpush3.bf16.msra.mxu0 %v2685_v16 }
 0x3fc   : > { %3606 = vmatpush3.bf16.msra.mxu1 %v2701_v51 }
 0x3fd   : > { %2549 = vmatmul.mubr.bf16.gmra.mrb[16].mxu0 %v6344_v57 }
 0x3fe   : > { %2646 = vmatmul.mubr.bf16.gmra.mrb[16].mxu1 %v6346_v59  ;;  %2556 = vmatprep.mubr.bf16.mxu0 %v6348_v1 }
 0x3ff   : > { %2653 = vmatprep.mubr.bf16.mxu1 %v6350_v2 }
 0x405   : > { %2557 = vmatmul.mubr.bf16.gmra.mrb[20].mxu0 %v2440_v48 }
 0x406   : > { %2654 = vmatmul.mubr.bf16.gmra.mrb[20].mxu1 %v2442_v56  ;;  %2564 = vmatprep.mubr.bf16.mxu0 %v2445_v15 }
 0x407   : > { %2661 = vmatprep.mubr.bf16.mxu1 %v2447_v55 }
 0x40d   : > { %2565 = vmatmul.mubr.bf16.gmra.mrb[24].mxu0 %v2444_v31 }
 0x40e   : > { %2662 = vmatmul.mubr.bf16.gmra.mrb[24].mxu1 %v2446_v35  ;;  %2572 = vmatprep.mubr.bf16.mxu0 %v2449_v24 }
 0x40f   : > { %2669 = vmatprep.mubr.bf16.mxu1 %v2451_v27 }
 0x415   : > { %2573 = vmatmul.mubr.bf16.gmra.mrb[28].mxu0 %v2448_v38 }
 0x416   : > { %2670 = vmatmul.mubr.bf16.gmra.mrb[28].mxu1 %v2450_v39  ;;  %2742 = vmatprep.mubr.bf16.mxu0 %v6290_v62 }
 0x417   : > { %2839 = vmatprep.mubr.bf16.mxu1 %v6292_v0 }
 0x41d   : > { %2743 = vmatmul.mubr.bf16.vlgmr.msra.gmra.mrb[32].mxu0 %v6296_v25 }
 0x41e   : > { %2840 = vmatmul.mubr.bf16.vlgmr.msra.gmra.mrb[32].mxu1 %v6298_v28  ;;  %2750 = vmatprep.mubr.bf16.mxu0 %v6300_v33 }
 0x41f   : > { %2847 = vmatprep.mubr.bf16.mxu1 %v6302_v34 }
 0x425   : > { %2751 = vmatmul.mubr.bf16.gmra.mrb[36].mxu0 %v6308_v52 }
 0x426   : > { %2848 = vmatmul.mubr.bf16.gmra.mrb[36].mxu1 %v6310_v3  ;;  %2758 = vmatprep.mubr.bf16.mxu0 %v6312_v53 }
 0x427   : > { %2855 = vmatprep.mubr.bf16.mxu1 %v6314_v54 }
 0x42d   : > { %2759 = vmatmul.mubr.bf16.gmra.mrb[40].mxu0 %v6320_v6 }
 0x42e   : > { %2856 = vmatmul.mubr.bf16.gmra.mrb[40].mxu1 %v6322_v9  ;;  %2766 = vmatprep.mubr.bf16.mxu0 %v6324_v18 }
 0x42f   : > { %2863 = vmatprep.mubr.bf16.mxu1 %v6326_v19 }
 0x435   : > { %2767 = vmatmul.mubr.bf16.gmra.mrb[44].mxu0 %v6332_v36 }
 0x436   : > { %2864 = vmatmul.mubr.bf16.gmra.mrb[44].mxu1 %v6334_v37  ;;  %2774 = vmatprep.mubr.bf16.mxu0 %v6336_v40 }
 0x437   : > { %2871 = vmatprep.mubr.bf16.mxu1 %v6338_v41 }
 0x43d   : > { %2775 = vmatmul.mubr.bf16.gmra.mrb[48].mxu0 %v6344_v57 }
 0x43e   : > { %2872 = vmatmul.mubr.bf16.gmra.mrb[48].mxu1 %v6346_v59  ;;  %2782 = vmatprep.mubr.bf16.mxu0 %v6348_v1 }
 0x43f   : > { %2879 = vmatprep.mubr.bf16.mxu1 %v6350_v2 }
 0x445   : > { %2783 = vmatmul.mubr.bf16.gmra.mrb[52].mxu0 %v2440_v48 }
 0x446   : > { %2880 = vmatmul.mubr.bf16.gmra.mrb[52].mxu1 %v2442_v56  ;;  %2790 = vmatprep.mubr.bf16.mxu0 %v2445_v15 }
 0x447   : > { %2887 = vmatprep.mubr.bf16.mxu1 %v2447_v55 }
 0x44d   : > { %2791 = vmatmul.mubr.bf16.gmra.mrb[56].mxu0 %v2444_v31 }
 0x44e   : > { %2888 = vmatmul.mubr.bf16.gmra.mrb[56].mxu1 %v2446_v35  ;;  %2798 = vmatprep.mubr.bf16.mxu0 %v2449_v24 }
 0x44f   : > { %2895 = vmatprep.mubr.bf16.mxu1 %v2451_v27 }
 0x455   : > { %2799 = vmatmul.mubr.bf16.gmra.mrb[60].mxu0 %v2448_v38 }
 0x456   : > { %2896 = vmatmul.mubr.bf16.gmra.mrb[60].mxu1 %v2450_v39 }
 0x4b0   : > { %v3415_v62 = vpop.f32.mrb[0].mxu0 }
 0x4b1   : > { %v3479_v0 = vpop.f32.mrb[0].mxu1  ;;  %v3416_v25 = vpop.f32.mrb[1].mxu0 }
 0x4b2   : > { %v3480_v28 = vpop.f32.mrb[1].mxu1  ;;  %v3417_v33 = vadd.f32 %v3416_v25, %v3415_v62  ;;  %v3418_v52 = vpop.f32.mrb[2].mxu0 }
 0x4b3   : > { %v3481_v34 = vadd.f32 %v3480_v28, %v3479_v0  ;;  %v3482_v3 = vpop.f32.mrb[2].mxu1  ;;  %v3419_v53 = vpop.f32.mrb[3].mxu0 }
 0x4b4   : > { %v3483_v54 = vpop.f32.mrb[3].mxu1  ;;  %v3420_v9 = vadd.f32 %v3419_v53, %v3418_v52 }
 0x4b5   : > { %v6378_v6 = vadd.f32 %v3481_v34, %v3417_v33  ;;  %v3484_v18 = vadd.f32 %v3483_v54, %v3482_v3 }
 0x4b7   : > { %v6380_v19 = vadd.f32 %v3484_v18, %v3420_v9 }
 0x4b8   : > { %v3421_v36 = vpop.f32.mrb[4].mxu0 }
 0x4b9   : > { %v3485_v37 = vpop.f32.mrb[4].mxu1  ;;  %v3422_v40 = vpop.f32.mrb[5].mxu0 }
 0x4ba   : > { %v3486_v41 = vpop.f32.mrb[5].mxu1  ;;  %v3423_v32 = vadd.f32 %v3422_v40, %v3421_v36  ;;  %v3424_v23 = vpop.f32.mrb[6].mxu0 }
 0x4bb   : > { %v3487_v45 = vadd.f32 %v3486_v41, %v3485_v37  ;;  %v3488_v42 = vpop.f32.mrb[6].mxu1  ;;  %v3425_v47 = vpop.f32.mrb[7].mxu0 }
 0x4bc   : > { %v3489_v44 = vpop.f32.mrb[7].mxu1  ;;  %v3426_v46 = vadd.f32 %v3425_v47, %v3424_v23 }
 0x4bd   : > { %v6382_v50 = vadd.f32 %v3487_v45, %v3423_v32  ;;  %v3490_v43 = vadd.f32 %v3489_v44, %v3488_v42 }
 0x4bf   : > { %v6384_v49 = vadd.f32 %v3490_v43, %v3426_v46 }
 0x4c0   : > { %v3427_v16 = vpop.f32.mrb[8].mxu0 }
 0x4c1   : > { %v3491_v51 = vpop.f32.mrb[8].mxu1  ;;  %v3428_v57 = vpop.f32.mrb[9].mxu0 }
 0x4c2   : > { %v3492_v59 = vpop.f32.mrb[9].mxu1  ;;  %v3429_v1 = vadd.f32 %v3428_v57, %v3427_v16  ;;  %v3430_v5 = vpop.f32.mrb[10].mxu0 }
 0x4c3   : > { %v3493_v2 = vadd.f32 %v3492_v59, %v3491_v51  ;;  %v3494_v13 = vpop.f32.mrb[10].mxu1  ;;  %v3431_v12 = vpop.f32.mrb[11].mxu0 }
 0x4c4   : > { %v3495_v20 = vpop.f32.mrb[11].mxu1  ;;  %v3432_v22 = vadd.f32 %v3431_v12, %v3430_v5 }
 0x4c5   : > { %v6386_v21 = vadd.f32 %v3493_v2, %v3429_v1  ;;  %v3496_v26 = vadd.f32 %v3495_v20, %v3494_v13 }
 0x4c7   : > { %v6388_v10 = vadd.f32 %v3496_v26, %v3432_v22 }
 0x4c8   : > { %v3433_v48 = vpop.f32.mrb[12].mxu0 }
 0x4c9   : > { %v3497_v56 = vpop.f32.mrb[12].mxu1  ;;  %v3434_v15 = vpop.f32.mrb[13].mxu0 }
 0x4ca   : > { %v3498_v55 = vpop.f32.mrb[13].mxu1  ;;  %v3435_v58 = vadd.f32 %v3434_v15, %v3433_v48  ;;  %v3436_v29 = vpop.f32.mrb[14].mxu0 }
 0x4cb   : > { %v3499_v60 = vadd.f32 %v3498_v55, %v3497_v56  ;;  %v3500_v30 = vpop.f32.mrb[14].mxu1  ;;  %v3437_v4 = vpop.f32.mrb[15].mxu0 }
 0x4cc   : > { %v3501_v11 = vpop.f32.mrb[15].mxu1  ;;  %v3438_v17 = vadd.f32 %v3437_v4, %v3436_v29 }
 0x4cd   : > { %v6390_v14 = vadd.f32 %v3499_v60, %v3435_v58  ;;  %v3502_v31 = vadd.f32 %v3501_v11, %v3500_v30 }
 0x4cf   : > { %v6392_v35 = vadd.f32 %v3502_v31, %v3438_v17 }
 0x4d0   : > { %v3439_v24 = vpop.f32.mrb[16].mxu0 }
 0x4d1   : > { %v3503_v27 = vpop.f32.mrb[16].mxu1  ;;  %v3440_v61 = vpop.f32.mrb[17].mxu0 }
 0x4d2   : > { %v3504_v63 = vpop.f32.mrb[17].mxu1  ;;  %v3441_v7 = vadd.f32 %v3440_v61, %v3439_v24  ;;  %v3442_v38 = vpop.f32.mrb[18].mxu0  ;;  %v2904_v61 = vld [vmem:[#allocation15] sm:$0xff] }
 0x4d3   : > { %v3505_v8 = vadd.f32 %v3504_v63, %v3503_v27  ;;  %v3506_v39 = vpop.f32.mrb[18].mxu1  ;;  %v3443_v62 = vpop.f32.mrb[19].mxu0 }
 0x4d4   : > { %v3507_v0 = vpop.f32.mrb[19].mxu1  ;;  %v3444_v28 = vadd.f32 %v3443_v62, %v3442_v38 }
 0x4d5   : > { %v6394_v25 = vadd.f32 %v3505_v8, %v3441_v7  ;;  %v3508_v33 = vadd.f32 %v3507_v0, %v3506_v39  ;;  %v2905_v0 = vld [vmem:[#allocation15 + $0x8] sm:$0xff] }
 0x4d7   : > { %v6396_v34 = vadd.f32 %v3508_v33, %v3444_v28 }
 0x4d8   : > { %v3445_v52 = vpop.f32.mrb[20].mxu0 }
 0x4d9   : > { %v3509_v3 = vpop.f32.mrb[20].mxu1  ;;  %v3446_v53 = vpop.f32.mrb[21].mxu0 }
 0x4da   : > { %v3510_v54 = vpop.f32.mrb[21].mxu1  ;;  %v3447_v9 = vadd.f32 %v3446_v53, %v3445_v52  ;;  %v3448_v36 = vpop.f32.mrb[22].mxu0  ;;  %v2920_v52 = vmul.f32 %v2904_v61, %v6378_v6 }
 0x4db   : > { %v3511_v18 = vadd.f32 %v3510_v54, %v3509_v3  ;;  %v3512_v37 = vpop.f32.mrb[22].mxu1  ;;  %v3449_v40 = vpop.f32.mrb[23].mxu0 }
 0x4dc   : > { %v3513_v41 = vpop.f32.mrb[23].mxu1  ;;  %v3450_v45 = vadd.f32 %v3449_v40, %v3448_v36 }
 0x4dd   : > { %v6398_v32 = vadd.f32 %v3511_v18, %v3447_v9  ;;  %v3514_v23 = vadd.f32 %v3513_v41, %v3512_v37  ;;  %v2921_v9 = vmul.f32 %v2905_v0, %v6380_v19 }
 0x4df   : > { %v6400_v42 = vadd.f32 %v3514_v23, %v3450_v45  ;;  %v2906_v45 = vld [vmem:[#allocation15 + $0x10] sm:$0xff] }
 0x4e0   : > { %v3451_v47 = vpop.f32.mrb[24].mxu0 }
 0x4e1   : > { %v3515_v44 = vpop.f32.mrb[24].mxu1  ;;  %v3452_v46 = vpop.f32.mrb[25].mxu0 }
 0x4e2   : > { %v3516_v43 = vpop.f32.mrb[25].mxu1  ;;  %v3453_v16 = vadd.f32 %v3452_v46, %v3451_v47  ;;  %v3454_v57 = vpop.f32.mrb[26].mxu0 }
 0x4e3   : > { %v3517_v51 = vadd.f32 %v3516_v43, %v3515_v44  ;;  %v3518_v59 = vpop.f32.mrb[26].mxu1  ;;  %v3455_v1 = vpop.f32.mrb[27].mxu0 }
 0x4e4   : > { %v3519_v2 = vpop.f32.mrb[27].mxu1  ;;  %v3456_v13 = vadd.f32 %v3455_v1, %v3454_v57  ;;  %v2907_v57 = vld [vmem:[#allocation15 + $0x18] sm:$0xff]  ;;  %v2922_v1 = vmul.f32 %v2906_v45, %v6382_v50  ;;  %v2909_v50 = vld [vmem:[#allocation15 + $0x28] sm:$0xff] }
 0x4e5   : > { %v6402_v5 = vadd.f32 %v3517_v51, %v3453_v16  ;;  %v3520_v12 = vadd.f32 %v3519_v2, %v3518_v59 }
 0x4e7   : > { %v6404_v20 = vadd.f32 %v3520_v12, %v3456_v13  ;;  %v2923_v12 = vmul.f32 %v2907_v57, %v6384_v49 }
 0x4e8   : > { %v3457_v22 = vpop.f32.mrb[28].mxu0 }
 0x4e9   : > { %v3521_v26 = vpop.f32.mrb[28].mxu1  ;;  %v3458_v48 = vpop.f32.mrb[29].mxu0 }
 0x4ea   : > { %v3522_v56 = vpop.f32.mrb[29].mxu1  ;;  %v3459_v15 = vadd.f32 %v3458_v48, %v3457_v22  ;;  %v3460_v58 = vpop.f32.mrb[30].mxu0 }
 0x4eb   : > { %v3523_v55 = vadd.f32 %v3522_v56, %v3521_v26  ;;  %v3524_v60 = vpop.f32.mrb[30].mxu1  ;;  %v3461_v29 = vpop.f32.mrb[31].mxu0 }
 0x4ec   : > { %v3525_v30 = vpop.f32.mrb[31].mxu1  ;;  %v3462_v11 = vadd.f32 %v3461_v29, %v3460_v58  ;;  %v2908_v58 = vld [vmem:[#allocation15 + $0x20] sm:$0xff] }
 0x4ed   : > { %v6406_v4 = vadd.f32 %v3523_v55, %v3459_v15  ;;  %v3526_v17 = vadd.f32 %v3525_v30, %v3524_v60 }
 0x4ef   : > { %v6408_v31 = vadd.f32 %v3526_v17, %v3462_v11 }
 0x4f0   : > { %v3543_v24 = vpop.f32.mrb[32].mxu0 }
 0x4f1   : > { %v3607_v27 = vpop.f32.mrb[32].mxu1  ;;  %v3544_v63 = vpop.f32.mrb[33].mxu0 }
 0x4f2   : > { %v3608_v7 = vpop.f32.mrb[33].mxu1  ;;  %v3545_v8 = vadd.f32 %v3544_v63, %v3543_v24  ;;  %v3546_v39 = vpop.f32.mrb[34].mxu0 }
 0x4f3   : > { %v3609_v38 = vadd.f32 %v3608_v7, %v3607_v27  ;;  %v3610_v62 = vpop.f32.mrb[34].mxu1  ;;  %v3547_v28 = vpop.f32.mrb[35].mxu0  ;;  %v2924_v7 = vmul.f32 %v2908_v58, %v6386_v21  ;;  %v2911_v21 = vld [vmem:[#allocation15 + $0x38] sm:$0xff] }
 0x4f4   : > { %v3611_v33 = vpop.f32.mrb[35].mxu1  ;;  %v3548_v53 = vadd.f32 %v3547_v28, %v3546_v39  ;;  %v2925_v39 = vmul.f32 %v2909_v50, %v6388_v10 }
 0x4f5   : > { %v2842_v3 = vadd.f32 %v3609_v38, %v3545_v8  ;;  %v3612_v54 = vadd.f32 %v3611_v33, %v3610_v62 }
 0x4f7   : > { %v2936_v18 = vmul.f32 %v2920_v52, %v2842_v3  ;;  %v2845_v36 = vadd.f32 %v3612_v54, %v3548_v53  ;;  %v2910_v53 = vld [vmem:[#allocation15 + $0x30] sm:$0xff] }
 0x4f8   : > { %v3549_v40 = vpop.f32.mrb[36].mxu0 }
 0x4f9   : > { %v2937_v37 = vmul.f32 %v2921_v9, %v2845_v36  ;;  %v3613_v41 = vpop.f32.mrb[36].mxu1  ;;  %v3550_v23 = vpop.f32.mrb[37].mxu0 }
 0x4fa   : > { %v3614_v47 = vpop.f32.mrb[37].mxu1  ;;  %v3551_v46 = vadd.f32 %v3550_v23, %v3549_v40  ;;  %v3552_v16 = vpop.f32.mrb[38].mxu0 }
 0x4fb   : > { %v2952_v44 = vadd.f32 %v2937_v37, %v2936_v18  ;;  %v3615_v43 = vadd.f32 %v3614_v47, %v3613_v41  ;;  %v3616_v51 = vpop.f32.mrb[38].mxu1  ;;  %v3553_v6 = vpop.f32.mrb[39].mxu0  ;;  %v2926_v47 = vmul.f32 %v2910_v53, %v6390_v14  ;;  %v2913_v14 = vld [vmem:[#allocation15 + $0x48] sm:$0xff] }
 0x4fc   : > { %v3617_v59 = vpop.f32.mrb[39].mxu1  ;;  %v3554_v19 = vadd.f32 %v3553_v6, %v3552_v16 }
 0x4fd   : > { %v2850_v2 = vadd.f32 %v3615_v43, %v3551_v46  ;;  %v3618_v13 = vadd.f32 %v3617_v59, %v3616_v51  ;;  %v2927_v43 = vmul.f32 %v2911_v21, %v6392_v35  ;;  %v2916_v21 = vld [vmem:[#allocation15 + $0x60] sm:$0xff] }
 0x4ff   : > { %v2938_v22 = vmul.f32 %v2922_v1, %v2850_v2  ;;  %v2853_v26 = vadd.f32 %v3618_v13, %v3554_v19  ;;  %v2912_v2 = vld [vmem:[#allocation15 + $0x40] sm:$0xff] }
 0x500   : > { %v3555_v15 = vpop.f32.mrb[40].mxu0  ;;  %v2928_v58 = vmul.f32 %v2912_v2, %v6394_v25  ;;  %v2915_v25 = vld [vmem:[#allocation15 + $0x58] sm:$0xff] }
 0x501   : > { %v2953_v48 = vadd.f32 %v2952_v44, %v2938_v22  ;;  %v2939_v56 = vmul.f32 %v2923_v12, %v2853_v26  ;;  %v3619_v55 = vpop.f32.mrb[40].mxu1  ;;  %v3556_v60 = vpop.f32.mrb[41].mxu0 }
 0x502   : > { %v3620_v29 = vpop.f32.mrb[41].mxu1  ;;  %v3557_v11 = vadd.f32 %v3556_v60, %v3555_v15  ;;  %v3558_v24 = vpop.f32.mrb[42].mxu0 }
 0x503   : > { %v2954_v30 = vadd.f32 %v2953_v48, %v2939_v56  ;;  %v3621_v17 = vadd.f32 %v3620_v29, %v3619_v55  ;;  %v3622_v27 = vpop.f32.mrb[42].mxu1  ;;  %v3559_v61 = vpop.f32.mrb[43].mxu0 }
 0x504   : > { %v3623_v63 = vpop.f32.mrb[43].mxu1  ;;  %v3560_v8 = vadd.f32 %v3559_v61, %v3558_v24 }
 0x505   : > { %v2858_v49 = vadd.f32 %v3621_v17, %v3557_v11  ;;  %v3624_v38 = vadd.f32 %v3623_v63, %v3622_v27  ;;  %v2914_v63 = vld [vmem:[#allocation15 + $0x50] sm:$0xff] }
 0x507   : > { %v2940_v62 = vmul.f32 %v2924_v7, %v2858_v49  ;;  %v2861_v0 = vadd.f32 %v3624_v38, %v3560_v8 }
 0x508   : > { %v3561_v52 = vpop.f32.mrb[44].mxu0 }
 0x509   : > { %v2955_v28 = vadd.f32 %v2954_v30, %v2940_v62  ;;  %v2941_v33 = vmul.f32 %v2925_v39, %v2861_v0  ;;  %v3625_v3 = vpop.f32.mrb[44].mxu1  ;;  %v3562_v54 = vpop.f32.mrb[45].mxu0  ;;  %v2929_v30 = vmul.f32 %v2913_v14, %v6396_v34 }
 0x50a   : > { %v3626_v9 = vpop.f32.mrb[45].mxu1  ;;  %v3563_v36 = vadd.f32 %v3562_v54, %v3561_v52  ;;  %v3564_v40 = vpop.f32.mrb[46].mxu0  ;;  %v2930_v52 = vmul.f32 %v2914_v63, %v6398_v32  ;;  %v2931_v54 = vmul.f32 %v2915_v25, %v6400_v42  ;;  %v2917_v32 = vld [vmem:[#allocation15 + $0x68] sm:$0xff] }
 0x50b   : > { %v2956_v18 = vadd.f32 %v2955_v28, %v2941_v33  ;;  %v3627_v37 = vadd.f32 %v3626_v9, %v3625_v3  ;;  %v3628_v41 = vpop.f32.mrb[46].mxu1  ;;  %v3565_v45 = vpop.f32.mrb[47].mxu0 }
 0x50c   : > { %v3629_v23 = vpop.f32.mrb[47].mxu1  ;;  %v3566_v44 = vadd.f32 %v3565_v45, %v3564_v40 }
 0x50d   : > { %v2866_v10 = vadd.f32 %v3627_v37, %v3563_v36  ;;  %v3630_v46 = vadd.f32 %v3629_v23, %v3628_v41 }
 0x50f   : > { %v2942_v16 = vmul.f32 %v2926_v47, %v2866_v10  ;;  %v2869_v51 = vadd.f32 %v3630_v46, %v3566_v44 }
 0x510   : > { %v3567_v59 = vpop.f32.mrb[48].mxu0 }
 0x511   : > { %v2957_v57 = vadd.f32 %v2956_v18, %v2942_v16  ;;  %v2943_v6 = vmul.f32 %v2927_v43, %v2869_v51  ;;  %v3631_v1 = vpop.f32.mrb[48].mxu1  ;;  %v3568_v19 = vpop.f32.mrb[49].mxu0 }
 0x512   : > { %v3632_v13 = vpop.f32.mrb[49].mxu1  ;;  %v3569_v22 = vadd.f32 %v3568_v19, %v3567_v59  ;;  %v3570_v48 = vpop.f32.mrb[50].mxu0 }
 0x513   : > { %v2958_v12 = vadd.f32 %v2957_v57, %v2943_v6  ;;  %v3633_v26 = vadd.f32 %v3632_v13, %v3631_v1  ;;  %v3634_v56 = vpop.f32.mrb[50].mxu1  ;;  %v3571_v15 = vpop.f32.mrb[51].mxu0  ;;  %v2932_v57 = vmul.f32 %v2916_v21, %v6402_v5  ;;  %v2933_v1 = vmul.f32 %v2917_v32, %v6404_v20  ;;  %v2919_v5 = vld [vmem:[#allocation15 + $0x78] sm:$0xff] }
 0x514   : > { %v3635_v55 = vpop.f32.mrb[51].mxu1  ;;  %v3572_v60 = vadd.f32 %v3571_v15, %v3570_v48  ;;  %v2918_v48 = vld [vmem:[#allocation15 + $0x70] sm:$0xff] }
 0x515   : > { %v2874_v35 = vadd.f32 %v3633_v26, %v3569_v22  ;;  %v3636_v29 = vadd.f32 %v3635_v55, %v3634_v56 }
 0x517   : > { %v2944_v11 = vmul.f32 %v2928_v58, %v2874_v35  ;;  %v2877_v17 = vadd.f32 %v3636_v29, %v3572_v60 }
 0x518   : > { %v3573_v50 = vpop.f32.mrb[52].mxu0 }
 0x519   : > { %v2959_v24 = vadd.f32 %v2958_v12, %v2944_v11  ;;  %v2945_v27 = vmul.f32 %v2929_v30, %v2877_v17  ;;  %v3637_v61 = vpop.f32.mrb[52].mxu1  ;;  %v3574_v7 = vpop.f32.mrb[53].mxu0  ;;  %v2934_v11 = vmul.f32 %v2918_v48, %v6406_v4  ;;  %v2973_v4 = vld [vmem:[%s6513_s8] sm:$0x1] }
 0x51a   : > { %v3638_v49 = vpop.f32.mrb[53].mxu1  ;;  %v3575_v38 = vadd.f32 %v3574_v7, %v3573_v50  ;;  %v3576_v62 = vpop.f32.mrb[54].mxu0 }
 0x51b   : > { %v2960_v8 = vadd.f32 %v2959_v24, %v2945_v27  ;;  %v3639_v39 = vadd.f32 %v3638_v49, %v3637_v61  ;;  %v3640_v0 = vpop.f32.mrb[54].mxu1  ;;  %v3577_v28 = vpop.f32.mrb[55].mxu0  ;;  %v2935_v27 = vmul.f32 %v2919_v5, %v6408_v31 }
 0x51c   : > { %v3641_v33 = vpop.f32.mrb[55].mxu1  ;;  %v3578_v3 = vadd.f32 %v3577_v28, %v3576_v62  ;;  %v2976_v28 = vstv %s2975_s30 }
 0x51d   : > { %v2882_v34 = vadd.f32 %v3639_v39, %v3575_v38  ;;  %v3642_v53 = vadd.f32 %v3641_v33, %v3640_v0 }
 0x51f   : > { %v2946_v9 = vmul.f32 %v2930_v52, %v2882_v34  ;;  %v2885_v18 = vadd.f32 %v3642_v53, %v3578_v3 }
 0x520   : > { %v3579_v40 = vpop.f32.mrb[56].mxu0 }
 0x521   : > { %v2961_v36 = vadd.f32 %v2960_v8, %v2946_v9  ;;  %v2947_v37 = vmul.f32 %v2931_v54, %v2885_v18  ;;  %v3643_v41 = vpop.f32.mrb[56].mxu1  ;;  %v3580_v45 = vpop.f32.mrb[57].mxu0 }
 0x522   : > { %v3644_v23 = vpop.f32.mrb[57].mxu1  ;;  %v3581_v10 = vadd.f32 %v3580_v45, %v3579_v40  ;;  %v3582_v46 = vpop.f32.mrb[58].mxu0 }
 0x523   : > { %v2962_v47 = vadd.f32 %v2961_v36, %v2947_v37  ;;  %v3645_v44 = vadd.f32 %v3644_v23, %v3643_v41  ;;  %v3646_v43 = vpop.f32.mrb[58].mxu1  ;;  %v3583_v16 = vpop.f32.mrb[59].mxu0 }
 0x524   : > { %v3647_v51 = vpop.f32.mrb[59].mxu1  ;;  %v3584_v6 = vadd.f32 %v3583_v16, %v3582_v46 }
 0x525   : > { %v2890_v42 = vadd.f32 %v3645_v44, %v3581_v10  ;;  %v3648_v59 = vadd.f32 %v3647_v51, %v3646_v43 }
 0x527   : > { %v2948_v2 = vmul.f32 %v2932_v57, %v2890_v42  ;;  %v2893_v19 = vadd.f32 %v3648_v59, %v3584_v6 }
 0x528   : > { %v3585_v22 = vpop.f32.mrb[60].mxu0 }
 0x529   : > { %v2963_v13 = vadd.f32 %v2962_v47, %v2948_v2  ;;  %v2949_v12 = vmul.f32 %v2933_v1, %v2893_v19  ;;  %v3649_v26 = vpop.f32.mrb[60].mxu1  ;;  %v3586_v56 = vpop.f32.mrb[61].mxu0 }
 0x52a   : > { %v3650_v14 = vpop.f32.mrb[61].mxu1  ;;  %v3587_v55 = vadd.f32 %v3586_v56, %v3585_v22  ;;  %v3588_v35 = vpop.f32.mrb[62].mxu0 }
 0x52b   : > { %v2964_v15 = vadd.f32 %v2963_v13, %v2949_v12  ;;  %v3651_v58 = vadd.f32 %v3650_v14, %v3649_v26  ;;  %v3652_v60 = vpop.f32.mrb[62].mxu1  ;;  %v3589_v29 = vpop.f32.mrb[63].mxu0 }
 0x52c   : > { %v3653_v30 = vpop.f32.mrb[63].mxu1  ;;  %v3590_v17 = vadd.f32 %v3589_v29, %v3588_v35 }
 0x52d   : > { %v2898_v20 = vadd.f32 %v3651_v58, %v3587_v55  ;;  %v3654_v24 = vadd.f32 %v3653_v30, %v3652_v60 }
 0x52f   : > { %v2950_v50 = vmul.f32 %v2934_v11, %v2898_v20  ;;  %v2901_v61 = vadd.f32 %v3654_v24, %v3590_v17 }
 0x531   : > { %v2965_v63 = vadd.f32 %v2964_v15, %v2950_v50  ;;  %v2951_v7 = vmul.f32 %v2935_v27, %v2901_v61 }
 0x533   : > { %v2966_v49 = vadd.f32 %v2965_v63, %v2951_v7 }
 0x535   : > { %v2967_v8 = vrot.slane %v2966_v49, 4 }
 0x537   : > { %v2968_v38 = vadd.f32 %v2967_v8, %v2966_v49 }
 0x539   : > { %v2969_v39 = vrot.slane %v2968_v38, 2 }
 0x53b   : > { %v2970_v62 = vadd.f32 %v2969_v39, %v2968_v38 }
 0x53d   : > { %v2971_v0 = vrot.slane %v2970_v62, 1 }
 0x53f   : > { %v2972_v25 = vadd.f32 %v2971_v0, %v2970_v62 }
 0x541   : > { %v2974_v33 = vmul.f32 %v2973_v4, %v2972_v25 }
 0x543   : > { %v2977_v52 = vmul.f32 %v2976_v28, %v2974_v33 }
 0x545   : > { %v3355_v31 = vmul.f32 -1.442695, %v2977_v52 }
 0x547   : > { %4027 = vpow2.f32 %v3355_v31 }
 0x551   : > { %v4028_v34 = vpop.eup %4027 }
 0x552   : > { %v2981_v3 = vadd.f32 1.0, %v4028_v34 }
 0x554   : > { %4029 = vrcp.f32 %v2981_v3 }
 0x55e   : > { %v4030_v53 = vpop.eup %4029 }
 0x55f   : > { %2984 = vst [vmem:[#allocation17] sm:$0x1] %v4030_v53 }
 0x560 PF: > { %p3875_p9 = scmp.eq.s32.totalorder %s4410_s0, 1  ;;  %s4321_s29 = smov [#allocation15]  }
 0x561   : > { %s3004_s17 = sshll.u32 %s4321_s29, 4  ;;  %s3005_s17 = int_to_ptr.vmem [resolvable:$true] %s3004_s17 }
 0x562   : > { %s4175_s12 = scalar_lea.vmem %s3005_s17, 2048  ;;  %p4182_p5 = scmp.lt.s32.totalorder %s3005_s17, %s3005_s17 }
 0x563   : > { %p4176_p11 = scmp.ne.s32.totalorder %s3005_s17, %s4175_s12  ;;  %p4183_p6 = scmp.lt.s32.totalorder %s4175_s12, %s4175_s12 }
 0x565   : > { %p4177_p7 = pnand %p4176_p11, %p3875_p9  ;;  %p4184_p2 = por %p4183_p6, %p4182_p5 }
 0x567   : > { %p4178_p1 = pneg %p4177_p7 }
 0x569   : > { %p4185_p4 = pnand %p4184_p2, %p4178_p1 }
 0x56b   : > { %4188 = shalt.err (!%p4185_p4)
}
 0x56c   : > { %s4189_s27 = scalar_lea.hbm %s6515_s10, 2048 }
 0x56d   : > { %p4190_p8 = scmp.ne.s32.totalorder %s6515_s10, %s4189_s27  ;;  %p4195_p13 = scmp.lt.u32.totalorder %s4189_s27, %s6515_s10 }
 0x56f   : > { %p4191_p10 = pnand %p4190_p8, %p3875_p9 }
 0x571   : > { %p4192_p12 = pneg %p4191_p10 }
 0x573   : > { %p4197_p0 = pnand %p4195_p13, %p4192_p12 }
 0x575   : > { %4200 = shalt.err (!%p4197_p0)
}
 0x576   : > { %s4322_s22 = smov 128   ;;  %s4323_s1 = smov 8  }
 0x577   : > { %3842 = dma.vmem_to_hbm [thread:$0]  (%p3875_p9), %s3005_s17, 2048, %s6515_s10, [#allocation16], %s4322_s22, %s4322_s22, %s4323_s1  }
 0x578   : > { %s4324_s24 = smov [#allocation14]  }
 0x579   : > { %s2991_s9 = sshll.u32 %s4324_s24, 4  ;;  %s2992_s9 = int_to_ptr.vmem [resolvable:$true] %s2991_s9 }
 0x57a   : > { %s4201_s16 = scalar_lea.vmem %s2992_s9, 8192  ;;  %p4208_p1 = scmp.lt.s32.totalorder %s2992_s9, %s2992_s9 }
 0x57b   : > { %p4202_p3 = scmp.ne.s32.totalorder %s2992_s9, %s4201_s16  ;;  %p4209_p5 = scmp.lt.s32.totalorder %s4201_s16, %s4201_s16 }
 0x57d   : > { %p4203_p11 = pnand %p4202_p3, %p3875_p9  ;;  %p4210_p6 = por %p4209_p5, %p4208_p1 }
 0x57f   : > { %p4204_p7 = pneg %p4203_p11 }
 0x581   : > { %p4211_p2 = pnand %p4210_p6, %p4204_p7 }
 0x583   : > { %4214 = shalt.err (!%p4211_p2)
}
 0x584   : > { %s6936_s26 = sld [smem:[#allocation101_spill]] }
 0x58a   : > { %s4215_s29 = scalar_lea.hbm %s6936_s26, 8192 }
 0x58b   : > { %p4216_p4 = scmp.ne.s32.totalorder %s6936_s26, %s4215_s29  ;;  %p4221_p12 = scmp.lt.u32.totalorder %s4215_s29, %s6936_s26 }
 0x58d   : > { %p4217_p8 = pnand %p4216_p4, %p3875_p9 }
 0x58f   : > { %p4218_p10 = pneg %p4217_p8 }
 0x591   : > { %p4223_p13 = pnand %p4221_p12, %p4218_p10 }
 0x593   : > { %4226 = shalt.err (!%p4223_p13)
}
 0x594   : > { %s4325_s27 = smov 512   ;;  %s4326_s11 = smov 32  }
 0x595   : > { %3840 = dma.vmem_to_hbm [thread:$0]  (%p3875_p9), %s2992_s9, 8192, %s6936_s26, [#allocation7], %s4325_s27, %s4325_s27, %s4326_s11  }
 0x596   : > { %s4327_s28 = smov [#allocation17]  }
 0x597   : > { %s3018_s22 = sshll.u32 %s4327_s28, 4  ;;  %s3019_s22 = int_to_ptr.vmem [resolvable:$true] %s3018_s22 }
 0x598   : > { %s4227_s1 = scalar_lea.vmem %s3019_s22, 16  ;;  %s4233_s3 = scalar_lea.vmem %s3019_s22, 32 }
 0x599   : > { %p4228_p0 = scmp.ne.s32.totalorder %s3019_s22, %s4227_s1  ;;  %p4234_p7 = scmp.lt.s32.totalorder %s3019_s22, %s3019_s22 }
 0x59a   : > { %p4235_p1 = scmp.lt.s32.totalorder %s4233_s3, %s4227_s1 }
 0x59b   : > { %p4229_p3 = pnand %p4228_p0, %p3875_p9 }
 0x59c   : > { %p4236_p5 = por %p4235_p1, %p4234_p7 }
 0x59d   : > { %p4230_p11 = pneg %p4229_p3 }
 0x59f   : > { %p4237_p6 = pnand %p4236_p5, %p4230_p11 }
 0x5a1   : > { %4240 = shalt.err (!%p4237_p6)
}
 0x5a2   : > { %s6937_s16 = sld [smem:[#allocation102_spill]] }
 0x5a8   : > { %s4241_s30 = scalar_lea.hbm %s6937_s16, 16 }
 0x5a9   : > { %p4242_p2 = scmp.ne.s32.totalorder %s6937_s16, %s4241_s30  ;;  %p4247_p10 = scmp.lt.u32.totalorder %s4241_s30, %s6937_s16 }
 0x5ab   : > { %p4243_p4 = pnand %p4242_p2, %p3875_p9 }
 0x5ad   : > { %p4244_p8 = pneg %p4243_p4 }
 0x5af   : > { %p4249_p12 = pnand %p4247_p10, %p4244_p8 }
 0x5b1   : > { %4252 = shalt.err (!%p4249_p12)
}
 0x5b2   : > { %3844 = dma.vmem_to_hbm [thread:$0]  (%p3875_p9), %s3019_s22, 16, %s6937_s16, [#allocation16]  }
 0x5b3   : > { %4286 = dma.done.wait (%p3875_p9), [#allocation7], 8192  }
 0x5b4   : > { %4288 = vsyncadd (%p3875_p9), [#allocation7], 4294959104 }
 0x5b5   : > { %4290 = dma.done.wait (%p3875_p9), [#allocation16], 2064  }
 0x5b6   : > { %4292 = vsyncadd (%p3875_p9), [#allocation16], 4294965232 }
 0x5b7 PF: > { %p29_p13 = scmp.ge.s32.totalorder %s4522_s18, 4   ;;  %s6938_s19 = smov %s4299_s20 }
 0x5b8   : > { %s6939_s20 = smov %s4303_s21  ;;  %s6940_s21 = smov %s4532_s14 }
 0x5b9   : > { %s6941_s22 = smov %s4522_s18  ;;  %31 = sbr.rel (!%p29_p13) target bundleno = 15 (0xf), region = 142 }
 0x5c0   :  { %3039 = vsyncpa [#allocation6], 1 }
 0x5c1   :  { %3041 = vsyncpa [#allocation6 + $0x1], 1 }
 0x5c2   :  { %3042 = vsyncpa [#allocation9], 1 }
 0x5c3   :  { %3044 = vsyncpa [#allocation9 + $0x1], 1 }
 0x5c4   :  { %3045 = vsyncpa [#allocation12], 1 }
 0x5c5   :  { %3046 = vsyncpa [#allocation7], 1 }
 0x5c6   :  { %3048 = vsyncpa [#allocation7 + $0x1], 1 }
 0x5c7   :  { %3049 = vsyncpa [#allocation16], 1 }

</bundles_post_ra>
